<compile_context>
chip_gen: v6e
topology: v6e:2x2x1
jax: 0.10.0
libtpu: 0.0.40
codegen_flags: <defaults>
</compile_context>

<pallas_src>
import functools
import math

import jax
import jax.numpy as jnp
from jax.experimental import pallas as pl
from jax.experimental.pallas import tpu as pltpu

GRID_SIZE = 5   # cfg.grid
SPLINE_K  = 3   # cfg.k
LN_EPS    = 1e-5


# ----------------------------------------------------------------------------
# Host-side helpers
# ----------------------------------------------------------------------------
def _round_up(n, m):
    return (n + m - 1) // m * m


def _knot_vector(grid_size=GRID_SIZE, k=SPLINE_K):
    """Uniform extended knot vector over [-1, 1] (Python floats -> closure consts)."""
    h = 2.0 / grid_size
    return tuple(float(i) * h - 1.0 for i in range(-k, grid_size + k + 1))


def _stack_weight_t(base_w, spline_w, basis_scale):
    """Transposed stacked weight (O, (S+1)*D): row block 0 = base path, block 1+s = B_s.

    The B-spline normalisation constant 1/(k! * h^k) (dropped from the in-kernel
    recursion) is folded into the spline weights here.
    """
    D, S, O = spline_w.shape
    sw = spline_w * basis_scale
    stacked = jnp.concatenate(
        [base_w, jnp.transpose(sw, (1, 0, 2)).reshape(S * D, O)], axis=0)
    return stacked.T                                   # (O, (S+1)*D)


# ----------------------------------------------------------------------------
# Fused kernel (transposed / feature-major layout, batch on lanes)
# ----------------------------------------------------------------------------
def _make_fused_kernel(n_layers, knots, k, eps):
    W = len(knots)

    def features_t(xt):
        """xt: (D, T) -> [silu ; b_0 ; ... ; b_{S-1}] stacked on sublanes: ((S+1)*D, T).

        Uniform-knot Cox–de Boor, un-normalised (constants folded into weights):
          b_p[j] = d[j]*b_{p-1}[j] - d[j+p+1]*b_{p-1}[j+1],   d[m] = x - t_m.
        """
        silu = xt * jax.nn.sigmoid(xt)                       # EUP sigmoid
        d = [xt - knots[m] for m in range(W)]                # 12 subs
        ge = [(d[m] >= 0.0).astype(jnp.float32) for m in range(W)]
        b = [ge[j] - ge[j + 1] for j in range(W - 1)]        # half-open intervals
        for p in range(1, k + 1):
            b = [d[j] * b[j] - d[j + p + 1] * b[j + 1]
                 for j in range(W - 1 - p)]
        return jnp.concatenate([silu] + b, axis=0)           # sublane-aligned concat

    def kernel(*refs):
        # refs = [x_t, (Wt, gamma, beta) * (L-1), Wt_last, out]
        x_ref = refs[0]
        idx = 1
        layer_params = []
        for li in range(n_layers):
            if li < n_layers - 1:
                layer_params.append((refs[idx], refs[idx + 1], refs[idx + 2]))
                idx += 3
            else:
                layer_params.append((refs[idx], None, None))
                idx += 1
        o_ref = refs[idx]

        h = x_ref[...]                                        # (D0, T) f32
        for li in range(n_layers):
            wt_ref, g_ref, b_ref = layer_params[li]
            feats = features_t(h)                             # ((S+1)*D, T)
            # single MXU matmul per layer: (O, (S+1)*D) @ ((S+1)*D, T)
            h = jnp.dot(wt_ref[...], feats,
                        preferred_element_type=jnp.float32)   # (O, T)
            if g_ref is not None:                             # LayerNorm over features
                mu = jnp.mean(h, axis=0, keepdims=True)
                var = jnp.mean(jnp.square(h - mu), axis=0, keepdims=True)
                h = (h - mu) * jax.lax.rsqrt(var + eps) * g_ref[...] + b_ref[...]
                # dropout -> identity (eval mode)
        o_ref[...] = h

    return kernel


# ----------------------------------------------------------------------------
# Wrapper: one pallas_call for the whole model, batch (lanes) tiled over a grid
# ----------------------------------------------------------------------------
def kan_model_forward(x, params, *, grid_size=GRID_SIZE, k=SPLINE_K, tile_n=1024):
    x = x.astype(jnp.float32)                                 # matches x.float()
    N, D0 = x.shape
    n_layers = len(params)
    knots = _knot_vector(grid_size, k)
    h_knot = 2.0 / grid_size
    basis_scale = 1.0 / (math.factorial(k) * h_knot ** k)     # folded into weights

    stacked = [_stack_weight_t(p["base_w"], p["spline_w"], basis_scale)
               for p in params]
    out_dim = stacked[-1].shape[0]
    out_pad = _round_up(out_dim, 8)                           # aligned final store
    if out_pad != out_dim:
        stacked[-1] = jnp.pad(stacked[-1], ((0, out_pad - out_dim), (0, 0)))

    # batch/lane tiling: multiple of 128; keep >= 2 grid steps when N > 128
    # so the "parallel" axis can use both v7x TensorCores.
    tn = _round_up(max(min(tile_n, -(-N // 2)), 1), 128)
    Np = _round_up(N, tn)

    xt = jnp.pad(x.T, ((0, 0), (0, Np - N)))                  # (D0, Np)

    inputs = [xt]
    in_specs = [pl.BlockSpec((D0, tn), lambda i: (0, i))]
    for li, (p, w) in enumerate(zip(params, stacked)):
        inputs.append(w)
        in_specs.append(pl.BlockSpec(w.shape, lambda i: (0, 0)))      # VMEM-resident
        if li < n_layers - 1:
            g = p["gamma"].reshape(-1, 1).astype(jnp.float32)          # (O, 1)
            b = p["beta"].reshape(-1, 1).astype(jnp.float32)
            inputs += [g, b]
            in_specs += [pl.BlockSpec(g.shape, lambda i: (0, 0)),
                         pl.BlockSpec(b.shape, lambda i: (0, 0))]

    kern = _make_fused_kernel(n_layers, knots, k, LN_EPS)
    out_t = pl.pallas_call(
        kern,
        out_shape=jax.ShapeDtypeStruct((out_pad, Np), jnp.float32),
        grid=(Np // tn,),
        in_specs=in_specs,
        out_specs=pl.BlockSpec((out_pad, tn), lambda i: (0, i)),
        compiler_params=pltpu.CompilerParams(
            dimension_semantics=("parallel",),
            vmem_limit_bytes=32 * 1024 * 1024),
    )(*inputs)
    return out_t[:out_dim, :N].T                              # (N, out_dim)


# ----------------------------------------------------------------------------
# Parameter setup (efficient-KAN shapes)
# ----------------------------------------------------------------------------
def make_params(key, dims, grid_size=GRID_SIZE, k=SPLINE_K):
    S = grid_size + k
    base_knots = jnp.asarray(_knot_vector(grid_size, k), jnp.float32)
    params = []
    for din, dout in zip(dims[:-1], dims[1:]):
        key, k1, k2 = jax.random.split(key, 3)
        base_w = jax.random.normal(k1, (din, dout), jnp.float32) / jnp.sqrt(
            jnp.float32(din))
        spline_w = jax.random.normal(k2, (din, S, dout), jnp.float32) * 0.1
        knots = jnp.tile(base_knots[None, :], (din, 1))        # (din, G+2k+1)
        params.append(dict(
            knots=knots, base_w=base_w, spline_w=spline_w,
            gamma=jnp.ones((dout,), jnp.float32),
            beta=jnp.zeros((dout,), jnp.float32)))
    return params


# ----------------------------------------------------------------------------
# Pure-JAX reference (standard normalized Cox–de Boor with divides)
# ----------------------------------------------------------------------------
def _kan_linear_ref(x, knots, base_w, spline_w, k):
    silu = x * jax.nn.sigmoid(x)
    base = silu @ base_w
    g = knots[None]                                            # (1, D, W)
    xe = x[:, :, None]                                         # (N, D, 1)
    b = ((xe >= g[:, :, :-1]) & (xe < g[:, :, 1:])).astype(x.dtype)
    for p in range(1, k + 1):
        b = ((xe - g[:, :, : -(p + 1)]) /
             (g[:, :, p:-1] - g[:, :, : -(p + 1)]) * b[:, :, :-1] +
             (g[:, :, p + 1:] - xe) /
             (g[:, :, p + 1:] - g[:, :, 1:-p]) * b[:, :, 1:])
    spline = jnp.einsum("nds,dso->no", b, spline_w)
    return base + spline


def _model_ref(x, params, k=SPLINE_K):
    x = x.astype(jnp.float32)
    n = len(params)
    for li, p in enumerate(params):
        x = _kan_linear_ref(x, p["knots"], p["base_w"], p["spline_w"], k)
        if li < n - 1:
            mu = jnp.mean(x, axis=-1, keepdims=True)
            var = jnp.mean(jnp.square(x - mu), axis=-1, keepdims=True)
            x = (x - mu) * jax.lax.rsqrt(var + LN_EPS) * p["gamma"] + p["beta"]
    return x


# ----------------------------------------------------------------------------
if __name__ == "__main__":
    key = jax.random.PRNGKey(0)
    k_x, k_p = jax.random.split(key)

    in_dim, hidden_dims, batch = 8, [32], 300
    dims = [in_dim] + hidden_dims + [3]

    x = jax.random.uniform(k_x, (batch, in_dim), jnp.float32,
                           minval=-1.0, maxval=1.0)
    params = make_params(k_p, dims)

    fwd = jax.jit(functools.partial(kan_model_forward))       # 2 grid steps + padding path
    out = jax.block_until_ready(fwd(x, params))

    ref = _model_ref(x, params)
    assert out.shape == (batch, 3) and out.dtype == jnp.float32
    assert jnp.allclose(out, ref, atol=1e-4, rtol=1e-4), float(
        jnp.max(jnp.abs(out - ref)))

    print("KERNEL_OK")
</pallas_src>

<mosaic_0001>
module attributes {stable_mosaic.version = 11 : i64} {
  func.func @kernel(%arg0: i32, %arg1: memref<8x256xf32, #tpu.memory_space<vmem>>, %arg2: memref<32x72xf32, #tpu.memory_space<vmem>>, %arg3: memref<32x1xf32, #tpu.memory_space<vmem>>, %arg4: memref<32x1xf32, #tpu.memory_space<vmem>>, %arg5: memref<8x288xf32, #tpu.memory_space<vmem>>, %arg6: memref<8x256xf32, #tpu.memory_space<vmem>>) attributes {dimension_semantics = [#tpu.dimension_semantics<parallel>], iteration_bounds = array<i64: 2>, scalar_prefetch = 0 : i64, scratch_operands = 0 : i64, tpu.core_type = #tpu.core_type<tc>, window_params = [{transform_indices = @transform_0, window_bounds = array<i64: 8, 256>}, {pipeline_mode = #tpu.pipeline_mode<synchronous>, transform_indices = @transform_1, window_bounds = array<i64: 32, 72>}, {pipeline_mode = #tpu.pipeline_mode<synchronous>, transform_indices = @transform_2, window_bounds = array<i64: 32, 1>}, {pipeline_mode = #tpu.pipeline_mode<synchronous>, transform_indices = @transform_3, window_bounds = array<i64: 32, 1>}, {pipeline_mode = #tpu.pipeline_mode<synchronous>, transform_indices = @transform_4, window_bounds = array<i64: 8, 288>}, {transform_indices = @transform_5, window_bounds = array<i64: 8, 256>}]} {
    %c0 = arith.constant 0 : index
    %c0_0 = arith.constant 0 : index
    %0 = vector.load %arg1[%c0, %c0_0] : memref<8x256xf32, #tpu.memory_space<vmem>>, vector<8x256xf32>
    %1 = arith.negf %0 : vector<8x256xf32>
    %2 = math.exp %1 : vector<8x256xf32>
    %cst = arith.constant 1.000000e+00 : f32
    %3 = vector.broadcast %cst : f32 to vector<8x256xf32>
    %4 = arith.addf %3, %2 : vector<8x256xf32>
    %5 = arith.divf %3, %4 : vector<8x256xf32>
    %6 = arith.mulf %0, %5 : vector<8x256xf32>
    %cst_1 = arith.constant -2.200000e+00 : f32
    %7 = vector.broadcast %cst_1 : f32 to vector<8x256xf32>
    %8 = arith.subf %0, %7 : vector<8x256xf32>
    %cst_2 = arith.constant -1.800000e+00 : f32
    %9 = vector.broadcast %cst_2 : f32 to vector<8x256xf32>
    %10 = arith.subf %0, %9 : vector<8x256xf32>
    %cst_3 = arith.constant -1.400000e+00 : f32
    %11 = vector.broadcast %cst_3 : f32 to vector<8x256xf32>
    %12 = arith.subf %0, %11 : vector<8x256xf32>
    %cst_4 = arith.constant -1.000000e+00 : f32
    %13 = vector.broadcast %cst_4 : f32 to vector<8x256xf32>
    %14 = arith.subf %0, %13 : vector<8x256xf32>
    %cst_5 = arith.constant -6.000000e-01 : f32
    %15 = vector.broadcast %cst_5 : f32 to vector<8x256xf32>
    %16 = arith.subf %0, %15 : vector<8x256xf32>
    %cst_6 = arith.constant -2.000000e-01 : f32
    %17 = vector.broadcast %cst_6 : f32 to vector<8x256xf32>
    %18 = arith.subf %0, %17 : vector<8x256xf32>
    %cst_7 = arith.constant 2.000000e-01 : f32
    %19 = vector.broadcast %cst_7 : f32 to vector<8x256xf32>
    %20 = arith.subf %0, %19 : vector<8x256xf32>
    %cst_8 = arith.constant 6.000000e-01 : f32
    %21 = vector.broadcast %cst_8 : f32 to vector<8x256xf32>
    %22 = arith.subf %0, %21 : vector<8x256xf32>
    %cst_9 = arith.constant 1.000000e+00 : f32
    %23 = vector.broadcast %cst_9 : f32 to vector<8x256xf32>
    %24 = arith.subf %0, %23 : vector<8x256xf32>
    %cst_10 = arith.constant 1.400000e+00 : f32
    %25 = vector.broadcast %cst_10 : f32 to vector<8x256xf32>
    %26 = arith.subf %0, %25 : vector<8x256xf32>
    %cst_11 = arith.constant 1.800000e+00 : f32
    %27 = vector.broadcast %cst_11 : f32 to vector<8x256xf32>
    %28 = arith.subf %0, %27 : vector<8x256xf32>
    %cst_12 = arith.constant 2.200000e+00 : f32
    %29 = vector.broadcast %cst_12 : f32 to vector<8x256xf32>
    %30 = arith.subf %0, %29 : vector<8x256xf32>
    %cst_13 = arith.constant 0.000000e+00 : f32
    %31 = vector.broadcast %cst_13 : f32 to vector<8x256xf32>
    %32 = arith.cmpf oge, %8, %31 : vector<8x256xf32>
    %33 = arith.extui %32 : vector<8x256xi1> to vector<8x256xi32>
    %34 = arith.sitofp %33 : vector<8x256xi32> to vector<8x256xf32>
    %cst_14 = arith.constant 0.000000e+00 : f32
    %35 = vector.broadcast %cst_14 : f32 to vector<8x256xf32>
    %36 = arith.cmpf oge, %10, %35 : vector<8x256xf32>
    %37 = arith.extui %36 : vector<8x256xi1> to vector<8x256xi32>
    %38 = arith.sitofp %37 : vector<8x256xi32> to vector<8x256xf32>
    %cst_15 = arith.constant 0.000000e+00 : f32
    %39 = vector.broadcast %cst_15 : f32 to vector<8x256xf32>
    %40 = arith.cmpf oge, %12, %39 : vector<8x256xf32>
    %41 = arith.extui %40 : vector<8x256xi1> to vector<8x256xi32>
    %42 = arith.sitofp %41 : vector<8x256xi32> to vector<8x256xf32>
    %cst_16 = arith.constant 0.000000e+00 : f32
    %43 = vector.broadcast %cst_16 : f32 to vector<8x256xf32>
    %44 = arith.cmpf oge, %14, %43 : vector<8x256xf32>
    %45 = arith.extui %44 : vector<8x256xi1> to vector<8x256xi32>
    %46 = arith.sitofp %45 : vector<8x256xi32> to vector<8x256xf32>
    %cst_17 = arith.constant 0.000000e+00 : f32
    %47 = vector.broadcast %cst_17 : f32 to vector<8x256xf32>
    %48 = arith.cmpf oge, %16, %47 : vector<8x256xf32>
    %49 = arith.extui %48 : vector<8x256xi1> to vector<8x256xi32>
    %50 = arith.sitofp %49 : vector<8x256xi32> to vector<8x256xf32>
    %cst_18 = arith.constant 0.000000e+00 : f32
    %51 = vector.broadcast %cst_18 : f32 to vector<8x256xf32>
    %52 = arith.cmpf oge, %18, %51 : vector<8x256xf32>
    %53 = arith.extui %52 : vector<8x256xi1> to vector<8x256xi32>
    %54 = arith.sitofp %53 : vector<8x256xi32> to vector<8x256xf32>
    %cst_19 = arith.constant 0.000000e+00 : f32
    %55 = vector.broadcast %cst_19 : f32 to vector<8x256xf32>
    %56 = arith.cmpf oge, %20, %55 : vector<8x256xf32>
    %57 = arith.extui %56 : vector<8x256xi1> to vector<8x256xi32>
    %58 = arith.sitofp %57 : vector<8x256xi32> to vector<8x256xf32>
    %cst_20 = arith.constant 0.000000e+00 : f32
    %59 = vector.broadcast %cst_20 : f32 to vector<8x256xf32>
    %60 = arith.cmpf oge, %22, %59 : vector<8x256xf32>
    %61 = arith.extui %60 : vector<8x256xi1> to vector<8x256xi32>
    %62 = arith.sitofp %61 : vector<8x256xi32> to vector<8x256xf32>
    %cst_21 = arith.constant 0.000000e+00 : f32
    %63 = vector.broadcast %cst_21 : f32 to vector<8x256xf32>
    %64 = arith.cmpf oge, %24, %63 : vector<8x256xf32>
    %65 = arith.extui %64 : vector<8x256xi1> to vector<8x256xi32>
    %66 = arith.sitofp %65 : vector<8x256xi32> to vector<8x256xf32>
    %cst_22 = arith.constant 0.000000e+00 : f32
    %67 = vector.broadcast %cst_22 : f32 to vector<8x256xf32>
    %68 = arith.cmpf oge, %26, %67 : vector<8x256xf32>
    %69 = arith.extui %68 : vector<8x256xi1> to vector<8x256xi32>
    %70 = arith.sitofp %69 : vector<8x256xi32> to vector<8x256xf32>
    %cst_23 = arith.constant 0.000000e+00 : f32
    %71 = vector.broadcast %cst_23 : f32 to vector<8x256xf32>
    %72 = arith.cmpf oge, %28, %71 : vector<8x256xf32>
    %73 = arith.extui %72 : vector<8x256xi1> to vector<8x256xi32>
    %74 = arith.sitofp %73 : vector<8x256xi32> to vector<8x256xf32>
    %cst_24 = arith.constant 0.000000e+00 : f32
    %75 = vector.broadcast %cst_24 : f32 to vector<8x256xf32>
    %76 = arith.cmpf oge, %30, %75 : vector<8x256xf32>
    %77 = arith.extui %76 : vector<8x256xi1> to vector<8x256xi32>
    %78 = arith.sitofp %77 : vector<8x256xi32> to vector<8x256xf32>
    %79 = arith.subf %34, %38 : vector<8x256xf32>
    %80 = arith.subf %38, %42 : vector<8x256xf32>
    %81 = arith.subf %42, %46 : vector<8x256xf32>
    %82 = arith.subf %46, %50 : vector<8x256xf32>
    %83 = arith.subf %50, %54 : vector<8x256xf32>
    %84 = arith.subf %54, %58 : vector<8x256xf32>
    %85 = arith.subf %58, %62 : vector<8x256xf32>
    %86 = arith.subf %62, %66 : vector<8x256xf32>
    %87 = arith.subf %66, %70 : vector<8x256xf32>
    %88 = arith.subf %70, %74 : vector<8x256xf32>
    %89 = arith.subf %74, %78 : vector<8x256xf32>
    %90 = arith.mulf %8, %79 : vector<8x256xf32>
    %91 = arith.mulf %12, %80 : vector<8x256xf32>
    %92 = arith.subf %90, %91 : vector<8x256xf32>
    %93 = arith.mulf %10, %80 : vector<8x256xf32>
    %94 = arith.mulf %14, %81 : vector<8x256xf32>
    %95 = arith.subf %93, %94 : vector<8x256xf32>
    %96 = arith.mulf %12, %81 : vector<8x256xf32>
    %97 = arith.mulf %16, %82 : vector<8x256xf32>
    %98 = arith.subf %96, %97 : vector<8x256xf32>
    %99 = arith.mulf %14, %82 : vector<8x256xf32>
    %100 = arith.mulf %18, %83 : vector<8x256xf32>
    %101 = arith.subf %99, %100 : vector<8x256xf32>
    %102 = arith.mulf %16, %83 : vector<8x256xf32>
    %103 = arith.mulf %20, %84 : vector<8x256xf32>
    %104 = arith.subf %102, %103 : vector<8x256xf32>
    %105 = arith.mulf %18, %84 : vector<8x256xf32>
    %106 = arith.mulf %22, %85 : vector<8x256xf32>
    %107 = arith.subf %105, %106 : vector<8x256xf32>
    %108 = arith.mulf %20, %85 : vector<8x256xf32>
    %109 = arith.mulf %24, %86 : vector<8x256xf32>
    %110 = arith.subf %108, %109 : vector<8x256xf32>
    %111 = arith.mulf %22, %86 : vector<8x256xf32>
    %112 = arith.mulf %26, %87 : vector<8x256xf32>
    %113 = arith.subf %111, %112 : vector<8x256xf32>
    %114 = arith.mulf %24, %87 : vector<8x256xf32>
    %115 = arith.mulf %28, %88 : vector<8x256xf32>
    %116 = arith.subf %114, %115 : vector<8x256xf32>
    %117 = arith.mulf %26, %88 : vector<8x256xf32>
    %118 = arith.mulf %30, %89 : vector<8x256xf32>
    %119 = arith.subf %117, %118 : vector<8x256xf32>
    %120 = arith.mulf %8, %92 : vector<8x256xf32>
    %121 = arith.mulf %14, %95 : vector<8x256xf32>
    %122 = arith.subf %120, %121 : vector<8x256xf32>
    %123 = arith.mulf %10, %95 : vector<8x256xf32>
    %124 = arith.mulf %16, %98 : vector<8x256xf32>
    %125 = arith.subf %123, %124 : vector<8x256xf32>
    %126 = arith.mulf %12, %98 : vector<8x256xf32>
    %127 = arith.mulf %18, %101 : vector<8x256xf32>
    %128 = arith.subf %126, %127 : vector<8x256xf32>
    %129 = arith.mulf %14, %101 : vector<8x256xf32>
    %130 = arith.mulf %20, %104 : vector<8x256xf32>
    %131 = arith.subf %129, %130 : vector<8x256xf32>
    %132 = arith.mulf %16, %104 : vector<8x256xf32>
    %133 = arith.mulf %22, %107 : vector<8x256xf32>
    %134 = arith.subf %132, %133 : vector<8x256xf32>
    %135 = arith.mulf %18, %107 : vector<8x256xf32>
    %136 = arith.mulf %24, %110 : vector<8x256xf32>
    %137 = arith.subf %135, %136 : vector<8x256xf32>
    %138 = arith.mulf %20, %110 : vector<8x256xf32>
    %139 = arith.mulf %26, %113 : vector<8x256xf32>
    %140 = arith.subf %138, %139 : vector<8x256xf32>
    %141 = arith.mulf %22, %113 : vector<8x256xf32>
    %142 = arith.mulf %28, %116 : vector<8x256xf32>
    %143 = arith.subf %141, %142 : vector<8x256xf32>
    %144 = arith.mulf %24, %116 : vector<8x256xf32>
    %145 = arith.mulf %30, %119 : vector<8x256xf32>
    %146 = arith.subf %144, %145 : vector<8x256xf32>
    %147 = arith.mulf %8, %122 : vector<8x256xf32>
    %148 = arith.mulf %16, %125 : vector<8x256xf32>
    %149 = arith.subf %147, %148 : vector<8x256xf32>
    %150 = arith.mulf %10, %125 : vector<8x256xf32>
    %151 = arith.mulf %18, %128 : vector<8x256xf32>
    %152 = arith.subf %150, %151 : vector<8x256xf32>
    %153 = arith.mulf %12, %128 : vector<8x256xf32>
    %154 = arith.mulf %20, %131 : vector<8x256xf32>
    %155 = arith.subf %153, %154 : vector<8x256xf32>
    %156 = arith.mulf %14, %131 : vector<8x256xf32>
    %157 = arith.mulf %22, %134 : vector<8x256xf32>
    %158 = arith.subf %156, %157 : vector<8x256xf32>
    %159 = arith.mulf %16, %134 : vector<8x256xf32>
    %160 = arith.mulf %24, %137 : vector<8x256xf32>
    %161 = arith.subf %159, %160 : vector<8x256xf32>
    %162 = arith.mulf %18, %137 : vector<8x256xf32>
    %163 = arith.mulf %26, %140 : vector<8x256xf32>
    %164 = arith.subf %162, %163 : vector<8x256xf32>
    %165 = arith.mulf %20, %140 : vector<8x256xf32>
    %166 = arith.mulf %28, %143 : vector<8x256xf32>
    %167 = arith.subf %165, %166 : vector<8x256xf32>
    %168 = arith.mulf %22, %143 : vector<8x256xf32>
    %169 = arith.mulf %30, %146 : vector<8x256xf32>
    %170 = arith.subf %168, %169 : vector<8x256xf32>
    %171 = tpu.concatenate %6, %149, %152, %155, %158, %161, %164, %167, %170 in 0 : vector<8x256xf32>, vector<8x256xf32>, vector<8x256xf32>, vector<8x256xf32>, vector<8x256xf32>, vector<8x256xf32>, vector<8x256xf32>, vector<8x256xf32>, vector<8x256xf32> -> vector<72x256xf32>
    %c0_25 = arith.constant 0 : index
    %c0_26 = arith.constant 0 : index
    %172 = vector.load %arg2[%c0_25, %c0_26] : memref<32x72xf32, #tpu.memory_space<vmem>>, vector<32x72xf32>
    %cst_27 = arith.constant dense<0.000000e+00> : vector<32x256xf32>
    %173 = tpu.matmul %172, %171, %cst_27 {dimension_numbers = #tpu.dot_dimension_numbers<[1], [0], [0], [1], [0, 0, 1, 1], [], []>} : vector<32x72xf32>, vector<72x256xf32>, vector<32x256xf32> -> vector<32x256xf32>
    %cst_28 = arith.constant dense<0.000000e+00> : vector<256xf32>
    %174 = vector.multi_reduction <add>, %173, %cst_28 [0] : vector<32x256xf32> to vector<256xf32>
    %175 = vector.shape_cast %174 : vector<256xf32> to vector<1x256xf32>
    %cst_29 = arith.constant 3.200000e+01 : f32
    %176 = vector.broadcast %cst_29 : f32 to vector<1x256xf32>
    %177 = arith.divf %175, %176 : vector<1x256xf32>
    %178 = vector.broadcast %177 : vector<1x256xf32> to vector<32x256xf32>
    %179 = arith.subf %173, %178 : vector<32x256xf32>
    %180 = arith.mulf %179, %179 : vector<32x256xf32>
    %cst_30 = arith.constant dense<0.000000e+00> : vector<256xf32>
    %181 = vector.multi_reduction <add>, %180, %cst_30 [0] : vector<32x256xf32> to vector<256xf32>
    %182 = vector.shape_cast %181 : vector<256xf32> to vector<1x256xf32>
    %cst_31 = arith.constant 3.200000e+01 : f32
    %183 = vector.broadcast %cst_31 : f32 to vector<1x256xf32>
    %184 = arith.divf %182, %183 : vector<1x256xf32>
    %185 = vector.broadcast %177 : vector<1x256xf32> to vector<32x256xf32>
    %186 = arith.subf %173, %185 : vector<32x256xf32>
    %cst_32 = arith.constant 9.99999974E-6 : f32
    %187 = vector.broadcast %cst_32 : f32 to vector<1x256xf32>
    %188 = arith.addf %184, %187 : vector<1x256xf32>
    %189 = math.rsqrt %188 : vector<1x256xf32>
    %190 = vector.broadcast %189 : vector<1x256xf32> to vector<32x256xf32>
    %191 = arith.mulf %186, %190 : vector<32x256xf32>
    %c0_33 = arith.constant 0 : index
    %c0_34 = arith.constant 0 : index
    %192 = vector.load %arg3[%c0_33, %c0_34] : memref<32x1xf32, #tpu.memory_space<vmem>>, vector<32x1xf32>
    %193 = vector.broadcast %192 : vector<32x1xf32> to vector<32x256xf32>
    %194 = arith.mulf %191, %193 : vector<32x256xf32>
    %c0_35 = arith.constant 0 : index
    %c0_36 = arith.constant 0 : index
    %195 = vector.load %arg4[%c0_35, %c0_36] : memref<32x1xf32, #tpu.memory_space<vmem>>, vector<32x1xf32>
    %196 = vector.broadcast %195 : vector<32x1xf32> to vector<32x256xf32>
    %197 = arith.addf %194, %196 : vector<32x256xf32>
    %198 = arith.negf %197 : vector<32x256xf32>
    %199 = math.exp %198 : vector<32x256xf32>
    %cst_37 = arith.constant 1.000000e+00 : f32
    %200 = vector.broadcast %cst_37 : f32 to vector<32x256xf32>
    %201 = arith.addf %200, %199 : vector<32x256xf32>
    %202 = arith.divf %200, %201 : vector<32x256xf32>
    %203 = arith.mulf %197, %202 : vector<32x256xf32>
    %cst_38 = arith.constant -2.200000e+00 : f32
    %204 = vector.broadcast %cst_38 : f32 to vector<32x256xf32>
    %205 = arith.subf %197, %204 : vector<32x256xf32>
    %cst_39 = arith.constant -1.800000e+00 : f32
    %206 = vector.broadcast %cst_39 : f32 to vector<32x256xf32>
    %207 = arith.subf %197, %206 : vector<32x256xf32>
    %cst_40 = arith.constant -1.400000e+00 : f32
    %208 = vector.broadcast %cst_40 : f32 to vector<32x256xf32>
    %209 = arith.subf %197, %208 : vector<32x256xf32>
    %cst_41 = arith.constant -1.000000e+00 : f32
    %210 = vector.broadcast %cst_41 : f32 to vector<32x256xf32>
    %211 = arith.subf %197, %210 : vector<32x256xf32>
    %cst_42 = arith.constant -6.000000e-01 : f32
    %212 = vector.broadcast %cst_42 : f32 to vector<32x256xf32>
    %213 = arith.subf %197, %212 : vector<32x256xf32>
    %cst_43 = arith.constant -2.000000e-01 : f32
    %214 = vector.broadcast %cst_43 : f32 to vector<32x256xf32>
    %215 = arith.subf %197, %214 : vector<32x256xf32>
    %cst_44 = arith.constant 2.000000e-01 : f32
    %216 = vector.broadcast %cst_44 : f32 to vector<32x256xf32>
    %217 = arith.subf %197, %216 : vector<32x256xf32>
    %cst_45 = arith.constant 6.000000e-01 : f32
    %218 = vector.broadcast %cst_45 : f32 to vector<32x256xf32>
    %219 = arith.subf %197, %218 : vector<32x256xf32>
    %cst_46 = arith.constant 1.000000e+00 : f32
    %220 = vector.broadcast %cst_46 : f32 to vector<32x256xf32>
    %221 = arith.subf %197, %220 : vector<32x256xf32>
    %cst_47 = arith.constant 1.400000e+00 : f32
    %222 = vector.broadcast %cst_47 : f32 to vector<32x256xf32>
    %223 = arith.subf %197, %222 : vector<32x256xf32>
    %cst_48 = arith.constant 1.800000e+00 : f32
    %224 = vector.broadcast %cst_48 : f32 to vector<32x256xf32>
    %225 = arith.subf %197, %224 : vector<32x256xf32>
    %cst_49 = arith.constant 2.200000e+00 : f32
    %226 = vector.broadcast %cst_49 : f32 to vector<32x256xf32>
    %227 = arith.subf %197, %226 : vector<32x256xf32>
    %cst_50 = arith.constant 0.000000e+00 : f32
    %228 = vector.broadcast %cst_50 : f32 to vector<32x256xf32>
    %229 = arith.cmpf oge, %205, %228 : vector<32x256xf32>
    %230 = arith.extui %229 : vector<32x256xi1> to vector<32x256xi32>
    %231 = arith.sitofp %230 : vector<32x256xi32> to vector<32x256xf32>
    %cst_51 = arith.constant 0.000000e+00 : f32
    %232 = vector.broadcast %cst_51 : f32 to vector<32x256xf32>
    %233 = arith.cmpf oge, %207, %232 : vector<32x256xf32>
    %234 = arith.extui %233 : vector<32x256xi1> to vector<32x256xi32>
    %235 = arith.sitofp %234 : vector<32x256xi32> to vector<32x256xf32>
    %cst_52 = arith.constant 0.000000e+00 : f32
    %236 = vector.broadcast %cst_52 : f32 to vector<32x256xf32>
    %237 = arith.cmpf oge, %209, %236 : vector<32x256xf32>
    %238 = arith.extui %237 : vector<32x256xi1> to vector<32x256xi32>
    %239 = arith.sitofp %238 : vector<32x256xi32> to vector<32x256xf32>
    %cst_53 = arith.constant 0.000000e+00 : f32
    %240 = vector.broadcast %cst_53 : f32 to vector<32x256xf32>
    %241 = arith.cmpf oge, %211, %240 : vector<32x256xf32>
    %242 = arith.extui %241 : vector<32x256xi1> to vector<32x256xi32>
    %243 = arith.sitofp %242 : vector<32x256xi32> to vector<32x256xf32>
    %cst_54 = arith.constant 0.000000e+00 : f32
    %244 = vector.broadcast %cst_54 : f32 to vector<32x256xf32>
    %245 = arith.cmpf oge, %213, %244 : vector<32x256xf32>
    %246 = arith.extui %245 : vector<32x256xi1> to vector<32x256xi32>
    %247 = arith.sitofp %246 : vector<32x256xi32> to vector<32x256xf32>
    %cst_55 = arith.constant 0.000000e+00 : f32
    %248 = vector.broadcast %cst_55 : f32 to vector<32x256xf32>
    %249 = arith.cmpf oge, %215, %248 : vector<32x256xf32>
    %250 = arith.extui %249 : vector<32x256xi1> to vector<32x256xi32>
    %251 = arith.sitofp %250 : vector<32x256xi32> to vector<32x256xf32>
    %cst_56 = arith.constant 0.000000e+00 : f32
    %252 = vector.broadcast %cst_56 : f32 to vector<32x256xf32>
    %253 = arith.cmpf oge, %217, %252 : vector<32x256xf32>
    %254 = arith.extui %253 : vector<32x256xi1> to vector<32x256xi32>
    %255 = arith.sitofp %254 : vector<32x256xi32> to vector<32x256xf32>
    %cst_57 = arith.constant 0.000000e+00 : f32
    %256 = vector.broadcast %cst_57 : f32 to vector<32x256xf32>
    %257 = arith.cmpf oge, %219, %256 : vector<32x256xf32>
    %258 = arith.extui %257 : vector<32x256xi1> to vector<32x256xi32>
    %259 = arith.sitofp %258 : vector<32x256xi32> to vector<32x256xf32>
    %cst_58 = arith.constant 0.000000e+00 : f32
    %260 = vector.broadcast %cst_58 : f32 to vector<32x256xf32>
    %261 = arith.cmpf oge, %221, %260 : vector<32x256xf32>
    %262 = arith.extui %261 : vector<32x256xi1> to vector<32x256xi32>
    %263 = arith.sitofp %262 : vector<32x256xi32> to vector<32x256xf32>
    %cst_59 = arith.constant 0.000000e+00 : f32
    %264 = vector.broadcast %cst_59 : f32 to vector<32x256xf32>
    %265 = arith.cmpf oge, %223, %264 : vector<32x256xf32>
    %266 = arith.extui %265 : vector<32x256xi1> to vector<32x256xi32>
    %267 = arith.sitofp %266 : vector<32x256xi32> to vector<32x256xf32>
    %cst_60 = arith.constant 0.000000e+00 : f32
    %268 = vector.broadcast %cst_60 : f32 to vector<32x256xf32>
    %269 = arith.cmpf oge, %225, %268 : vector<32x256xf32>
    %270 = arith.extui %269 : vector<32x256xi1> to vector<32x256xi32>
    %271 = arith.sitofp %270 : vector<32x256xi32> to vector<32x256xf32>
    %cst_61 = arith.constant 0.000000e+00 : f32
    %272 = vector.broadcast %cst_61 : f32 to vector<32x256xf32>
    %273 = arith.cmpf oge, %227, %272 : vector<32x256xf32>
    %274 = arith.extui %273 : vector<32x256xi1> to vector<32x256xi32>
    %275 = arith.sitofp %274 : vector<32x256xi32> to vector<32x256xf32>
    %276 = arith.subf %231, %235 : vector<32x256xf32>
    %277 = arith.subf %235, %239 : vector<32x256xf32>
    %278 = arith.subf %239, %243 : vector<32x256xf32>
    %279 = arith.subf %243, %247 : vector<32x256xf32>
    %280 = arith.subf %247, %251 : vector<32x256xf32>
    %281 = arith.subf %251, %255 : vector<32x256xf32>
    %282 = arith.subf %255, %259 : vector<32x256xf32>
    %283 = arith.subf %259, %263 : vector<32x256xf32>
    %284 = arith.subf %263, %267 : vector<32x256xf32>
    %285 = arith.subf %267, %271 : vector<32x256xf32>
    %286 = arith.subf %271, %275 : vector<32x256xf32>
    %287 = arith.mulf %205, %276 : vector<32x256xf32>
    %288 = arith.mulf %209, %277 : vector<32x256xf32>
    %289 = arith.subf %287, %288 : vector<32x256xf32>
    %290 = arith.mulf %207, %277 : vector<32x256xf32>
    %291 = arith.mulf %211, %278 : vector<32x256xf32>
    %292 = arith.subf %290, %291 : vector<32x256xf32>
    %293 = arith.mulf %209, %278 : vector<32x256xf32>
    %294 = arith.mulf %213, %279 : vector<32x256xf32>
    %295 = arith.subf %293, %294 : vector<32x256xf32>
    %296 = arith.mulf %211, %279 : vector<32x256xf32>
    %297 = arith.mulf %215, %280 : vector<32x256xf32>
    %298 = arith.subf %296, %297 : vector<32x256xf32>
    %299 = arith.mulf %213, %280 : vector<32x256xf32>
    %300 = arith.mulf %217, %281 : vector<32x256xf32>
    %301 = arith.subf %299, %300 : vector<32x256xf32>
    %302 = arith.mulf %215, %281 : vector<32x256xf32>
    %303 = arith.mulf %219, %282 : vector<32x256xf32>
    %304 = arith.subf %302, %303 : vector<32x256xf32>
    %305 = arith.mulf %217, %282 : vector<32x256xf32>
    %306 = arith.mulf %221, %283 : vector<32x256xf32>
    %307 = arith.subf %305, %306 : vector<32x256xf32>
    %308 = arith.mulf %219, %283 : vector<32x256xf32>
    %309 = arith.mulf %223, %284 : vector<32x256xf32>
    %310 = arith.subf %308, %309 : vector<32x256xf32>
    %311 = arith.mulf %221, %284 : vector<32x256xf32>
    %312 = arith.mulf %225, %285 : vector<32x256xf32>
    %313 = arith.subf %311, %312 : vector<32x256xf32>
    %314 = arith.mulf %223, %285 : vector<32x256xf32>
    %315 = arith.mulf %227, %286 : vector<32x256xf32>
    %316 = arith.subf %314, %315 : vector<32x256xf32>
    %317 = arith.mulf %205, %289 : vector<32x256xf32>
    %318 = arith.mulf %211, %292 : vector<32x256xf32>
    %319 = arith.subf %317, %318 : vector<32x256xf32>
    %320 = arith.mulf %207, %292 : vector<32x256xf32>
    %321 = arith.mulf %213, %295 : vector<32x256xf32>
    %322 = arith.subf %320, %321 : vector<32x256xf32>
    %323 = arith.mulf %209, %295 : vector<32x256xf32>
    %324 = arith.mulf %215, %298 : vector<32x256xf32>
    %325 = arith.subf %323, %324 : vector<32x256xf32>
    %326 = arith.mulf %211, %298 : vector<32x256xf32>
    %327 = arith.mulf %217, %301 : vector<32x256xf32>
    %328 = arith.subf %326, %327 : vector<32x256xf32>
    %329 = arith.mulf %213, %301 : vector<32x256xf32>
    %330 = arith.mulf %219, %304 : vector<32x256xf32>
    %331 = arith.subf %329, %330 : vector<32x256xf32>
    %332 = arith.mulf %215, %304 : vector<32x256xf32>
    %333 = arith.mulf %221, %307 : vector<32x256xf32>
    %334 = arith.subf %332, %333 : vector<32x256xf32>
    %335 = arith.mulf %217, %307 : vector<32x256xf32>
    %336 = arith.mulf %223, %310 : vector<32x256xf32>
    %337 = arith.subf %335, %336 : vector<32x256xf32>
    %338 = arith.mulf %219, %310 : vector<32x256xf32>
    %339 = arith.mulf %225, %313 : vector<32x256xf32>
    %340 = arith.subf %338, %339 : vector<32x256xf32>
    %341 = arith.mulf %221, %313 : vector<32x256xf32>
    %342 = arith.mulf %227, %316 : vector<32x256xf32>
    %343 = arith.subf %341, %342 : vector<32x256xf32>
    %344 = arith.mulf %205, %319 : vector<32x256xf32>
    %345 = arith.mulf %213, %322 : vector<32x256xf32>
    %346 = arith.subf %344, %345 : vector<32x256xf32>
    %347 = arith.mulf %207, %322 : vector<32x256xf32>
    %348 = arith.mulf %215, %325 : vector<32x256xf32>
    %349 = arith.subf %347, %348 : vector<32x256xf32>
    %350 = arith.mulf %209, %325 : vector<32x256xf32>
    %351 = arith.mulf %217, %328 : vector<32x256xf32>
    %352 = arith.subf %350, %351 : vector<32x256xf32>
    %353 = arith.mulf %211, %328 : vector<32x256xf32>
    %354 = arith.mulf %219, %331 : vector<32x256xf32>
    %355 = arith.subf %353, %354 : vector<32x256xf32>
    %356 = arith.mulf %213, %331 : vector<32x256xf32>
    %357 = arith.mulf %221, %334 : vector<32x256xf32>
    %358 = arith.subf %356, %357 : vector<32x256xf32>
    %359 = arith.mulf %215, %334 : vector<32x256xf32>
    %360 = arith.mulf %223, %337 : vector<32x256xf32>
    %361 = arith.subf %359, %360 : vector<32x256xf32>
    %362 = arith.mulf %217, %337 : vector<32x256xf32>
    %363 = arith.mulf %225, %340 : vector<32x256xf32>
    %364 = arith.subf %362, %363 : vector<32x256xf32>
    %365 = arith.mulf %219, %340 : vector<32x256xf32>
    %366 = arith.mulf %227, %343 : vector<32x256xf32>
    %367 = arith.subf %365, %366 : vector<32x256xf32>
    %368 = tpu.concatenate %203, %346, %349, %352, %355, %358, %361, %364, %367 in 0 : vector<32x256xf32>, vector<32x256xf32>, vector<32x256xf32>, vector<32x256xf32>, vector<32x256xf32>, vector<32x256xf32>, vector<32x256xf32>, vector<32x256xf32>, vector<32x256xf32> -> vector<288x256xf32>
    %c0_62 = arith.constant 0 : index
    %c0_63 = arith.constant 0 : index
    %369 = vector.load %arg5[%c0_62, %c0_63] : memref<8x288xf32, #tpu.memory_space<vmem>>, vector<8x288xf32>
    %cst_64 = arith.constant dense<0.000000e+00> : vector<8x256xf32>
    %370 = tpu.matmul %369, %368, %cst_64 {dimension_numbers = #tpu.dot_dimension_numbers<[1], [0], [0], [1], [0, 0, 1, 1], [], []>} : vector<8x288xf32>, vector<288x256xf32>, vector<8x256xf32> -> vector<8x256xf32>
    %c0_65 = arith.constant 0 : index
    %c0_66 = arith.constant 0 : index
    %371 = vector.load %arg6[%c0_65, %c0_66] : memref<8x256xf32, #tpu.memory_space<vmem>>, vector<8x256xf32>
    tpu.vector_store %arg6[%c0_65, %c0_66], %370 {strides = array<i32>} : memref<8x256xf32, #tpu.memory_space<vmem>>, vector<8x256xf32>,
    return
  }
  func.func @transform_0(%arg0: i32) -> (i32, i32) {
    %c0_i32 = arith.constant 0 : i32
    %c0_i32_0 = arith.constant 0 : i32
    return %c0_i32, %arg0 : i32, i32
  }
  func.func @transform_1(%arg0: i32) -> (i32, i32) {
    %c0_i32 = arith.constant 0 : i32
    %c0_i32_0 = arith.constant 0 : i32
    %c0_i32_1 = arith.constant 0 : i32
    return %c0_i32, %c0_i32_0 : i32, i32
  }
  func.func @transform_2(%arg0: i32) -> (i32, i32) {
    %c0_i32 = arith.constant 0 : i32
    %c0_i32_0 = arith.constant 0 : i32
    %c0_i32_1 = arith.constant 0 : i32
    return %c0_i32, %c0_i32_0 : i32, i32
  }
  func.func @transform_3(%arg0: i32) -> (i32, i32) {
    %c0_i32 = arith.constant 0 : i32
    %c0_i32_0 = arith.constant 0 : i32
    %c0_i32_1 = arith.constant 0 : i32
    return %c0_i32, %c0_i32_0 : i32, i32
  }
  func.func @transform_4(%arg0: i32) -> (i32, i32) {
    %c0_i32 = arith.constant 0 : i32
    %c0_i32_0 = arith.constant 0 : i32
    %c0_i32_1 = arith.constant 0 : i32
    return %c0_i32, %c0_i32_0 : i32, i32
  }
  func.func @transform_5(%arg0: i32) -> (i32, i32) {
    %c0_i32 = arith.constant 0 : i32
    %c0_i32_0 = arith.constant 0 : i32
    return %c0_i32, %arg0 : i32, i32
  }
}

</mosaic_0001>

<bundles_post_ra>
// kernel: kan_model_forward.1
= control target key start
LH: loop header
LB: loop body
LE: loop exit
PB: predicated region body
PF: predicated region fallthrough
CT: control target
= control target key end

     0   :  { %s2508_s18 = smov 0   ;;  %s4401_s0 = inlined_call_operand.vmem [shape: f32[8,512], index: 0, kind: input, shape index: {}]   ;;  %s4402_s1 = inlined_call_operand.vmem [shape: f32[32,72], index: 1, kind: input, shape index: {}]   ;;  %s4403_s2 = inlined_call_operand.vmem [shape: f32[32,1], index: 2, kind: input, shape index: {}]   ;;  %s4404_s3 = inlined_call_operand.vmem [shape: f32[32,1], index: 3, kind: input, shape index: {}]   ;;  %s4405_s4 = inlined_call_operand.vmem [shape: f32[8,288], index: 4, kind: input, shape index: {}]   ;;  %s4406_s5 = inlined_call_operand.vmem [shape: f32[8,512], index: 5, kind: output, shape index: {}]  }
   0x1 LB: > { %s2146_s19 = sadd.s32 4294967295, %s2474_s18   ;;  %p2150_p0 = scmp.ge.s32.totalorder %s2474_s18, 1  ;;  %s2474_s18 = sphi %s2508_s18, %s15_s18  }
   0x2   : > { %p188_p1 = scmp.lt.s32.totalorder %s2474_s18, 3 }
   0x4   : > { %p189_p2 = pnand %p2150_p0, %p188_p1 }
   0x6   : > { %192 = sbr.rel (%p189_p2) target bundleno = 855 (0x357), region = 40 }
   0xb   : > { %s2151_s20 = sshll.u32 %s2146_s19, 1  ;;  %v4410_v0 = vmov 0.0   ;;  %v702_v1 = vld [vmem:[%s4403_s2 + $0x18] sm:$0xff]  ;;  %v2477_v3 = vmov 0   ;;  %v701_v4 = vld [vmem:[%s4403_s2 + $0x10] sm:$0xff]  ;;  %v700_v5 = vld [vmem:[%s4403_s2 + $0x8] sm:$0xff] }
   0xc   : > { %p217_p3 = scmp.lt.s32.totalorder %s2151_s20, 3  ;;  %605 = vmatprep.mubr.f32.mxu0 %v4410_v0  ;;  %v734_v2 = vld [vmem:[%s4404_s3 + $0x18] sm:$0xff]  ;;  %2422 = vset.pattern.permute.xlu0 %v2477_v3  ;;  %v733_v6 = vld [vmem:[%s4404_s3 + $0x10] sm:$0xff]  ;;  %v699_v9 = vld [vmem:[%s4403_s2] sm:$0xff] }
   0xd   : > { %2423 = vset.pattern.permute.xlu1 %v2477_v3  ;;  %720 = vperm.xlu0 %2422, %v702_v1   ;;  %v732_v23 = vld [vmem:[%s4404_s3 + $0x8] sm:$0xff]  ;;  %v731_v24 = vld [vmem:[%s4404_s3] sm:$0xff] }
   0xe   : > { %s4997_s20 = smov (!%p217_p3, %s2151_s20), 3  ;;  %752 = vperm.xlu1 %2423, %v734_v2  }
   0xf   : > { %s2152_s29 = sshll.u32 %s4997_s20, 3 }
  0x10   : > { %s220_s7 = scalar_lea.vmem %s4401_s0, %s2152_s29  ;;  %s226_s10 = scalar_lea.vmem %s4406_s5, %s2152_s29 }
  0x11   : > { %v2540_v7 = vld [vmem:[%s220_s7 + $0x8] sm:$0xff]  ;;  %v2542_v8 = vld [vmem:[%s220_s7] sm:$0xff]  ;;  %715 = vperm.xlu0 %2422, %v701_v4  }
  0x12   : > { %710 = vperm.xlu1 %2423, %v700_v5   ;;  %v2548_v10 = vadd.f32 -0.2, %v2540_v7  ;;  %v2551_v11 = vadd.f32 -0.6, %v2540_v7  ;;  %v2554_v12 = vadd.f32 -1.0, %v2540_v7  ;;  %v2557_v13 = vadd.f32 -1.0, %v2542_v8 }
  0x13   : > { %v2560_v14 = vadd.f32 -1.4, %v2540_v7  ;;  %v2563_v15 = vadd.f32 -1.8, %v2540_v7  ;;  %v2566_v16 = vadd.f32 -2.2, %v2540_v7 }
  0x14   : > { %vm305_vm0 = vcmp.ge.f32.partialorder %v2548_v10, 0.0  ;;  %vm311_vm1 = vcmp.ge.f32.partialorder %v2551_v11, 0.0  ;;  %vm317_vm2 = vcmp.ge.f32.partialorder %v2554_v12, 0.0  ;;  %v2572_v17 = vadd.f32 -0.2, %v2542_v8 }
  0x15   : > { %v2575_v18 = vsel %vm305_vm0, 1.0, %v4410_v0  ;;  %v2196_v19 = vsel %vm311_vm1, 1.0, %v4410_v0  ;;  %v2198_v20 = vsel %vm317_vm2, 1.0, %v4410_v0  ;;  %vm323_vm3 = vcmp.ge.f32.partialorder %v2560_v14, 0.0  ;;  %747 = vperm.xlu0 %2422, %v733_v6  }
  0x16   : > { %705 = vperm.xlu1 %2423, %v699_v9   ;;  %v2200_v21 = vsel %vm323_vm3, 1.0, %v4410_v0  ;;  %vm329_vm4 = vcmp.ge.f32.partialorder %v2563_v15, 0.0  ;;  %vm335_vm5 = vcmp.ge.f32.partialorder %v2566_v16, 0.0  ;;  %v2584_v22 = vsub.f32 %v2575_v18, %v2196_v19 }
  0x17   : > { %v2202_v25 = vsel %vm329_vm4, 1.0, %v4410_v0  ;;  %v2204_v26 = vsel %vm335_vm5, 1.0, %v4410_v0  ;;  %v355_v27 = vsub.f32 %v2196_v19, %v2198_v20  ;;  %v357_v28 = vsub.f32 %v2198_v20, %v2200_v21 }
  0x18   : > { %v359_v29 = vsub.f32 %v2200_v21, %v2202_v25  ;;  %v361_v30 = vsub.f32 %v2202_v25, %v2204_v26  ;;  %v2595_v31 = vadd.f32 -0.6, %v2542_v8  ;;  %v2598_v32 = vadd.f32 -1.4, %v2542_v8 }
  0x19   : > { %v405_v33 = vmul.f32 %v2551_v11, %v355_v27  ;;  %v407_v34 = vmul.f32 %v2560_v14, %v357_v28  ;;  %v411_v35 = vmul.f32 %v2554_v12, %v357_v28  ;;  %v2604_v36 = vadd.f32 -1.8, %v2542_v8  ;;  %742 = vperm.xlu0 %2422, %v732_v23  }
  0x1a   : > { %737 = vperm.xlu1 %2423, %v731_v24   ;;  %v413_v37 = vmul.f32 %v2563_v15, %v359_v29  ;;  %v417_v38 = vmul.f32 %v2560_v14, %v359_v29  ;;  %v419_v39 = vmul.f32 %v2566_v16, %v361_v30  ;;  %v2610_v40 = vadd.f32 -2.2, %v2542_v8 }
  0x1b   : > { %v409_v41 = vsub.f32 %v405_v33, %v407_v34  ;;  %vm304_vm6 = vcmp.ge.f32.partialorder %v2572_v17, 0.0  ;;  %vm310_vm7 = vcmp.ge.f32.partialorder %v2595_v31, 0.0  ;;  %vm316_vm8 = vcmp.ge.f32.partialorder %v2557_v13, 0.0 }
  0x1c   : > { %v415_v42 = vsub.f32 %v411_v35, %v413_v37  ;;  %v421_v43 = vsub.f32 %v417_v38, %v419_v39  ;;  %v2616_v44 = vsel %vm304_vm6, 1.0, %v4410_v0  ;;  %v2195_v45 = vsel %vm310_vm7, 1.0, %v4410_v0 }
  0x1d   : > { %v465_v46 = vmul.f32 %v2551_v11, %v409_v41  ;;  %v2197_v47 = vsel %vm316_vm8, 1.0, %v4410_v0  ;;  %vm322_vm9 = vcmp.ge.f32.partialorder %v2598_v32, 0.0  ;;  %vm328_vm10 = vcmp.ge.f32.partialorder %v2604_v36, 0.0 }
  0x1e   : > { %v467_v48 = vmul.f32 %v2563_v15, %v415_v42  ;;  %v471_v49 = vmul.f32 %v2554_v12, %v415_v42  ;;  %v473_v50 = vmul.f32 %v2566_v16, %v421_v43  ;;  %v2199_v51 = vsel %vm322_vm9, 1.0, %v4410_v0 }
  0x1f   : > { %v2201_v52 = vsel %vm328_vm10, 1.0, %v4410_v0  ;;  %vm334_vm11 = vcmp.ge.f32.partialorder %v2610_v40, 0.0  ;;  %v352_v53 = vsub.f32 %v2616_v44, %v2195_v45  ;;  %v354_v54 = vsub.f32 %v2195_v45, %v2197_v47 }
  0x20   : > { %v469_v55 = vsub.f32 %v465_v46, %v467_v48  ;;  %v475_v56 = vsub.f32 %v471_v49, %v473_v50  ;;  %v2203_v57 = vsel %vm334_vm11, 1.0, %v4410_v0  ;;  %v356_v58 = vsub.f32 %v2197_v47, %v2199_v51 }
  0x21   : > { %v358_v59 = vsub.f32 %v2199_v51, %v2201_v52  ;;  %v360_v60 = vsub.f32 %v2201_v52, %v2203_v57  ;;  %v404_v61 = vmul.f32 %v2595_v31, %v354_v54  ;;  %v399_v62 = vmul.f32 %v2548_v10, %v2584_v22 }
  0x22   : > { %v519_v63 = vmul.f32 %v2551_v11, %v469_v55  ;;  %v521_v1 = vmul.f32 %v2566_v16, %v475_v56  ;;  %v406_v2 = vmul.f32 %v2598_v32, %v356_v58  ;;  %v410_v3 = vmul.f32 %v2557_v13, %v356_v58 }
  0x23   : > { %v412_v4 = vmul.f32 %v2604_v36, %v358_v59  ;;  %v416_v5 = vmul.f32 %v2598_v32, %v358_v59  ;;  %v418_v6 = vmul.f32 %v2610_v40, %v360_v60  ;;  %v401_v9 = vmul.f32 %v2554_v12, %v355_v27 }
  0x24   : > { %v523_v19 = vsub.f32 %v519_v63, %v521_v1  ;;  %v408_v20 = vsub.f32 %v404_v61, %v406_v2  ;;  %v461_v21 = vmul.f32 %v2560_v14, %v409_v41  ;;  %v398_v16 = vmul.f32 %v2572_v17, %v352_v53 }
  0x25   : > { %v414_v23 = vsub.f32 %v410_v3, %v412_v4  ;;  %v420_v24 = vsub.f32 %v416_v5, %v418_v6  ;;  %v403_v25 = vsub.f32 %v399_v62, %v401_v9  ;;  %v515_v28 = vmul.f32 %v2563_v15, %v469_v55 }
  0x26   : > { %555 = vmatprep.subr.mxu0 %v523_v19  ;;  %v464_v26 = vmul.f32 %v2595_v31, %v408_v20  ;;  %v400_v29 = vmul.f32 %v2557_v13, %v354_v54  ;;  %v2648_v30 = vadd.f32 0.2, %v2540_v7  ;;  %v460_v38 = vmul.f32 %v2598_v32, %v408_v20 }
  0x27   : > { %v466_v27 = vmul.f32 %v2604_v36, %v414_v23  ;;  %v470_v33 = vmul.f32 %v2557_v13, %v414_v23  ;;  %v472_v34 = vmul.f32 %v2610_v40, %v420_v24  ;;  %v459_v35 = vmul.f32 %v2548_v10, %v403_v25 }
  0x28   : > { %v402_v37 = vsub.f32 %v398_v16, %v400_v29  ;;  %vm299_vm12 = vcmp.ge.f32.partialorder %v2648_v30, 0.0  ;;  %v395_v15 = vmul.f32 %v2551_v11, %v2584_v22  ;;  %v455_v47 = vmul.f32 %v2554_v12, %v403_v25 }
  0x29   : > { %v468_v39 = vsub.f32 %v464_v26, %v466_v27  ;;  %v474_v41 = vsub.f32 %v470_v33, %v472_v34  ;;  %v463_v42 = vsub.f32 %v459_v35, %v461_v21  ;;  %v2192_v43 = vsel %vm299_vm12, 1.0, %v4410_v0 }
  0x2a   : > { %v458_v45 = vmul.f32 %v2572_v17, %v402_v37  ;;  %v351_v46 = vsub.f32 %v2192_v43, %v2575_v18  ;;  %v2663_v48 = vadd.f32 0.2, %v2542_v8  ;;  %v394_v51 = vmul.f32 %v2595_v31, %v352_v53 }
  0x2b   : > { %v518_v49 = vmul.f32 %v2595_v31, %v468_v39  ;;  %v520_v50 = vmul.f32 %v2610_v40, %v474_v41  ;;  %v513_v22 = vmul.f32 %v2548_v10, %v463_v42  ;;  %v514_v54 = vmul.f32 %v2604_v36, %v468_v39 }
  0x2c   : > { %v462_v52 = vsub.f32 %v458_v45, %v460_v38  ;;  %v393_v55 = vmul.f32 %v2648_v30, %v351_v46  ;;  %vm298_vm13 = vcmp.ge.f32.partialorder %v2663_v48, 0.0  ;;  %v509_v57 = vmul.f32 %v2560_v14, %v463_v42 }
  0x2d   : > { %v522_v18 = vsub.f32 %v518_v49, %v520_v50  ;;  %v517_v56 = vsub.f32 %v513_v22, %v515_v28  ;;  %v2191_v58 = vsel %vm298_vm13, 1.0, %v4410_v0  ;;  %v454_v53 = vmul.f32 %v2557_v13, %v402_v37 }
  0x2e   : > { %v512_v59 = vmul.f32 %v2572_v17, %v462_v52  ;;  %v397_v40 = vsub.f32 %v393_v55, %v395_v15  ;;  %v350_v60 = vsub.f32 %v2191_v58, %v2616_v44  ;;  %v508_v36 = vmul.f32 %v2598_v32, %v462_v52 }
  0x2f   : > { %556 = vmatpush1.msra.mxu0 %v522_v18  ;;  %v2679_v61 = vadd.f32 0.6, %v2540_v7  ;;  %v2682_v62 = vadd.f32 0.6, %v2542_v8  ;;  %v2685_v14 = vadd.f32 1.0, %v2540_v7  ;;  %v389_v2 = vmul.f32 %v2548_v10, %v351_v46 }
  0x30   : > { %557 = vmatprep.subr.mxu0 %v517_v56  ;;  %v516_v63 = vsub.f32 %v512_v59, %v514_v54  ;;  %v453_v1 = vmul.f32 %v2648_v30, %v397_v40  ;;  %v392_v44 = vmul.f32 %v2663_v48, %v350_v60  ;;  %v388_v32 = vmul.f32 %v2572_v17, %v350_v60 }
  0x31   : > { %vm293_vm14 = vcmp.ge.f32.partialorder %v2679_v61, 0.0  ;;  %vm292_vm15 = vcmp.ge.f32.partialorder %v2682_v62, 0.0  ;;  %vm287_vm0 = vcmp.ge.f32.partialorder %v2685_v14, 0.0  ;;  %v2698_v21 = vadd.f32 1.0, %v2542_v8 }
  0x32   : > { %558 = vmatpush1.msra.mxu0 %v516_v63  ;;  %v457_v3 = vsub.f32 %v453_v1, %v455_v47  ;;  %v396_v4 = vsub.f32 %v392_v44, %v394_v51  ;;  %v2190_v5 = vsel %vm293_vm14, 1.0, %v4410_v0  ;;  %v2189_v6 = vsel %vm292_vm15, 1.0, %v4410_v0 }
  0x33   : > { %v349_v9 = vsub.f32 %v2190_v5, %v2192_v43  ;;  %v348_v19 = vsub.f32 %v2189_v6, %v2191_v58  ;;  %v2188_v20 = vsel %vm287_vm0, 1.0, %v4410_v0  ;;  %v449_v25 = vmul.f32 %v2551_v11, %v397_v40 }
  0x34   : > { %v507_v23 = vmul.f32 %v2648_v30, %v457_v3  ;;  %v452_v24 = vmul.f32 %v2663_v48, %v396_v4  ;;  %v503_v16 = vmul.f32 %v2554_v12, %v457_v3  ;;  %v347_v29 = vsub.f32 %v2188_v20, %v2190_v5 }
  0x35   : > { %v387_v26 = vmul.f32 %v2679_v61, %v349_v9  ;;  %v386_v28 = vmul.f32 %v2682_v62, %v348_v19  ;;  %v383_v27 = vmul.f32 %v2648_v30, %v349_v9  ;;  %v448_v35 = vmul.f32 %v2595_v31, %v396_v4 }
  0x36   : > { %v511_v33 = vsub.f32 %v507_v23, %v509_v57  ;;  %v456_v34 = vsub.f32 %v452_v24, %v454_v53  ;;  %vm286_vm1 = vcmp.ge.f32.partialorder %v2698_v21, 0.0  ;;  %v381_v15 = vmul.f32 %v2685_v14, %v347_v29 }
  0x37   : > { %v391_v37 = vsub.f32 %v387_v26, %v389_v2  ;;  %v390_v38 = vsub.f32 %v386_v28, %v388_v32  ;;  %v2187_v39 = vsel %vm286_vm1, 1.0, %v4410_v0  ;;  %v382_v42 = vmul.f32 %v2663_v48, %v348_v19 }
  0x38   : > { %559 = vmatprep.subr.mxu0 %v511_v33  ;;  %v506_v12 = vmul.f32 %v2663_v48, %v456_v34  ;;  %v346_v41 = vsub.f32 %v2187_v39, %v2189_v6  ;;  %v2714_v43 = vadd.f32 1.4, %v2540_v7  ;;  %v385_v47 = vsub.f32 %v381_v15, %v383_v27 }
  0x39   : > { %v447_v45 = vmul.f32 %v2679_v61, %v391_v37  ;;  %v446_v46 = vmul.f32 %v2682_v62, %v390_v38  ;;  %v443_v49 = vmul.f32 %v2548_v10, %v391_v37  ;;  %v502_v22 = vmul.f32 %v2557_v13, %v456_v34 }
  0x3a   : > { %v510_v50 = vsub.f32 %v506_v12, %v508_v36  ;;  %v380_v51 = vmul.f32 %v2698_v21, %v346_v41  ;;  %vm281_vm2 = vcmp.ge.f32.partialorder %v2714_v43, 0.0  ;;  %v441_v55 = vmul.f32 %v2685_v14, %v385_v47 }
  0x3b   : > { %v451_v52 = vsub.f32 %v447_v45, %v449_v25  ;;  %v450_v54 = vsub.f32 %v446_v46, %v448_v35  ;;  %v2186_v18 = vsel %vm281_vm2, 1.0, %v4410_v0  ;;  %v442_v57 = vmul.f32 %v2572_v17, %v390_v38 }
  0x3c   : > { %560 = vmatpush1.msra.mxu0 %v510_v50  ;;  %v384_v56 = vsub.f32 %v380_v51, %v382_v42  ;;  %v345_v58 = vsub.f32 %v2186_v18, %v2188_v20  ;;  %v377_v59 = vmul.f32 %v2679_v61, %v347_v29  ;;  %v445_v60 = vsub.f32 %v441_v55, %v443_v49 }
  0x3d   : > { %v501_v40 = vmul.f32 %v2679_v61, %v451_v52  ;;  %v500_v13 = vmul.f32 %v2682_v62, %v450_v54  ;;  %v497_v53 = vmul.f32 %v2551_v11, %v451_v52  ;;  %v2732_v1 = vadd.f32 1.4, %v2542_v8 }
  0x3e   : > { %v440_v36 = vmul.f32 %v2698_v21, %v384_v56  ;;  %v375_v63 = vmul.f32 %v2714_v43, %v345_v58  ;;  %v495_v32 = vmul.f32 %v2685_v14, %v445_v60  ;;  %v437_v3 = vmul.f32 %v2648_v30, %v385_v47 }
  0x3f   : > { %v505_v44 = vsub.f32 %v501_v40, %v503_v16  ;;  %v504_v2 = vsub.f32 %v500_v13, %v502_v22  ;;  %v496_v5 = vmul.f32 %v2595_v31, %v450_v54  ;;  %vm280_vm3 = vcmp.ge.f32.partialorder %v2732_v1, 0.0 }
  0x40   : > { %v444_v4 = vsub.f32 %v440_v36, %v442_v57  ;;  %v379_v6 = vsub.f32 %v375_v63, %v377_v59  ;;  %v499_v11 = vsub.f32 %v495_v32, %v497_v53  ;;  %v491_v9 = vmul.f32 %v2548_v10, %v445_v60 }
  0x41   : > { %561 = vmatprep.subr.mxu0 %v505_v44  ;;  %v2185_v19 = vsel %vm280_vm3, 1.0, %v4410_v0  ;;  %v2160_v20 = vadd.f32 1.8, %v2540_v7  ;;  %v376_v16 = vmul.f32 %v2682_v62, %v346_v41  ;;  %v436_v31 = vmul.f32 %v2663_v48, %v384_v56 }
  0x42   : > { %562 = vmatpush1.msra.mxu0 %v504_v2  ;;  %v494_v23 = vmul.f32 %v2698_v21, %v444_v4  ;;  %v435_v24 = vmul.f32 %v2714_v43, %v379_v6  ;;  %v344_v25 = vsub.f32 %v2185_v19, %v2187_v39  ;;  %v490_v26 = vmul.f32 %v2572_v17, %v444_v4 }
  0x43   : > { %563 = vmatprep.subr.mxu0 %v499_v11  ;;  %vm275_vm4 = vcmp.ge.f32.partialorder %v2160_v20, 0.0  ;;  %v2159_v10 = vadd.f32 1.8, %v2542_v8  ;;  %v371_v35 = vmul.f32 %v2685_v14, %v345_v58  ;;  %v2158_v37 = vadd.f32 2.2, %v2540_v7 }
  0x44   : > { %v498_v28 = vsub.f32 %v494_v23, %v496_v5  ;;  %v439_v29 = vsub.f32 %v435_v24, %v437_v3  ;;  %v374_v27 = vmul.f32 %v2732_v1, %v344_v25  ;;  %v2184_v33 = vsel %vm275_vm4, 1.0, %v4410_v0 }
  0x45   : > { %v343_v34 = vsub.f32 %v2184_v33, %v2186_v18  ;;  %vm274_vm5 = vcmp.ge.f32.partialorder %v2159_v10, 0.0  ;;  %v431_v17 = vmul.f32 %v2679_v61, %v379_v6  ;;  %v370_v42 = vmul.f32 %v2698_v21, %v344_v25 }
  0x46   : > { %564 = vmatpush1.msra.mxu0 %v498_v28  ;;  %v489_v38 = vmul.f32 %v2714_v43, %v439_v29  ;;  %v378_v15 = vsub.f32 %v374_v27, %v376_v16  ;;  %v2183_v39 = vsel %vm274_vm5, 1.0, %v4410_v0  ;;  %vm269_vm6 = vcmp.ge.f32.partialorder %v2158_v37, 0.0 }
  0x47   : > { %v369_v12 = vmul.f32 %v2160_v20, %v343_v34  ;;  %v342_v41 = vsub.f32 %v2183_v39, %v2185_v19  ;;  %v2182_v47 = vsel %vm269_vm6, 1.0, %v4410_v0  ;;  %v365_v49 = vmul.f32 %v2714_v43, %v343_v34 }
  0x48   : > { %v493_v45 = vsub.f32 %v489_v38, %v491_v9  ;;  %v434_v46 = vmul.f32 %v2732_v1, %v378_v15  ;;  %v341_v51 = vsub.f32 %v2182_v47, %v2184_v33  ;;  %v2157_v52 = vadd.f32 2.2, %v2542_v8 }
  0x49   : > { %v373_v50 = vsub.f32 %v369_v12, %v371_v35  ;;  %v368_v22 = vmul.f32 %v2159_v10, %v342_v41  ;;  %v485_v55 = vmul.f32 %v2648_v30, %v439_v29  ;;  %v2156_v18 = vmul.f32 -1.442695, %v2540_v7 }
  0x4a   : > { %565 = vmatprep.subr.mxu0 %v493_v45  ;;  %v438_v54 = vsub.f32 %v434_v46, %v436_v31  ;;  %v2155_v56 = vmul.f32 -1.442695, %v2542_v8  ;;  %v430_v59 = vmul.f32 %v2682_v62, %v378_v15  ;;  %v363_v40 = vmul.f32 %v2158_v37, %v341_v51 }
  0x4b   : > { %v429_v57 = vmul.f32 %v2160_v20, %v373_v50  ;;  %v372_v58 = vsub.f32 %v368_v22, %v370_v42  ;;  %v425_v13 = vmul.f32 %v2685_v14, %v373_v50  ;;  %vm268_vm7 = vcmp.ge.f32.partialorder %v2157_v52, 0.0 }
  0x4c   : > { %v488_v43 = vmul.f32 %v2732_v1, %v438_v54  ;;  %2424 = vpow2.f32 %v2156_v18  ;;  %v367_v36 = vsub.f32 %v363_v40, %v365_v49  ;;  %v2181_v30 = vsel %vm268_vm7, 1.0, %v4410_v0 }
  0x4d   : > { %v433_v60 = vsub.f32 %v429_v57, %v431_v17  ;;  %v428_v53 = vmul.f32 %v2159_v10, %v372_v58  ;;  %v340_v44 = vsub.f32 %v2181_v30, %v2183_v39  ;;  %v364_v2 = vmul.f32 %v2732_v1, %v342_v41 }
  0x4e   : > { %v492_v63 = vsub.f32 %v488_v43, %v490_v26  ;;  %2426 = vpow2.f32 %v2155_v56  ;;  %v484_v4 = vmul.f32 %v2663_v48, %v438_v54  ;;  %v423_v5 = vmul.f32 %v2158_v37, %v367_v36 }
  0x4f   : > { %v483_v32 = vmul.f32 %v2160_v20, %v433_v60  ;;  %v432_v3 = vsub.f32 %v428_v53, %v430_v59  ;;  %v362_v6 = vmul.f32 %v2157_v52, %v340_v44  ;;  %v479_v19 = vmul.f32 %v2679_v61, %v433_v60 }
  0x50   : > { %566 = vmatpush1.msra.mxu0 %v492_v63  ;;  %v427_v9 = vsub.f32 %v423_v5, %v425_v13  ;;  %v424_v24 = vmul.f32 %v2698_v21, %v372_v58  ;;  %vm528_vm8 = vcmask 588800  }
  0x51   : > { %v487_v14 = vsub.f32 %v483_v32, %v485_v55  ;;  %v482_v11 = vmul.f32 %v2159_v10, %v432_v3  ;;  %v366_v23 = vsub.f32 %v362_v6, %v364_v2  ;;  %v478_v48 = vmul.f32 %v2682_v62, %v432_v3  ;;  %v524_v62 = vld [vmem:[%s4402_s1] sm:$0xff] }
  0x52   : > { %v477_v16 = vmul.f32 %v2158_v37, %v427_v9  ;;  %v525_v37 = vld [vmem:[%s4402_s1 + $0x8] sm:$0xff] }
  0x53   : > { %567 = vmatprep.subr.mxu0 %v487_v14  ;;  %v486_v25 = vsub.f32 %v482_v11, %v484_v4  ;;  %v422_v1 = vmul.f32 %v2157_v52, %v366_v23 }
  0x54   : > { %v481_v20 = vsub.f32 %v477_v16, %v479_v19 }
  0x55   : > { %568 = vmatpush1.msra.mxu0 %v486_v25  ;;  %v426_v31 = vsub.f32 %v422_v1, %v424_v24 }
  0x56   : > { %569 = vmatprep.subr.mxu0 %v481_v20 }
  0x57   : > { %v476_v26 = vmul.f32 %v2157_v52, %v426_v31 }
  0x59   : > { %v2425_v28 = vpop.eup %2424  ;;  %v480_v29 = vsub.f32 %v476_v26, %v478_v48 }
  0x5a   : > { %v237_v10 = vadd.f32 1.0, %v2425_v28 }
  0x5b   : > { %v2427_v27 = vpop.eup %2426  ;;  %570 = vmatpush1.msra.mxu0 %v480_v29 }
  0x5c   : > { %2428 = vrcp.f32 %v237_v10  ;;  %v236_v61 = vadd.f32 1.0, %v2427_v27 }
  0x5e   : > { %2430 = vrcp.f32 %v236_v61 }
  0x69   : > { %v2429_v21 = vpop.eup %2428 }
  0x6a   : > { %v243_v33 = vmul.f32 %v2429_v21, %v2540_v7  ;;  %v526_v7 = vld [vmem:[%s4402_s1 + $0x10] sm:$0xff] }
  0x6b   : > { %v2431_v34 = vpop.eup %2430 }
  0x6c   : > { %571 = vmatprep.subr.mxu0 %v243_v33  ;;  %v242_v35 = vmul.f32 %v2431_v34, %v2542_v8  ;;  %v527_v8 = vld [vmem:[%s4402_s1 + $0x18] sm:$0xff] }
  0x6e   : > { %572 = vmatpush1.msra.mxu0 %v242_v35 }
  0x6f   : > { %2205 = vmatmul.mubr.msk.f32.vlgmr.msra.gmra.mxu0 %vm528_vm8, %v524_v62 }
  0x70   : > { %611 = vmatprep.mubr.f32.mxu0 %v4410_v0 }
  0x73   : > { %2206 = vmatmul.mubr.msk.f32.gmra.mxu0 %vm528_vm8, %v525_v37 }
  0x74   : > { %617 = vmatprep.mubr.f32.mxu0 %v4410_v0 }
  0x77   : > { %2207 = vmatmul.mubr.msk.f32.gmra.mxu0 %vm528_vm8, %v526_v7 }
  0x78   : > { %623 = vmatprep.mubr.f32.mxu0 %v4410_v0 }
  0x7b   : > { %2208 = vmatmul.mubr.msk.f32.gmra.mxu0 %vm528_vm8, %v527_v8 }
  0x7c   : > { %2081 = vmatprep.mubr.f32.mxu0 %v4410_v0 }
 0x12f   : > { %v607_v38 = vpop.f32.mrf.mxu0 }
 0x131   : > { %v609_v15 = vpop.f32.mrf.mxu0 }
 0x133   : > { %v613_v17 = vpop.f32.mrf.mxu0 }
 0x134   : > { %v630_v41 = vadd.f32 %v613_v17, %v607_v38 }
 0x135   : > { %v615_v39 = vpop.f32.mrf.mxu0 }
 0x136   : > { %v639_v45 = vadd.f32 %v615_v39, %v609_v15 }
 0x137   : > { %v619_v12 = vpop.f32.mrf.mxu0 }
 0x138   : > { %v631_v46 = vadd.f32 %v630_v41, %v619_v12 }
 0x139   : > { %v621_v42 = vpop.f32.mrf.mxu0 }
 0x13a   : > { %v640_v49 = vadd.f32 %v639_v45, %v621_v42 }
 0x13b   : > { %v625_v47 = vpop.f32.mrf.mxu0 }
 0x13c   : > { %v632_v50 = vadd.f32 %v631_v46, %v625_v47 }
 0x13d   : > { %v627_v22 = vpop.f32.mrf.mxu0 }
 0x13e   : > { %v633_v51 = vrot.slane %v632_v50, 4  ;;  %v641_v52 = vadd.f32 %v640_v49, %v627_v22 }
 0x140   : > { %v634_v54 = vadd.f32 %v633_v51, %v632_v50  ;;  %v642_v55 = vrot.slane %v641_v52, 4 }
 0x142   : > { %v635_v18 = vrot.slane %v634_v54, 2  ;;  %v643_v56 = vadd.f32 %v642_v55, %v641_v52 }
 0x144   : > { %v636_v57 = vadd.f32 %v635_v18, %v634_v54  ;;  %v644_v58 = vrot.slane %v643_v56, 2 }
 0x146   : > { %v637_v59 = vrot.slane %v636_v57, 1  ;;  %v645_v40 = vadd.f32 %v644_v58, %v643_v56 }
 0x148   : > { %v638_v43 = vadd.f32 %v637_v59, %v636_v57  ;;  %v646_v13 = vrot.slane %v645_v40, 1 }
 0x14a   : > { %v649_v60 = vmul.f32 0.03125, %v638_v43  ;;  %v647_v53 = vadd.f32 %v646_v13, %v645_v40 }
 0x14c   : > { %v651_v36 = vsub.f32 %v607_v38, %v649_v60  ;;  %v653_v30 = vsub.f32 %v613_v17, %v649_v60  ;;  %v655_v63 = vsub.f32 %v619_v12, %v649_v60  ;;  %v650_v44 = vmul.f32 0.03125, %v647_v53  ;;  %v721_v17 = vpop.permute.xlu0 %720  ;;  %v753_v12 = vpop.permute.xlu1 %752 }
 0x14d   : > { %v657_v2 = vsub.f32 %v625_v47, %v649_v60 }
 0x14e   : > { %v659_v32 = vmul.f32 %v651_v36, %v651_v36  ;;  %v661_v3 = vmul.f32 %v653_v30, %v653_v30  ;;  %v652_v4 = vsub.f32 %v609_v15, %v650_v44  ;;  %v654_v5 = vsub.f32 %v615_v39, %v650_v44 }
 0x14f   : > { %v656_v6 = vsub.f32 %v621_v42, %v650_v44  ;;  %v663_v14 = vmul.f32 %v655_v63, %v655_v63  ;;  %v658_v9 = vsub.f32 %v627_v22, %v650_v44  ;;  %v665_v24 = vmul.f32 %v657_v2, %v657_v2 }
 0x150   : > { %v667_v11 = vadd.f32 %v661_v3, %v659_v32  ;;  %v660_v19 = vmul.f32 %v652_v4, %v652_v4  ;;  %v662_v23 = vmul.f32 %v654_v5, %v654_v5  ;;  %v716_v41 = vpop.permute.xlu0 %715  ;;  %v711_v42 = vpop.permute.xlu1 %710 }
 0x151   : > { %v664_v16 = vmul.f32 %v656_v6, %v656_v6  ;;  %v666_v31 = vmul.f32 %v658_v9, %v658_v9 }
 0x152   : > { %v668_v25 = vadd.f32 %v667_v11, %v663_v14  ;;  %v676_v1 = vadd.f32 %v662_v23, %v660_v19 }
 0x154   : > { %v669_v20 = vadd.f32 %v668_v25, %v665_v24  ;;  %v677_v48 = vadd.f32 %v676_v1, %v664_v16  ;;  %v748_v45 = vpop.permute.xlu0 %747  ;;  %v706_v47 = vpop.permute.xlu1 %705 }
 0x156   : > { %v670_v26 = vrot.slane %v669_v20, 4  ;;  %v678_v28 = vadd.f32 %v677_v48, %v666_v31 }
 0x158   : > { %v671_v29 = vadd.f32 %v670_v26, %v669_v20  ;;  %v679_v10 = vrot.slane %v678_v28, 4  ;;  %v743_v60 = vpop.permute.xlu0 %742 }
 0x15a   : > { %v672_v27 = vrot.slane %v671_v29, 2  ;;  %v680_v61 = vadd.f32 %v679_v10, %v678_v28 }
 0x15c   : > { %v673_v21 = vadd.f32 %v672_v27, %v671_v29  ;;  %v681_v33 = vrot.slane %v680_v61, 2 }
 0x15e   : > { %v674_v34 = vrot.slane %v673_v21, 1  ;;  %v682_v35 = vadd.f32 %v681_v33, %v680_v61 }
 0x160   : > { %v675_v62 = vadd.f32 %v674_v34, %v673_v21  ;;  %v683_v37 = vrot.slane %v682_v35, 1 }
 0x162   : > { %v685_v7 = vmul.f32 0.03125, %v675_v62  ;;  %v684_v8 = vadd.f32 %v683_v37, %v682_v35 }
 0x164   : > { %v687_v38 = vadd.f32 1e-05, %v685_v7  ;;  %v686_v15 = vmul.f32 0.03125, %v684_v8 }
 0x166   : > { %2432 = vrsqrt.f32 %v687_v38  ;;  %v688_v39 = vadd.f32 1e-05, %v686_v15 }
 0x168   : > { %2434 = vrsqrt.f32 %v688_v39 }
 0x173   : > { %v2433_v46 = vpop.eup %2432 }
 0x174   : > { %v697_v49 = vmul.f32 %v2433_v46, %v657_v2  ;;  %v695_v50 = vmul.f32 %v2433_v46, %v655_v63  ;;  %v693_v22 = vmul.f32 %v2433_v46, %v653_v30  ;;  %v691_v51 = vmul.f32 %v2433_v46, %v651_v36  ;;  %v738_v36 = vpop.permute.xlu1 %737 }
 0x175   : > { %v2435_v52 = vpop.eup %2434 }
 0x176   : > { %v729_v54 = vmul.f32 %v721_v17, %v697_v49  ;;  %v727_v55 = vmul.f32 %v716_v41, %v695_v50  ;;  %v725_v18 = vmul.f32 %v711_v42, %v693_v22  ;;  %v723_v56 = vmul.f32 %v706_v47, %v691_v51 }
 0x177   : > { %v698_v57 = vmul.f32 %v2435_v52, %v658_v9  ;;  %v696_v58 = vmul.f32 %v2435_v52, %v656_v6  ;;  %v694_v59 = vmul.f32 %v2435_v52, %v654_v5  ;;  %v692_v40 = vmul.f32 %v2435_v52, %v652_v4 }
 0x178   : > { %v2789_v43 = vadd.f32 %v753_v12, %v729_v54  ;;  %v2791_v13 = vadd.f32 %v748_v45, %v727_v55  ;;  %v2793_v63 = vadd.f32 %v743_v60, %v725_v18  ;;  %v2795_v32 = vadd.f32 %v738_v36, %v723_v56 }
 0x179   : > { %v730_v53 = vmul.f32 %v721_v17, %v698_v57  ;;  %v728_v44 = vmul.f32 %v716_v41, %v696_v58  ;;  %v726_v2 = vmul.f32 %v711_v42, %v694_v59  ;;  %v724_v30 = vmul.f32 %v706_v47, %v692_v40 }
 0x17a   : > { %4633 = vst [vmem:[#allocation2_spill] sm:$0xff] %v2793_v63  ;;  %4634 = vst [vmem:[#allocation3_spill] sm:$0xff] %v2795_v32  ;;  %v2798_v3 = vadd.f32 1.4, %v2789_v43  ;;  %v2801_v5 = vadd.f32 1.0, %v2789_v43  ;;  %v2811_v11 = vadd.f32 -1.0, %v2789_v43 }
 0x17b   : > { %v2803_v4 = vadd.f32 %v753_v12, %v730_v53  ;;  %v2805_v6 = vadd.f32 %v748_v45, %v728_v44  ;;  %v2808_v14 = vadd.f32 0.6, %v2789_v43  ;;  %v2813_v9 = vadd.f32 %v743_v60, %v726_v2 }
 0x17c   : > { %4635 = vst [vmem:[#allocation4_spill] sm:$0xff] %v2798_v3  ;;  %4636 = vst [vmem:[#allocation5_spill] sm:$0xff] %v2801_v5  ;;  %v2816_v19 = vadd.f32 0.2, %v2789_v43  ;;  %v2819_v23 = vadd.f32 -0.2, %v2789_v43  ;;  %v2836_v31 = vadd.f32 %v738_v36, %v724_v30 }
 0x17d   : > { %4637 = vst [vmem:[#allocation6_spill] sm:$0xff] %v2803_v4  ;;  %4638 = vst [vmem:[#allocation7_spill] sm:$0xff] %v2808_v14  ;;  %v2822_v24 = vadd.f32 -0.6, %v2789_v43  ;;  %v2825_v25 = vadd.f32 1.8, %v2803_v4 }
 0x17e   : > { %4639 = vst [vmem:[#allocation8_spill] sm:$0xff] %v2811_v11  ;;  %4640 = vst [vmem:[#allocation9_spill] sm:$0xff] %v2816_v19  ;;  %v2828_v16 = vadd.f32 1.4, %v2803_v4  ;;  %v2831_v1 = vadd.f32 1.0, %v2803_v4  ;;  %v2834_v20 = vadd.f32 -1.0, %v2803_v4 }
 0x17f   : > { %4641 = vst [vmem:[#allocation10_spill] sm:$0xff] %v2819_v23  ;;  %4642 = vst [vmem:[#allocation11_spill] sm:$0xff] %v2822_v24  ;;  %v2839_v48 = vadd.f32 0.6, %v2803_v4  ;;  %v2842_v26 = vadd.f32 0.2, %v2803_v4 }
 0x180   : > { %4643 = vst [vmem:[#allocation12_spill] sm:$0xff] %v2828_v16  ;;  %4644 = vst [vmem:[#allocation13_spill] sm:$0xff] %v2831_v1  ;;  %v2845_v28 = vadd.f32 -0.2, %v2803_v4  ;;  %v2848_v29 = vadd.f32 -0.6, %v2803_v4 }
 0x181   : > { %4645 = vst [vmem:[#allocation14_spill] sm:$0xff] %v2834_v20  ;;  %4646 = vst [vmem:[#allocation15_spill] sm:$0xff] %v2836_v31  ;;  %vm946_vm9 = vcmp.ge.f32.partialorder %v2825_v25, 0.0  ;;  %vm970_vm10 = vcmp.ge.f32.partialorder %v2828_v16, 0.0  ;;  %vm994_vm11 = vcmp.ge.f32.partialorder %v2831_v1, 0.0  ;;  %vm1018_vm12 = vcmp.ge.f32.partialorder %v2839_v48, 0.0 }
 0x182   : > { %4647 = vst [vmem:[#allocation16_spill] sm:$0xff] %v2839_v48  ;;  %4648 = vst [vmem:[#allocation17_spill] sm:$0xff] %v2842_v26  ;;  %v2854_v10 = vsel %vm946_vm9, 1.0, %v4410_v0  ;;  %v2336_v27 = vsel %vm970_vm10, 1.0, %v4410_v0  ;;  %v2344_v61 = vsel %vm994_vm11, 1.0, %v4410_v0  ;;  %v2352_v21 = vsel %vm1018_vm12, 1.0, %v4410_v0 }
 0x183   : > { %4649 = vst [vmem:[#allocation18_spill] sm:$0xff] %v2845_v28  ;;  %4650 = vst [vmem:[#allocation19_spill] sm:$0xff] %v2848_v29  ;;  %vm1042_vm13 = vcmp.ge.f32.partialorder %v2842_v26, 0.0  ;;  %vm1066_vm14 = vcmp.ge.f32.partialorder %v2845_v28, 0.0  ;;  %vm1090_vm15 = vcmp.ge.f32.partialorder %v2848_v29, 0.0  ;;  %v2867_v62 = vsub.f32 %v2854_v10, %v2336_v27 }
 0x184   : > { %4651 = vst [vmem:[#allocation20_spill] sm:$0xff] %v2854_v10  ;;  %v2360_v33 = vsel %vm1042_vm13, 1.0, %v4410_v0  ;;  %v2368_v34 = vsel %vm1066_vm14, 1.0, %v4410_v0  ;;  %v2376_v35 = vsel %vm1090_vm15, 1.0, %v4410_v0  ;;  %v2869_v37 = vsub.f32 %v2336_v27, %v2344_v61 }
 0x185   : > { %4652 = vst [vmem:[#allocation21_spill] sm:$0xff] %v2867_v62  ;;  %v1234_v7 = vsub.f32 %v2344_v61, %v2352_v21  ;;  %v1242_v8 = vsub.f32 %v2352_v21, %v2360_v33  ;;  %v2871_v38 = vsub.f32 %v2360_v33, %v2368_v34  ;;  %v2873_v15 = vsub.f32 %v2368_v34, %v2376_v35 }
 0x186   : > { %v2876_v17 = vadd.f32 -1.4, %v2803_v4  ;;  %v2879_v39 = vadd.f32 -1.8, %v2803_v4  ;;  %v2882_v12 = vadd.f32 -2.2, %v2803_v4  ;;  %v1346_v41 = vmul.f32 %v2828_v16, %v2869_v37 }
 0x187   : > { %4653 = vst [vmem:[#allocation22_spill] sm:$0xff] %v2871_v38  ;;  %4654 = vst [vmem:[#allocation23_spill] sm:$0xff] %v2873_v15  ;;  %v1354_v42 = vmul.f32 %v2839_v48, %v1234_v7  ;;  %v1370_v45 = vmul.f32 %v2831_v1, %v1234_v7  ;;  %v1378_v46 = vmul.f32 %v2842_v26, %v1242_v8  ;;  %vm1114_vm0 = vcmp.ge.f32.partialorder %v2834_v20, 0.0 }
 0x188   : > { %4655 = vst [vmem:[#allocation24_spill] sm:$0xff] %v2876_v17  ;;  %4656 = vst [vmem:[#allocation25_spill] sm:$0xff] %v2879_v39  ;;  %v1394_v47 = vmul.f32 %v2839_v48, %v1242_v8  ;;  %v1402_v49 = vmul.f32 %v2845_v28, %v2871_v38  ;;  %vm1138_vm1 = vcmp.ge.f32.partialorder %v2876_v17, 0.0  ;;  %v2384_v51 = vsel %vm1114_vm0, 1.0, %v4410_v0 }
 0x189   : > { %v2894_v50 = vsub.f32 %v1346_v41, %v1354_v42  ;;  %v1386_v22 = vsub.f32 %v1370_v45, %v1378_v46  ;;  %v2392_v52 = vsel %vm1138_vm1, 1.0, %v4410_v0  ;;  %vm1162_vm2 = vcmp.ge.f32.partialorder %v2879_v39, 0.0 }
 0x18a   : > { %v2898_v54 = vsub.f32 %v1394_v47, %v1402_v49  ;;  %vm1186_vm3 = vcmp.ge.f32.partialorder %v2882_v12, 0.0  ;;  %v2902_v55 = vsub.f32 %v2376_v35, %v2384_v51  ;;  %v2400_v58 = vsel %vm1162_vm2, 1.0, %v4410_v0 }
 0x18b   : > { %v1586_v18 = vmul.f32 %v2828_v16, %v2894_v50  ;;  %v1594_v56 = vmul.f32 %v2842_v26, %v1386_v22  ;;  %v1610_v57 = vmul.f32 %v2831_v1, %v1386_v22  ;;  %v2408_v40 = vsel %vm1186_vm3, 1.0, %v4410_v0 }
 0x18c   : > { %4657 = vst [vmem:[#allocation26_spill] sm:$0xff] %v2898_v54  ;;  %4658 = vst [vmem:[#allocation27_spill] sm:$0xff] %v2902_v55  ;;  %v1618_v59 = vmul.f32 %v2845_v28, %v2898_v54  ;;  %v1274_v60 = vsub.f32 %v2384_v51, %v2392_v52  ;;  %v1282_v53 = vsub.f32 %v2392_v52, %v2400_v58  ;;  %vm969_vm4 = vcmp.ge.f32.partialorder %v2798_v3, 0.0 }
 0x18d   : > { %v2912_v44 = vsub.f32 %v1586_v18, %v1594_v56  ;;  %v1290_v2 = vsub.f32 %v2400_v58, %v2408_v40  ;;  %v1466_v36 = vmul.f32 %v2848_v29, %v2902_v55  ;;  %v2927_v7 = vsel %vm969_vm4, 1.0, %v4410_v0 }
 0x18e   : > { %v2917_v30 = vsub.f32 %v1610_v57, %v1618_v59  ;;  %v1474_v27 = vmul.f32 %v2876_v17, %v1274_v60  ;;  %v1490_v61 = vmul.f32 %v2834_v20, %v1274_v60  ;;  %v1498_v21 = vmul.f32 %v2879_v39, %v1282_v53 }
 0x18f   : > { %v1802_v33 = vmul.f32 %v2828_v16, %v2912_v44  ;;  %v1514_v34 = vmul.f32 %v2876_v17, %v1282_v53  ;;  %v1522_v35 = vmul.f32 %v2882_v12, %v1290_v2  ;;  %vm993_vm5 = vcmp.ge.f32.partialorder %v2801_v5, 0.0 }
 0x190   : > { %4659 = vst [vmem:[#allocation28_spill] sm:$0xff] %v2917_v30  ;;  %v1810_v8 = vmul.f32 %v2845_v28, %v2917_v30  ;;  %v2931_v41 = vsub.f32 %v1466_v36, %v1474_v27  ;;  %v1506_v42 = vsub.f32 %v1490_v61, %v1498_v21  ;;  %v2343_v46 = vsel %vm993_vm5, 1.0, %v4410_v0 }
 0x191   : > { %v1530_v45 = vsub.f32 %v1514_v34, %v1522_v35  ;;  %vm1017_vm6 = vcmp.ge.f32.partialorder %v2808_v14, 0.0  ;;  %vm1041_vm7 = vcmp.ge.f32.partialorder %v2816_v19, 0.0  ;;  %vm1065_vm8 = vcmp.ge.f32.partialorder %v2819_v23, 0.0 }
 0x192   : > { %4660 = vst [vmem:[#allocation29_spill] sm:$0xff] %v2931_v41  ;;  %v1818_v47 = vsub.f32 %v1802_v33, %v1810_v8  ;;  %v1706_v49 = vmul.f32 %v2848_v29, %v2931_v41  ;;  %v1714_v22 = vmul.f32 %v2879_v39, %v1506_v42  ;;  %v1730_v51 = vmul.f32 %v2834_v20, %v1506_v42 }
 0x193   : > { %v1738_v52 = vmul.f32 %v2882_v12, %v1530_v45  ;;  %v2351_v18 = vsel %vm1017_vm6, 1.0, %v4410_v0  ;;  %v2359_v56 = vsel %vm1041_vm7, 1.0, %v4410_v0  ;;  %v2367_v58 = vsel %vm1065_vm8, 1.0, %v4410_v0 }
 0x194   : > { %1946 = vmatprep.subr.mxu1 %v1818_v47  ;;  %v2945_v57 = vsub.f32 %v1706_v49, %v1714_v22  ;;  %vm1089_vm9 = vcmp.ge.f32.partialorder %v2822_v24, 0.0  ;;  %vm1113_vm10 = vcmp.ge.f32.partialorder %v2811_v11, 0.0  ;;  %v2953_v53 = vsub.f32 %v2927_v7, %v2343_v46 }
 0x195   : > { %v1746_v59 = vsub.f32 %v1730_v51, %v1738_v52  ;;  %v2375_v40 = vsel %vm1089_vm9, 1.0, %v4410_v0  ;;  %v2383_v60 = vsel %vm1113_vm10, 1.0, %v4410_v0  ;;  %v1233_v36 = vsub.f32 %v2343_v46, %v2351_v18 }
 0x196   : > { %4661 = vst [vmem:[#allocation30_spill] sm:$0xff] %v2945_v57  ;;  %v1922_v2 = vmul.f32 %v2848_v29, %v2945_v57  ;;  %v1241_v27 = vsub.f32 %v2351_v18, %v2359_v56  ;;  %v2957_v61 = vsub.f32 %v2359_v56, %v2367_v58  ;;  %v2960_v33 = vsub.f32 %v2367_v58, %v2375_v40 }
 0x197   : > { %v1930_v21 = vmul.f32 %v2882_v12, %v1746_v59  ;;  %v2962_v34 = vsub.f32 %v2375_v40, %v2383_v60  ;;  %v1345_v35 = vmul.f32 %v2798_v3, %v2953_v53  ;;  %v1353_v8 = vmul.f32 %v2808_v14, %v1233_v36 }
 0x198   : > { %4662 = vst [vmem:[#allocation31_spill] sm:$0xff] %v2957_v61  ;;  %4663 = vst [vmem:[#allocation32_spill] sm:$0xff] %v2960_v33  ;;  %v1369_v42 = vmul.f32 %v2801_v5, %v1233_v36  ;;  %v1377_v45 = vmul.f32 %v2816_v19, %v1241_v27  ;;  %v1393_v46 = vmul.f32 %v2808_v14, %v1241_v27  ;;  %v2973_v12 = vadd.f32 -1.4, %v2789_v43 }
 0x199   : > { %4664 = vst [vmem:[#allocation33_spill] sm:$0xff] %v2962_v34  ;;  %v1938_v47 = vsub.f32 %v1922_v2, %v1930_v21  ;;  %v1401_v49 = vmul.f32 %v2819_v23, %v2957_v61  ;;  %v2976_v22 = vadd.f32 -1.8, %v2789_v43  ;;  %v2978_v51 = vsub.f32 %v1345_v35, %v1353_v8 }
 0x19a   : > { %4665 = vst [vmem:[#allocation34_spill] sm:$0xff] %v2973_v12  ;;  %v1385_v52 = vsub.f32 %v1369_v42, %v1377_v45  ;;  %v2311_v18 = vadd.f32 -2.2, %v2789_v43  ;;  %v1465_v56 = vmul.f32 %v2822_v24, %v2962_v34  ;;  %vm1137_vm11 = vcmp.ge.f32.partialorder %v2973_v12, 0.0 }
 0x19b   : > { %4666 = vst [vmem:[#allocation35_spill] sm:$0xff] %v2976_v22  ;;  %2041 = vmatprep.subr.mxu0 %v1938_v47  ;;  %v2983_v58 = vsub.f32 %v1393_v46, %v1401_v49  ;;  %vm1161_vm12 = vcmp.ge.f32.partialorder %v2976_v22, 0.0  ;;  %v2988_v59 = vadd.f32 1.4, %v2805_v6  ;;  %v1585_v40 = vmul.f32 %v2798_v3, %v2978_v51 }
 0x19c   : > { %v1593_v2 = vmul.f32 %v2816_v19, %v1385_v52  ;;  %v1609_v36 = vmul.f32 %v2801_v5, %v1385_v52  ;;  %v2391_v27 = vsel %vm1137_vm11, 1.0, %v4410_v0  ;;  %v2399_v35 = vsel %vm1161_vm12, 1.0, %v4410_v0 }
 0x19d   : > { %4667 = vst [vmem:[#allocation36_spill] sm:$0xff] %v2983_v58  ;;  %4668 = vst [vmem:[#allocation37_spill] sm:$0xff] %v2988_v59  ;;  %v1617_v21 = vmul.f32 %v2819_v23, %v2983_v58  ;;  %vm1185_vm13 = vcmp.ge.f32.partialorder %v2311_v18, 0.0  ;;  %v1273_v8 = vsub.f32 %v2383_v60, %v2391_v27  ;;  %v1281_v46 = vsub.f32 %v2391_v27, %v2399_v35 }
 0x19e   : > { %v2998_v42 = vsub.f32 %v1585_v40, %v1593_v2  ;;  %v2407_v45 = vsel %vm1185_vm13, 1.0, %v4410_v0  ;;  %v3002_v47 = vadd.f32 1.0, %v2805_v6  ;;  %v3013_v2 = vadd.f32 0.6, %v2805_v6 }
 0x19f   : > { %v3004_v49 = vsub.f32 %v1609_v36, %v1617_v21  ;;  %v1289_v52 = vsub.f32 %v2399_v35, %v2407_v45  ;;  %v1473_v30 = vmul.f32 %v2973_v12, %v1273_v8  ;;  %v1489_v54 = vmul.f32 %v2811_v11, %v1273_v8 }
 0x1a0   : > { %4669 = vst [vmem:[#allocation38_spill] sm:$0xff] %v3002_v47  ;;  %v1801_v58 = vmul.f32 %v2798_v3, %v2998_v42  ;;  %v1497_v60 = vmul.f32 %v2976_v22, %v1281_v46  ;;  %v1513_v40 = vmul.f32 %v2973_v12, %v1281_v46  ;;  %4671 = vst [vmem:[#allocation40_spill] sm:$0xff] %v3013_v2  ;;  %v3020_v35 = vadd.f32 0.2, %v2805_v6 }
 0x1a1   : > { %4670 = vst [vmem:[#allocation39_spill] sm:$0xff] %v3004_v49  ;;  %v1809_v27 = vmul.f32 %v2819_v23, %v3004_v49  ;;  %v3017_v36 = vsub.f32 %v1465_v56, %v1473_v30  ;;  %v1521_v21 = vmul.f32 %v2311_v18, %v1289_v52  ;;  %v3023_v45 = vadd.f32 -0.2, %v2805_v6 }
 0x1a2   : > { %4673 = vst [vmem:[#allocation42_spill] sm:$0xff] %v3020_v35  ;;  %v1505_v8 = vsub.f32 %v1489_v54, %v1497_v60  ;;  %vm968_vm14 = vcmp.ge.f32.partialorder %v2988_v59, 0.0  ;;  %vm992_vm15 = vcmp.ge.f32.partialorder %v3002_v47, 0.0  ;;  %v4675_v49 = vmov 0.0  }
 0x1a3   : > { %4672 = vst [vmem:[#allocation41_spill] sm:$0xff] %v3017_v36  ;;  %4674 = vst [vmem:[#allocation43_spill] sm:$0xff] %v3023_v45  ;;  %v1817_v46 = vsub.f32 %v1801_v58, %v1809_v27  ;;  %v1529_v0 = vsub.f32 %v1513_v40, %v1521_v21  ;;  %v1705_v61 = vmul.f32 %v2822_v24, %v3017_v36  ;;  %v3030_v30 = vsel %vm968_vm14, 1.0, %v4675_v49 }
 0x1a4   : > { %v1713_v56 = vmul.f32 %v2976_v22, %v1505_v8  ;;  %v1729_v52 = vmul.f32 %v2811_v11, %v1505_v8  ;;  %v2342_v54 = vsel %vm992_vm15, 1.0, %v4675_v49  ;;  %vm1016_vm0 = vcmp.ge.f32.partialorder %v3013_v2, 0.0 }
 0x1a5   : > { %1947 = vmatpush1.msra.mxu1 %v1817_v46  ;;  %v1737_v60 = vmul.f32 %v2311_v18, %v1529_v0  ;;  %v2350_v29 = vsel %vm1016_vm0, 1.0, %v4675_v49  ;;  %vm1040_vm1 = vcmp.ge.f32.partialorder %v3020_v35, 0.0  ;;  %vm1064_vm2 = vcmp.ge.f32.partialorder %v3023_v45, 0.0 }
 0x1a6   : > { %v3039_v58 = vsub.f32 %v1705_v61, %v1713_v56  ;;  %v2358_v40 = vsel %vm1040_vm1, 1.0, %v4675_v49  ;;  %v3043_v27 = vsel %vm1064_vm2, 1.0, %v4675_v49  ;;  %v3046_v21 = vsub.f32 %v3030_v30, %v2342_v54 }
 0x1a7   : > { %4677 = vst [vmem:[#allocation45_spill] sm:$0xff] %v3043_v27  ;;  %v1745_v8 = vsub.f32 %v1729_v52, %v1737_v60  ;;  %v1232_v38 = vsub.f32 %v2342_v54, %v2350_v29  ;;  %v1240_v46 = vsub.f32 %v2350_v29, %v2358_v40  ;;  %v3049_v0 = vsub.f32 %v2358_v40, %v3043_v27 }
 0x1a8   : > { %4676 = vst [vmem:[#allocation44_spill] sm:$0xff] %v3039_v58  ;;  %v1921_v22 = vmul.f32 %v2822_v24, %v3039_v58  ;;  %v1344_v61 = vmul.f32 %v2988_v59, %v3046_v21  ;;  %v3056_v56 = vadd.f32 -0.6, %v2805_v6  ;;  %v3059_v12 = vadd.f32 -1.0, %v2805_v6 }
 0x1a9   : > { %4678 = vst [vmem:[#allocation46_spill] sm:$0xff] %v3049_v0  ;;  %v1929_v36 = vmul.f32 %v2311_v18, %v1745_v8  ;;  %v1352_v52 = vmul.f32 %v3013_v2, %v1232_v38  ;;  %v1368_v29 = vmul.f32 %v3002_v47, %v1232_v38  ;;  %v1376_v54 = vmul.f32 %v3020_v35, %v1240_v46 }
 0x1aa   : > { %4679 = vst [vmem:[#allocation47_spill] sm:$0xff] %v3056_v56  ;;  %4680 = vst [vmem:[#allocation48_spill] sm:$0xff] %v3059_v12  ;;  %v1392_v60 = vmul.f32 %v3013_v2, %v1240_v46  ;;  %v1400_v40 = vmul.f32 %v3023_v45, %v3049_v0  ;;  %v3068_v24 = vadd.f32 -1.4, %v2805_v6  ;;  %v3071_v27 = vadd.f32 -1.8, %v2805_v6 }
 0x1ab   : > { %v1937_v58 = vsub.f32 %v1921_v22, %v1929_v36  ;;  %v3073_v11 = vsub.f32 %v1344_v61, %v1352_v52  ;;  %v1384_v18 = vsub.f32 %v1368_v29, %v1376_v54  ;;  %v3076_v8 = vadd.f32 -2.2, %v2805_v6 }
 0x1ac   : > { %4681 = vst [vmem:[#allocation49_spill] sm:$0xff] %v3068_v24  ;;  %4682 = vst [vmem:[#allocation50_spill] sm:$0xff] %v3071_v27  ;;  %v3078_v38 = vsub.f32 %v1392_v60, %v1400_v40  ;;  %vm1088_vm3 = vcmp.ge.f32.partialorder %v3056_v56, 0.0  ;;  %vm1112_vm4 = vcmp.ge.f32.partialorder %v3059_v12, 0.0  ;;  %vm1136_vm5 = vcmp.ge.f32.partialorder %v3068_v24, 0.0 }
 0x1ad   : > { %2042 = vmatpush1.msra.mxu0 %v1937_v58  ;;  %v1584_v46 = vmul.f32 %v2988_v59, %v3073_v11  ;;  %v1592_v22 = vmul.f32 %v3020_v35, %v1384_v18  ;;  %v1608_v36 = vmul.f32 %v3002_v47, %v1384_v18  ;;  %v3088_v61 = vsel %vm1088_vm3, 1.0, %v4675_v49 }
 0x1ae   : > { %4683 = vst [vmem:[#allocation51_spill] sm:$0xff] %v3078_v38  ;;  %4684 = vst [vmem:[#allocation52_spill] sm:$0xff] %v3088_v61  ;;  %v1616_v52 = vmul.f32 %v3023_v45, %v3078_v38  ;;  %v2382_v29 = vsel %vm1112_vm4, 1.0, %v4675_v49  ;;  %v2390_v54 = vsel %vm1136_vm5, 1.0, %v4675_v49  ;;  %vm1160_vm6 = vcmp.ge.f32.partialorder %v3071_v27, 0.0 }
 0x1af   : > { %v3095_v58 = vsub.f32 %v1584_v46, %v1592_v22  ;;  %v2398_v60 = vsel %vm1160_vm6, 1.0, %v4675_v49  ;;  %vm1184_vm7 = vcmp.ge.f32.partialorder %v3076_v8, 0.0  ;;  %v3100_v40 = vsub.f32 %v3088_v61, %v2382_v29 }
 0x1b0   : > { %v3102_v18 = vsub.f32 %v1608_v36, %v1616_v52  ;;  %v2406_v0 = vsel %vm1184_vm7, 1.0, %v4675_v49  ;;  %v1272_v38 = vsub.f32 %v2382_v29, %v2390_v54  ;;  %v1280_v34 = vsub.f32 %v2390_v54, %v2398_v60 }
 0x1b1   : > { %4685 = vst [vmem:[#allocation53_spill] sm:$0xff] %v3100_v40  ;;  %v1800_v23 = vmul.f32 %v2988_v59, %v3095_v58  ;;  %v1288_v33 = vsub.f32 %v2398_v60, %v2406_v0  ;;  %v1464_v46 = vmul.f32 %v3056_v56, %v3100_v40  ;;  %v3110_v22 = vadd.f32 1.4, %v2791_v13 }
 0x1b2   : > { %4686 = vst [vmem:[#allocation54_spill] sm:$0xff] %v3102_v18  ;;  %v1808_v61 = vmul.f32 %v3023_v45, %v3102_v18  ;;  %v1472_v36 = vmul.f32 %v3068_v24, %v1272_v38  ;;  %v1488_v52 = vmul.f32 %v3059_v12, %v1272_v38  ;;  %v1496_v29 = vmul.f32 %v3071_v27, %v1280_v34 }
 0x1b3   : > { %4687 = vst [vmem:[#allocation55_spill] sm:$0xff] %v3110_v22  ;;  %v1512_v54 = vmul.f32 %v3068_v24, %v1280_v34  ;;  %v1520_v39 = vmul.f32 %v3076_v8, %v1288_v33  ;;  %v3120_v0 = vadd.f32 1.0, %v2791_v13  ;;  %v3123_v60 = vadd.f32 0.6, %v2791_v13 }
 0x1b4   : > { %v1816_v40 = vsub.f32 %v1800_v23, %v1808_v61  ;;  %v3125_v57 = vsub.f32 %v1464_v46, %v1472_v36  ;;  %v1504_v18 = vsub.f32 %v1488_v52, %v1496_v29  ;;  %v3128_v45 = vadd.f32 0.2, %v2791_v13 }
 0x1b5   : > { %4688 = vst [vmem:[#allocation56_spill] sm:$0xff] %v3120_v0  ;;  %4689 = vst [vmem:[#allocation57_spill] sm:$0xff] %v3123_v60  ;;  %v1528_v38 = vsub.f32 %v1512_v54, %v1520_v39  ;;  %v3131_v17 = vadd.f32 -0.2, %v2791_v13  ;;  %vm967_vm8 = vcmp.ge.f32.partialorder %v3110_v22, 0.0  ;;  %vm991_vm9 = vcmp.ge.f32.partialorder %v3120_v0, 0.0 }
 0x1b6   : > { %4690 = vst [vmem:[#allocation58_spill] sm:$0xff] %v3125_v57  ;;  %4691 = vst [vmem:[#allocation59_spill] sm:$0xff] %v3128_v45  ;;  %1948 = vmatprep.subr.mxu1 %v1816_v40  ;;  %v1704_v33 = vmul.f32 %v3056_v56, %v3125_v57  ;;  %v1712_v23 = vmul.f32 %v3071_v27, %v1504_v18  ;;  %v1728_v34 = vmul.f32 %v3059_v12, %v1504_v18 }
 0x1b7   : > { %4692 = vst [vmem:[#allocation60_spill] sm:$0xff] %v3131_v17  ;;  %v3140_v61 = vsel %vm967_vm8, 1.0, %v4675_v49  ;;  %v1736_v39 = vmul.f32 %v3076_v8, %v1528_v38  ;;  %v2341_v46 = vsel %vm991_vm9, 1.0, %v4675_v49  ;;  %vm1015_vm10 = vcmp.ge.f32.partialorder %v3123_v60, 0.0 }
 0x1b8   : > { %vm1039_vm11 = vcmp.ge.f32.partialorder %v3128_v45, 0.0  ;;  %v3146_v36 = vsub.f32 %v1704_v33, %v1712_v23  ;;  %v2349_v40 = vsel %vm1015_vm10, 1.0, %v4675_v49  ;;  %vm1063_vm12 = vcmp.ge.f32.partialorder %v3131_v17, 0.0 }
 0x1b9   : > { %v2357_v52 = vsel %vm1039_vm11, 1.0, %v4675_v49  ;;  %v1744_v18 = vsub.f32 %v1728_v34, %v1736_v39  ;;  %v3152_v29 = vsel %vm1063_vm12, 1.0, %v4675_v49  ;;  %v3155_v54 = vsub.f32 %v3140_v61, %v2341_v46 }
 0x1ba   : > { %4693 = vst [vmem:[#allocation61_spill] sm:$0xff] %v3146_v36  ;;  %4694 = vst [vmem:[#allocation62_spill] sm:$0xff] %v3152_v29  ;;  %v1231_v38 = vsub.f32 %v2341_v46, %v2349_v40  ;;  %v1920_v27 = vmul.f32 %v3056_v56, %v3146_v36  ;;  %v1239_v24 = vsub.f32 %v2349_v40, %v2357_v52  ;;  %v3163_v23 = vadd.f32 -0.6, %v2791_v13 }
 0x1bb   : > { %v3160_v33 = vsub.f32 %v2357_v52, %v3152_v29  ;;  %v1928_v57 = vmul.f32 %v3076_v8, %v1744_v18  ;;  %v1343_v34 = vmul.f32 %v3110_v22, %v3155_v54  ;;  %v3175_v52 = vadd.f32 -1.0, %v2791_v13 }
 0x1bc   : > { %4696 = vst [vmem:[#allocation64_spill] sm:$0xff] %v3163_v23  ;;  %v1351_v39 = vmul.f32 %v3123_v60, %v1231_v38  ;;  %v1367_v12 = vmul.f32 %v3120_v0, %v1231_v38  ;;  %v1375_v46 = vmul.f32 %v3128_v45, %v1239_v24  ;;  %v1391_v56 = vmul.f32 %v3123_v60, %v1239_v24 }
 0x1bd   : > { %4695 = vst [vmem:[#allocation63_spill] sm:$0xff] %v3160_v33  ;;  %v1399_v40 = vmul.f32 %v3131_v17, %v3160_v33  ;;  %4697 = vst [vmem:[#allocation65_spill] sm:$0xff] %v3175_v52  ;;  %v1936_v29 = vsub.f32 %v1920_v27, %v1928_v57  ;;  %v3180_v8 = vadd.f32 -1.4, %v2791_v13  ;;  %v3183_v18 = vadd.f32 -1.8, %v2791_v13 }
 0x1be   : > { %v3177_v36 = vsub.f32 %v1343_v34, %v1351_v39  ;;  %v1383_v38 = vsub.f32 %v1367_v12, %v1375_v46  ;;  %v3188_v24 = vadd.f32 -2.2, %v2791_v13  ;;  %vm1087_vm13 = vcmp.ge.f32.partialorder %v3163_v23, 0.0 }
 0x1bf   : > { %4698 = vst [vmem:[#allocation66_spill] sm:$0xff] %v3180_v8  ;;  %4699 = vst [vmem:[#allocation67_spill] sm:$0xff] %v3183_v18  ;;  %v3185_v41 = vsub.f32 %v1391_v56, %v1399_v40  ;;  %2043 = vmatprep.subr.mxu0 %v1936_v29  ;;  %v3194_v27 = vsel %vm1087_vm13, 1.0, %v4675_v49  ;;  %vm1111_vm14 = vcmp.ge.f32.partialorder %v3175_v52, 0.0  ;;  %vm1135_vm15 = vcmp.ge.f32.partialorder %v3180_v8, 0.0 }
 0x1c0   : > { %v1583_v57 = vmul.f32 %v3110_v22, %v3177_v36  ;;  %4701 = vst [vmem:[#allocation69_spill] sm:$0xff] %v3194_v27  ;;  %v1591_v12 = vmul.f32 %v3128_v45, %v1383_v38  ;;  %v1607_v56 = vmul.f32 %v3120_v0, %v1383_v38  ;;  %v2381_v39 = vsel %vm1111_vm14, 1.0, %v4675_v49 }
 0x1c1   : > { %4700 = vst [vmem:[#allocation68_spill] sm:$0xff] %v3185_v41  ;;  %v1615_v34 = vmul.f32 %v3131_v17, %v3185_v41  ;;  %v2389_v29 = vsel %vm1135_vm15, 1.0, %v4675_v49  ;;  %vm1159_vm0 = vcmp.ge.f32.partialorder %v3183_v18, 0.0  ;;  %vm1183_vm1 = vcmp.ge.f32.partialorder %v3188_v24, 0.0 }
 0x1c2   : > { %v3207_v46 = vsub.f32 %v3194_v27, %v2381_v39  ;;  %v3209_v40 = vsub.f32 %v1583_v57, %v1591_v12  ;;  %v2397_v38 = vsel %vm1159_vm0, 1.0, %v4675_v49  ;;  %v2405_v20 = vsel %vm1183_vm1, 1.0, %v4675_v49 }
 0x1c3   : > { %v3211_v33 = vsub.f32 %v1607_v56, %v1615_v34  ;;  %v1271_v41 = vsub.f32 %v2381_v39, %v2389_v29  ;;  %v1279_v55 = vsub.f32 %v2389_v29, %v2397_v38  ;;  %v1287_v28 = vsub.f32 %v2397_v38, %v2405_v20 }
 0x1c4   : > { %4702 = vst [vmem:[#allocation70_spill] sm:$0xff] %v3207_v46  ;;  %v1463_v15 = vmul.f32 %v3163_v23, %v3207_v46  ;;  %v1799_v59 = vmul.f32 %v3110_v22, %v3209_v40  ;;  %v3222_v57 = vadd.f32 1.4, %v2813_v9  ;;  %v3225_v12 = vadd.f32 1.0, %v2813_v9 }
 0x1c5   : > { %4703 = vst [vmem:[#allocation71_spill] sm:$0xff] %v3211_v33  ;;  %v1807_v27 = vmul.f32 %v3131_v17, %v3211_v33  ;;  %v1471_v56 = vmul.f32 %v3180_v8, %v1271_v41  ;;  %v1487_v34 = vmul.f32 %v3175_v52, %v1271_v41  ;;  %v1495_v20 = vmul.f32 %v3183_v18, %v1279_v55 }
 0x1c6   : > { %4704 = vst [vmem:[#allocation72_spill] sm:$0xff] %v3222_v57  ;;  %4705 = vst [vmem:[#allocation73_spill] sm:$0xff] %v3225_v12  ;;  %v1511_v39 = vmul.f32 %v3180_v8, %v1279_v55  ;;  %v1519_v38 = vmul.f32 %v3188_v24, %v1287_v28  ;;  %v3233_v46 = vadd.f32 0.6, %v2813_v9  ;;  %v3236_v33 = vadd.f32 0.2, %v2813_v9 }
 0x1c7   : > { %v1815_v29 = vsub.f32 %v1799_v59, %v1807_v27  ;;  %v3238_v17 = vsub.f32 %v1463_v15, %v1471_v56  ;;  %v1503_v22 = vsub.f32 %v1487_v34, %v1495_v20  ;;  %v3241_v10 = vadd.f32 -0.2, %v2813_v9 }
 0x1c8   : > { %4706 = vst [vmem:[#allocation74_spill] sm:$0xff] %v3233_v46  ;;  %4707 = vst [vmem:[#allocation75_spill] sm:$0xff] %v3236_v33  ;;  %vm966_vm2 = vcmp.ge.f32.partialorder %v3222_v57, 0.0  ;;  %v1527_v41 = vsub.f32 %v1511_v39, %v1519_v38  ;;  %vm990_vm3 = vcmp.ge.f32.partialorder %v3225_v12, 0.0  ;;  %vm1014_vm4 = vcmp.ge.f32.partialorder %v3233_v46, 0.0 }
 0x1c9   : > { %4708 = vst [vmem:[#allocation76_spill] sm:$0xff] %v3238_v17  ;;  %4709 = vst [vmem:[#allocation77_spill] sm:$0xff] %v3241_v10  ;;  %1949 = vmatpush1.msra.mxu1 %v1815_v29  ;;  %v3245_v55 = vsel %vm966_vm2, 1.0, %v4675_v49  ;;  %v1703_v28 = vmul.f32 %v3163_v23, %v3238_v17  ;;  %v1711_v15 = vmul.f32 %v3183_v18, %v1503_v22  ;;  %v2340_v27 = vsel %vm990_vm3, 1.0, %v4675_v49 }
 0x1ca   : > { %4710 = vst [vmem:[#allocation78_spill] sm:$0xff] %v3245_v55  ;;  %v1727_v59 = vmul.f32 %v3175_v52, %v1503_v22  ;;  %v1735_v56 = vmul.f32 %v3188_v24, %v1527_v41  ;;  %v2348_v34 = vsel %vm1014_vm4, 1.0, %v4675_v49  ;;  %vm1038_vm5 = vcmp.ge.f32.partialorder %v3236_v33, 0.0 }
 0x1cb   : > { %vm1062_vm6 = vcmp.ge.f32.partialorder %v3241_v10, 0.0  ;;  %v3258_v20 = vsub.f32 %v1703_v28, %v1711_v15  ;;  %v2356_v39 = vsel %vm1038_vm5, 1.0, %v4675_v49  ;;  %v3265_v38 = vsub.f32 %v3245_v55, %v2340_v27 }
 0x1cc   : > { %v3262_v29 = vsel %vm1062_vm6, 1.0, %v4675_v49  ;;  %v1743_v22 = vsub.f32 %v1727_v59, %v1735_v56  ;;  %v1230_v18 = vsub.f32 %v2340_v27, %v2348_v34  ;;  %v1238_v8 = vsub.f32 %v2348_v34, %v2356_v39 }
 0x1cd   : > { %4711 = vst [vmem:[#allocation79_spill] sm:$0xff] %v3258_v20  ;;  %4712 = vst [vmem:[#allocation80_spill] sm:$0xff] %v3262_v29  ;;  %v3268_v41 = vsub.f32 %v2356_v39, %v3262_v29  ;;  %v1919_v17 = vmul.f32 %v3163_v23, %v3258_v20  ;;  %v1342_v28 = vmul.f32 %v3222_v57, %v3265_v38  ;;  %v3275_v15 = vadd.f32 -0.6, %v2813_v9 }
 0x1ce   : > { %v3278_v52 = vadd.f32 -1.0, %v2813_v9  ;;  %v1927_v3 = vmul.f32 %v3188_v24, %v1743_v22  ;;  %v1350_v59 = vmul.f32 %v3233_v46, %v1230_v18  ;;  %v1366_v27 = vmul.f32 %v3225_v12, %v1230_v18 }
 0x1cf   : > { %4713 = vst [vmem:[#allocation81_spill] sm:$0xff] %v3268_v41  ;;  %4714 = vst [vmem:[#allocation82_spill] sm:$0xff] %v3275_v15  ;;  %v1374_v56 = vmul.f32 %v3236_v33, %v1238_v8  ;;  %v1390_v34 = vmul.f32 %v3233_v46, %v1238_v8  ;;  %v1398_v39 = vmul.f32 %v3241_v10, %v3268_v41  ;;  %v3288_v23 = vadd.f32 -1.4, %v2813_v9 }
 0x1d0   : > { %4715 = vst [vmem:[#allocation83_spill] sm:$0xff] %v3278_v52  ;;  %v3291_v29 = vadd.f32 -1.8, %v2813_v9  ;;  %v1935_v20 = vsub.f32 %v1919_v17, %v1927_v3  ;;  %v3293_v16 = vsub.f32 %v1342_v28, %v1350_v59  ;;  %v3296_v22 = vadd.f32 -2.2, %v2813_v9 }
 0x1d1   : > { %4716 = vst [vmem:[#allocation84_spill] sm:$0xff] %v3288_v23  ;;  %v1382_v24 = vsub.f32 %v1366_v27, %v1374_v56  ;;  %v3298_v18 = vsub.f32 %v1390_v34, %v1398_v39  ;;  %vm1086_vm7 = vcmp.ge.f32.partialorder %v3275_v15, 0.0  ;;  %vm1110_vm8 = vcmp.ge.f32.partialorder %v3278_v52, 0.0 }
 0x1d2   : > { %4717 = vst [vmem:[#allocation85_spill] sm:$0xff] %v3291_v29  ;;  %vm1134_vm9 = vcmp.ge.f32.partialorder %v3288_v23, 0.0  ;;  %2044 = vmatpush1.msra.mxu0 %v1935_v20  ;;  %v1582_v8 = vmul.f32 %v3222_v57, %v3293_v16  ;;  %v3308_v28 = vsel %vm1086_vm7, 1.0, %v4675_v49  ;;  %v2380_v27 = vsel %vm1110_vm8, 1.0, %v4675_v49 }
 0x1d3   : > { %4718 = vst [vmem:[#allocation86_spill] sm:$0xff] %v3298_v18  ;;  %v1590_v3 = vmul.f32 %v3236_v33, %v1382_v24  ;;  %v1606_v17 = vmul.f32 %v3225_v12, %v1382_v24  ;;  %4719 = vst [vmem:[#allocation87_spill] sm:$0xff] %v3308_v28  ;;  %v1614_v59 = vmul.f32 %v3241_v10, %v3298_v18  ;;  %v2388_v56 = vsel %vm1134_vm9, 1.0, %v4675_v49 }
 0x1d4   : > { %vm1158_vm10 = vcmp.ge.f32.partialorder %v3291_v29, 0.0  ;;  %vm1182_vm11 = vcmp.ge.f32.partialorder %v3296_v22, 0.0  ;;  %v3320_v39 = vsub.f32 %v3308_v28, %v2380_v27  ;;  %v1270_v18 = vsub.f32 %v2380_v27, %v2388_v56 }
 0x1d5   : > { %v3315_v20 = vsub.f32 %v1582_v8, %v1590_v3  ;;  %v2396_v34 = vsel %vm1158_vm10, 1.0, %v4675_v49  ;;  %v3322_v24 = vsub.f32 %v1606_v17, %v1614_v59  ;;  %v2404_v41 = vsel %vm1182_vm11, 1.0, %v4675_v49 }
 0x1d6   : > { %4721 = vst [vmem:[#allocation89_spill] sm:$0xff] %v3320_v39  ;;  %v1278_v4 = vsub.f32 %v2388_v56, %v2396_v34  ;;  %v1286_v33 = vsub.f32 %v2396_v34, %v2404_v41  ;;  %v1462_v8 = vmul.f32 %v3275_v15, %v3320_v39  ;;  %v3330_v3 = vadd.f32 1.4, %v2793_v63 }
 0x1d7   : > { %4720 = vst [vmem:[#allocation88_spill] sm:$0xff] %v3315_v20  ;;  %4722 = vst [vmem:[#allocation90_spill] sm:$0xff] %v3322_v24  ;;  %v1798_v55 = vmul.f32 %v3222_v57, %v3315_v20  ;;  %v1806_v28 = vmul.f32 %v3241_v10, %v3322_v24  ;;  %v1470_v17 = vmul.f32 %v3288_v23, %v1270_v18  ;;  %v3340_v41 = vadd.f32 1.0, %v2793_v63 }
 0x1d8   : > { %4723 = vst [vmem:[#allocation91_spill] sm:$0xff] %v3330_v3  ;;  %v1486_v59 = vmul.f32 %v3278_v52, %v1270_v18  ;;  %v1494_v27 = vmul.f32 %v3291_v29, %v1278_v4  ;;  %v1510_v56 = vmul.f32 %v3288_v23, %v1278_v4  ;;  %v1518_v57 = vmul.f32 %v3296_v22, %v1286_v33 }
 0x1d9   : > { %4724 = vst [vmem:[#allocation92_spill] sm:$0xff] %v3340_v41  ;;  %v3343_v34 = vadd.f32 0.6, %v2793_v63  ;;  %v1814_v39 = vsub.f32 %v1798_v55, %v1806_v28  ;;  %v3345_v20 = vsub.f32 %v1462_v8, %v1470_v17  ;;  %v3348_v10 = vadd.f32 0.2, %v2793_v63 }
 0x1da   : > { %v1502_v24 = vsub.f32 %v1486_v59, %v1494_v27  ;;  %v1526_v18 = vsub.f32 %v1510_v56, %v1518_v57  ;;  %v3351_v46 = vadd.f32 -0.2, %v2793_v63  ;;  %vm965_vm12 = vcmp.ge.f32.partialorder %v3330_v3, 0.0 }
 0x1db   : > { %4725 = vst [vmem:[#allocation93_spill] sm:$0xff] %v3343_v34  ;;  %4726 = vst [vmem:[#allocation94_spill] sm:$0xff] %v3345_v20  ;;  %vm989_vm13 = vcmp.ge.f32.partialorder %v3340_v41, 0.0  ;;  %1950 = vmatprep.subr.mxu1 %v1814_v39  ;;  %v1702_v4 = vmul.f32 %v3275_v15, %v3345_v20  ;;  %v3360_v28 = vsel %vm965_vm12, 1.0, %v4675_v49  ;;  %vm1013_vm14 = vcmp.ge.f32.partialorder %v3343_v34, 0.0 }
 0x1dc   : > { %4727 = vst [vmem:[#allocation95_spill] sm:$0xff] %v3348_v10  ;;  %4728 = vst [vmem:[#allocation96_spill] sm:$0xff] %v3351_v46  ;;  %v1710_v33 = vmul.f32 %v3291_v29, %v1502_v24  ;;  %v1726_v55 = vmul.f32 %v3278_v52, %v1502_v24  ;;  %v1734_v57 = vmul.f32 %v3296_v22, %v1526_v18  ;;  %v2339_v8 = vsel %vm989_vm13, 1.0, %v4675_v49 }
 0x1dd   : > { %4729 = vst [vmem:[#allocation97_spill] sm:$0xff] %v3360_v28  ;;  %vm1037_vm15 = vcmp.ge.f32.partialorder %v3348_v10, 0.0  ;;  %v2347_v39 = vsel %vm1013_vm14, 1.0, %v4675_v49  ;;  %vm1061_vm0 = vcmp.ge.f32.partialorder %v3351_v46, 0.0  ;;  %v3375_v56 = vsub.f32 %v3360_v28, %v2339_v8 }
 0x1de   : > { %v3366_v17 = vsub.f32 %v1702_v4, %v1710_v33  ;;  %v2355_v59 = vsel %vm1037_vm15, 1.0, %v4675_v49  ;;  %v1742_v24 = vsub.f32 %v1726_v55, %v1734_v57  ;;  %v3372_v27 = vsel %vm1061_vm0, 1.0, %v4675_v49 }
 0x1df   : > { %4731 = vst [vmem:[#allocation99_spill] sm:$0xff] %v3372_v27  ;;  %4732 = vst [vmem:[#allocation100_spill] sm:$0xff] %v3375_v56  ;;  %v1229_v18 = vsub.f32 %v2339_v8, %v2347_v39  ;;  %v1237_v23 = vsub.f32 %v2347_v39, %v2355_v59  ;;  %v3380_v4 = vsub.f32 %v2355_v59, %v3372_v27  ;;  %v3383_v33 = vadd.f32 -0.6, %v2793_v63 }
 0x1e0   : > { %4730 = vst [vmem:[#allocation98_spill] sm:$0xff] %v3366_v17  ;;  %v1918_v29 = vmul.f32 %v3275_v15, %v3366_v17  ;;  %v1926_v20 = vmul.f32 %v3296_v22, %v1742_v24  ;;  %v1341_v55 = vmul.f32 %v3330_v3, %v3375_v56  ;;  %v3395_v59 = vadd.f32 -1.0, %v2793_v63 }
 0x1e1   : > { %4733 = vst [vmem:[#allocation101_spill] sm:$0xff] %v3380_v4  ;;  %4734 = vst [vmem:[#allocation102_spill] sm:$0xff] %v3383_v33  ;;  %v1349_v57 = vmul.f32 %v3343_v34, %v1229_v18  ;;  %v1365_v52 = vmul.f32 %v3340_v41, %v1229_v18  ;;  %v1373_v8 = vmul.f32 %v3348_v10, %v1237_v23  ;;  %v3400_v22 = vadd.f32 -1.4, %v2793_v63 }
 0x1e2   : > { %v1389_v15 = vmul.f32 %v3343_v34, %v1237_v23  ;;  %v1397_v39 = vmul.f32 %v3351_v46, %v3380_v4  ;;  %4735 = vst [vmem:[#allocation103_spill] sm:$0xff] %v3395_v59  ;;  %v1934_v27 = vsub.f32 %v1918_v29, %v1926_v20  ;;  %v3403_v24 = vadd.f32 -1.8, %v2793_v63 }
 0x1e3   : > { %v3397_v17 = vsub.f32 %v1341_v55, %v1349_v57  ;;  %4737 = vst [vmem:[#allocation105_spill] sm:$0xff] %v3400_v22  ;;  %v1381_v18 = vsub.f32 %v1365_v52, %v1373_v8  ;;  %v3408_v23 = vadd.f32 -2.2, %v2793_v63  ;;  %vm1085_vm1 = vcmp.ge.f32.partialorder %v3383_v33, 0.0 }
 0x1e4   : > { %4738 = vst [vmem:[#allocation106_spill] sm:$0xff] %v3403_v24  ;;  %v3405_v28 = vsub.f32 %v1389_v15, %v1397_v39  ;;  %2045 = vmatprep.subr.mxu0 %v1934_v27  ;;  %v3414_v20 = vsel %vm1085_vm1, 1.0, %v4675_v49  ;;  %vm1109_vm2 = vcmp.ge.f32.partialorder %v3395_v59, 0.0  ;;  %vm1133_vm3 = vcmp.ge.f32.partialorder %v3400_v22, 0.0 }
 0x1e5   : > { %4736 = vst [vmem:[#allocation104_spill] sm:$0xff] %v3397_v17  ;;  %v1581_v29 = vmul.f32 %v3330_v3, %v3397_v17  ;;  %4740 = vst [vmem:[#allocation108_spill] sm:$0xff] %v3414_v20  ;;  %v1589_v52 = vmul.f32 %v3348_v10, %v1381_v18  ;;  %v1605_v15 = vmul.f32 %v3340_v41, %v1381_v18  ;;  %v2379_v57 = vsel %vm1109_vm2, 1.0, %v4675_v49 }
 0x1e6   : > { %4739 = vst [vmem:[#allocation107_spill] sm:$0xff] %v3405_v28  ;;  %v1613_v55 = vmul.f32 %v3351_v46, %v3405_v28  ;;  %v2387_v27 = vsel %vm1133_vm3, 1.0, %v4675_v49  ;;  %vm1157_vm4 = vcmp.ge.f32.partialorder %v3403_v24, 0.0  ;;  %vm1181_vm5 = vcmp.ge.f32.partialorder %v3408_v23, 0.0 }
 0x1e7   : > { %v3427_v8 = vsub.f32 %v3414_v20, %v2379_v57  ;;  %v3429_v39 = vsub.f32 %v1581_v29, %v1589_v52  ;;  %v2395_v18 = vsel %vm1157_vm4, 1.0, %v4675_v49  ;;  %v2403_v10 = vsel %vm1181_vm5, 1.0, %v4675_v49 }
 0x1e8   : > { %v3431_v4 = vsub.f32 %v1605_v15, %v1613_v55  ;;  %v1269_v28 = vsub.f32 %v2379_v57, %v2387_v27  ;;  %v1277_v34 = vsub.f32 %v2387_v27, %v2395_v18  ;;  %v1285_v17 = vsub.f32 %v2395_v18, %v2403_v10 }
 0x1e9   : > { %4741 = vst [vmem:[#allocation109_spill] sm:$0xff] %v3427_v8  ;;  %4742 = vst [vmem:[#allocation110_spill] sm:$0xff] %v3429_v39  ;;  %v1461_v41 = vmul.f32 %v3383_v33, %v3427_v8  ;;  %v1797_v56 = vmul.f32 %v3330_v3, %v3429_v39  ;;  %v3442_v29 = vadd.f32 1.4, %v2836_v31  ;;  %v3445_v52 = vadd.f32 1.0, %v2836_v31 }
 0x1ea   : > { %4743 = vst [vmem:[#allocation111_spill] sm:$0xff] %v3431_v4  ;;  %v1805_v20 = vmul.f32 %v3351_v46, %v3431_v4  ;;  %v1469_v15 = vmul.f32 %v3400_v22, %v1269_v28  ;;  %v1485_v55 = vmul.f32 %v3395_v59, %v1269_v28  ;;  %v1493_v10 = vmul.f32 %v3403_v24, %v1277_v34 }
 0x1eb   : > { %4744 = vst [vmem:[#allocation112_spill] sm:$0xff] %v3442_v29  ;;  %4745 = vst [vmem:[#allocation113_spill] sm:$0xff] %v3445_v52  ;;  %v1509_v57 = vmul.f32 %v3400_v22, %v1277_v34  ;;  %v1517_v18 = vmul.f32 %v3408_v23, %v1285_v17  ;;  %v3453_v8 = vadd.f32 0.6, %v2836_v31  ;;  %v3456_v4 = vadd.f32 0.2, %v2836_v31 }
 0x1ec   : > { %v1813_v27 = vsub.f32 %v1797_v56, %v1805_v20  ;;  %v3458_v46 = vsub.f32 %v1461_v41, %v1469_v15  ;;  %v1501_v3 = vsub.f32 %v1485_v55, %v1493_v10  ;;  %v3461_v39 = vadd.f32 -0.2, %v2836_v31 }
 0x1ed   : > { %4746 = vst [vmem:[#allocation114_spill] sm:$0xff] %v3453_v8  ;;  %4747 = vst [vmem:[#allocation115_spill] sm:$0xff] %v3456_v4  ;;  %vm964_vm6 = vcmp.ge.f32.partialorder %v3442_v29, 0.0  ;;  %v1525_v28 = vsub.f32 %v1509_v57, %v1517_v18  ;;  %vm988_vm7 = vcmp.ge.f32.partialorder %v3445_v52, 0.0  ;;  %vm1012_vm8 = vcmp.ge.f32.partialorder %v3453_v8, 0.0 }
 0x1ee   : > { %4748 = vst [vmem:[#allocation116_spill] sm:$0xff] %v3458_v46  ;;  %4749 = vst [vmem:[#allocation117_spill] sm:$0xff] %v3461_v39  ;;  %1951 = vmatpush1.msra.mxu1 %v1813_v27  ;;  %v3465_v34 = vsel %vm964_vm6, 1.0, %v4675_v49  ;;  %v1701_v17 = vmul.f32 %v3383_v33, %v3458_v46  ;;  %v1709_v41 = vmul.f32 %v3403_v24, %v1501_v3  ;;  %v2338_v20 = vsel %vm988_vm7, 1.0, %v4675_v49 }
 0x1ef   : > { %4750 = vst [vmem:[#allocation118_spill] sm:$0xff] %v3465_v34  ;;  %v1725_v56 = vmul.f32 %v3395_v59, %v1501_v3  ;;  %v1733_v15 = vmul.f32 %v3408_v23, %v1525_v28  ;;  %v2346_v55 = vsel %vm1012_vm8, 1.0, %v4675_v49  ;;  %vm1036_vm9 = vcmp.ge.f32.partialorder %v3456_v4, 0.0 }
 0x1f0   : > { %vm1060_vm10 = vcmp.ge.f32.partialorder %v3461_v39, 0.0  ;;  %v3478_v10 = vsub.f32 %v1701_v17, %v1709_v41  ;;  %v2354_v57 = vsel %vm1036_vm9, 1.0, %v4675_v49  ;;  %v3485_v18 = vsub.f32 %v3465_v34, %v2338_v20 }
 0x1f1   : > { %v3482_v27 = vsel %vm1060_vm10, 1.0, %v4675_v49  ;;  %v1741_v3 = vsub.f32 %v1725_v56, %v1733_v15  ;;  %v1228_v24 = vsub.f32 %v2338_v20, %v2346_v55  ;;  %v1236_v22 = vsub.f32 %v2346_v55, %v2354_v57 }
 0x1f2   : > { %4751 = vst [vmem:[#allocation119_spill] sm:$0xff] %v3478_v10  ;;  %4752 = vst [vmem:[#allocation120_spill] sm:$0xff] %v3482_v27  ;;  %v3488_v28 = vsub.f32 %v2354_v57, %v3482_v27  ;;  %v1917_v46 = vmul.f32 %v3383_v33, %v3478_v10  ;;  %v1340_v17 = vmul.f32 %v3442_v29, %v3485_v18  ;;  %v3495_v41 = vadd.f32 -0.6, %v2836_v31 }
 0x1f3   : > { %4753 = vst [vmem:[#allocation121_spill] sm:$0xff] %v3485_v18  ;;  %v3498_v59 = vadd.f32 -1.0, %v2836_v31  ;;  %v1925_v34 = vmul.f32 %v3408_v23, %v1741_v3  ;;  %v1348_v56 = vmul.f32 %v3453_v8, %v1228_v24  ;;  %v1364_v20 = vmul.f32 %v3445_v52, %v1228_v24 }
 0x1f4   : > { %4754 = vst [vmem:[#allocation122_spill] sm:$0xff] %v3488_v28  ;;  %4755 = vst [vmem:[#allocation123_spill] sm:$0xff] %v3495_v41  ;;  %v1372_v15 = vmul.f32 %v3456_v4, %v1236_v22  ;;  %v1388_v55 = vmul.f32 %v3453_v8, %v1236_v22  ;;  %v1396_v57 = vmul.f32 %v3461_v39, %v3488_v28  ;;  %v3508_v33 = vadd.f32 -1.4, %v2836_v31 }
 0x1f5   : > { %4756 = vst [vmem:[#allocation124_spill] sm:$0xff] %v3498_v59  ;;  %v3511_v27 = vadd.f32 -1.8, %v2836_v31  ;;  %v1933_v10 = vsub.f32 %v1917_v46, %v1925_v34  ;;  %v3513_v18 = vsub.f32 %v1340_v17, %v1348_v56  ;;  %v3516_v3 = vadd.f32 -2.2, %v2836_v31 }
 0x1f6   : > { %4757 = vst [vmem:[#allocation125_spill] sm:$0xff] %v3508_v33  ;;  %v1380_v23 = vsub.f32 %v1364_v20, %v1372_v15  ;;  %v3518_v24 = vsub.f32 %v1388_v55, %v1396_v57  ;;  %vm1084_vm11 = vcmp.ge.f32.partialorder %v3495_v41, 0.0  ;;  %vm1108_vm12 = vcmp.ge.f32.partialorder %v3498_v59, 0.0 }
 0x1f7   : > { %4758 = vst [vmem:[#allocation126_spill] sm:$0xff] %v3511_v27  ;;  %4759 = vst [vmem:[#allocation127_spill] sm:$0xff] %v3513_v18  ;;  %vm1132_vm13 = vcmp.ge.f32.partialorder %v3508_v33, 0.0  ;;  %2046 = vmatpush1.msra.mxu0 %v1933_v10  ;;  %v1580_v22 = vmul.f32 %v3442_v29, %v3513_v18  ;;  %v3528_v17 = vsel %vm1084_vm11, 1.0, %v4675_v49  ;;  %v2378_v20 = vsel %vm1108_vm12, 1.0, %v4675_v49 }
 0x1f8   : > { %4760 = vst [vmem:[#allocation128_spill] sm:$0xff] %v3518_v24  ;;  %v1588_v46 = vmul.f32 %v3456_v4, %v1380_v23  ;;  %v1604_v34 = vmul.f32 %v3445_v52, %v1380_v23  ;;  %4761 = vst [vmem:[#allocation129_spill] sm:$0xff] %v3528_v17  ;;  %v1612_v56 = vmul.f32 %v3461_v39, %v3518_v24  ;;  %v2386_v15 = vsel %vm1132_vm13, 1.0, %v4675_v49 }
 0x1f9   : > { %vm1156_vm14 = vcmp.ge.f32.partialorder %v3511_v27, 0.0  ;;  %vm1180_vm15 = vcmp.ge.f32.partialorder %v3516_v3, 0.0  ;;  %v3540_v57 = vsub.f32 %v3528_v17, %v2378_v20  ;;  %v1268_v24 = vsub.f32 %v2378_v20, %v2386_v15 }
 0x1fa   : > { %v3535_v10 = vsub.f32 %v1580_v22, %v1588_v46  ;;  %v2394_v55 = vsel %vm1156_vm14, 1.0, %v4675_v49  ;;  %v3542_v23 = vsub.f32 %v1604_v34, %v1612_v56  ;;  %v2402_v28 = vsel %vm1180_vm15, 1.0, %v4675_v49 }
 0x1fb   : > { %4763 = vst [vmem:[#allocation131_spill] sm:$0xff] %v3540_v57  ;;  %v1276_v4 = vsub.f32 %v2386_v15, %v2394_v55  ;;  %v1284_v18 = vsub.f32 %v2394_v55, %v2402_v28  ;;  %v1460_v22 = vmul.f32 %v3495_v41, %v3540_v57  ;;  %v3550_v46 = vadd.f32 1.4, %v2795_v32 }
 0x1fc   : > { %4762 = vst [vmem:[#allocation130_spill] sm:$0xff] %v3535_v10  ;;  %4764 = vst [vmem:[#allocation132_spill] sm:$0xff] %v3542_v23  ;;  %v1796_v8 = vmul.f32 %v3442_v29, %v3535_v10  ;;  %v1804_v17 = vmul.f32 %v3461_v39, %v3542_v23  ;;  %v1468_v34 = vmul.f32 %v3508_v33, %v1268_v24  ;;  %v3560_v28 = vadd.f32 1.0, %v2795_v32 }
 0x1fd   : > { %4765 = vst [vmem:[#allocation133_spill] sm:$0xff] %v3550_v46  ;;  %v1484_v56 = vmul.f32 %v3498_v59, %v1268_v24  ;;  %v1492_v20 = vmul.f32 %v3511_v27, %v1276_v4  ;;  %v1508_v15 = vmul.f32 %v3508_v33, %v1276_v4  ;;  %v1516_v29 = vmul.f32 %v3516_v3, %v1284_v18 }
 0x1fe   : > { %4766 = vst [vmem:[#allocation134_spill] sm:$0xff] %v3560_v28  ;;  %v3563_v55 = vadd.f32 0.6, %v2795_v32  ;;  %v1812_v57 = vsub.f32 %v1796_v8, %v1804_v17  ;;  %v3565_v10 = vsub.f32 %v1460_v22, %v1468_v34  ;;  %v3568_v39 = vadd.f32 0.2, %v2795_v32 }
 0x1ff   : > { %v1500_v23 = vsub.f32 %v1484_v56, %v1492_v20  ;;  %v1524_v24 = vsub.f32 %v1508_v15, %v1516_v29  ;;  %v3571_v52 = vadd.f32 -0.2, %v2795_v32  ;;  %vm963_vm0 = vcmp.ge.f32.partialorder %v3550_v46, 0.0 }
 0x200   : > { %4767 = vst [vmem:[#allocation135_spill] sm:$0xff] %v3563_v55  ;;  %4768 = vst [vmem:[#allocation136_spill] sm:$0xff] %v3565_v10  ;;  %vm987_vm1 = vcmp.ge.f32.partialorder %v3560_v28, 0.0  ;;  %1952 = vmatprep.subr.mxu1 %v1812_v57  ;;  %v1700_v4 = vmul.f32 %v3495_v41, %v3565_v10  ;;  %v3580_v17 = vsel %vm963_vm0, 1.0, %v4675_v49  ;;  %vm1011_vm2 = vcmp.ge.f32.partialorder %v3563_v55, 0.0 }
 0x201   : > { %4769 = vst [vmem:[#allocation137_spill] sm:$0xff] %v3568_v39  ;;  %4770 = vst [vmem:[#allocation138_spill] sm:$0xff] %v3571_v52  ;;  %v1708_v8 = vmul.f32 %v3511_v27, %v1500_v23  ;;  %v1724_v18 = vmul.f32 %v3498_v59, %v1500_v23  ;;  %v1732_v29 = vmul.f32 %v3516_v3, %v1524_v24  ;;  %v2337_v22 = vsel %vm987_vm1, 1.0, %v4675_v49 }
 0x202   : > { %4771 = vst [vmem:[#allocation139_spill] sm:$0xff] %v3580_v17  ;;  %vm1035_vm3 = vcmp.ge.f32.partialorder %v3568_v39, 0.0  ;;  %v2345_v57 = vsel %vm1011_vm2, 1.0, %v4675_v49  ;;  %vm1059_vm4 = vcmp.ge.f32.partialorder %v3571_v52, 0.0  ;;  %v3595_v15 = vsub.f32 %v3580_v17, %v2337_v22 }
 0x203   : > { %v3586_v34 = vsub.f32 %v1700_v4, %v1708_v8  ;;  %v2353_v56 = vsel %vm1035_vm3, 1.0, %v4675_v49  ;;  %v1740_v23 = vsub.f32 %v1724_v18, %v1732_v29  ;;  %v3592_v20 = vsel %vm1059_vm4, 1.0, %v4675_v49 }
 0x204   : > { %4773 = vst [vmem:[#allocation141_spill] sm:$0xff] %v3592_v20  ;;  %4774 = vst [vmem:[#allocation142_spill] sm:$0xff] %v3595_v15  ;;  %v1227_v24 = vsub.f32 %v2337_v22, %v2345_v57  ;;  %v1235_v33 = vsub.f32 %v2345_v57, %v2353_v56  ;;  %v3600_v4 = vsub.f32 %v2353_v56, %v3592_v20  ;;  %v3603_v8 = vadd.f32 -0.6, %v2795_v32 }
 0x205   : > { %4772 = vst [vmem:[#allocation140_spill] sm:$0xff] %v3586_v34  ;;  %v1916_v27 = vmul.f32 %v3495_v41, %v3586_v34  ;;  %v1924_v10 = vmul.f32 %v3516_v3, %v1740_v23  ;;  %v1339_v18 = vmul.f32 %v3550_v46, %v3595_v15  ;;  %v3615_v56 = vadd.f32 -1.0, %v2795_v32 }
 0x206   : > { %4775 = vst [vmem:[#allocation143_spill] sm:$0xff] %v3600_v4  ;;  %4776 = vst [vmem:[#allocation144_spill] sm:$0xff] %v3603_v8  ;;  %v1347_v29 = vmul.f32 %v3563_v55, %v1227_v24  ;;  %v1363_v59 = vmul.f32 %v3560_v28, %v1227_v24  ;;  %v1371_v22 = vmul.f32 %v3568_v39, %v1235_v33  ;;  %v3620_v3 = vadd.f32 -1.4, %v2795_v32 }
 0x207   : > { %v1387_v41 = vmul.f32 %v3563_v55, %v1235_v33  ;;  %v1395_v57 = vmul.f32 %v3571_v52, %v3600_v4  ;;  %4777 = vst [vmem:[#allocation145_spill] sm:$0xff] %v3615_v56  ;;  %v1932_v20 = vsub.f32 %v1916_v27, %v1924_v10  ;;  %v3623_v23 = vadd.f32 -1.8, %v2795_v32 }
 0x208   : > { %v3617_v34 = vsub.f32 %v1339_v18, %v1347_v29  ;;  %4779 = vst [vmem:[#allocation147_spill] sm:$0xff] %v3620_v3  ;;  %v1379_v24 = vsub.f32 %v1363_v59, %v1371_v22  ;;  %v3628_v33 = vadd.f32 -2.2, %v2795_v32  ;;  %vm1083_vm5 = vcmp.ge.f32.partialorder %v3603_v8, 0.0 }
 0x209   : > { %4780 = vst [vmem:[#allocation148_spill] sm:$0xff] %v3623_v23  ;;  %v3625_v17 = vsub.f32 %v1387_v41, %v1395_v57  ;;  %2047 = vmatprep.subr.mxu0 %v1932_v20  ;;  %v3634_v10 = vsel %vm1083_vm5, 1.0, %v4675_v49  ;;  %vm1107_vm6 = vcmp.ge.f32.partialorder %v3615_v56, 0.0  ;;  %vm1131_vm7 = vcmp.ge.f32.partialorder %v3620_v3, 0.0 }
 0x20a   : > { %4778 = vst [vmem:[#allocation146_spill] sm:$0xff] %v3617_v34  ;;  %v1579_v27 = vmul.f32 %v3550_v46, %v3617_v34  ;;  %4782 = vst [vmem:[#allocation150_spill] sm:$0xff] %v3634_v10  ;;  %v1587_v59 = vmul.f32 %v3568_v39, %v1379_v24  ;;  %v1603_v41 = vmul.f32 %v3560_v28, %v1379_v24  ;;  %v2377_v29 = vsel %vm1107_vm6, 1.0, %v4675_v49 }
 0x20b   : > { %4781 = vst [vmem:[#allocation149_spill] sm:$0xff] %v3625_v17  ;;  %v1611_v18 = vmul.f32 %v3571_v52, %v3625_v17  ;;  %v2385_v20 = vsel %vm1131_vm7, 1.0, %v4675_v49  ;;  %vm1155_vm8 = vcmp.ge.f32.partialorder %v3623_v23, 0.0  ;;  %vm1179_vm9 = vcmp.ge.f32.partialorder %v3628_v33, 0.0 }
 0x20c   : > { %v3647_v22 = vsub.f32 %v3634_v10, %v2377_v29  ;;  %v3649_v57 = vsub.f32 %v1579_v27, %v1587_v59  ;;  %v2393_v24 = vsel %vm1155_vm8, 1.0, %v4675_v49  ;;  %v2401_v39 = vsel %vm1179_vm9, 1.0, %v4675_v49 }
 0x20d   : > { %v3651_v4 = vsub.f32 %v1603_v41, %v1611_v18  ;;  %v1267_v17 = vsub.f32 %v2377_v29, %v2385_v20  ;;  %v1275_v55 = vsub.f32 %v2385_v20, %v2393_v24  ;;  %v1283_v34 = vsub.f32 %v2393_v24, %v2401_v39  ;;  %v1940_v41 = vld [vmem:[%s4405_s4 + $0x8] sm:$0xff] }
 0x20e   : > { %4783 = vst [vmem:[#allocation151_spill] sm:$0xff] %v3647_v22  ;;  %v1459_v28 = vmul.f32 %v3603_v8, %v3647_v22  ;;  %v1795_v15 = vmul.f32 %v3550_v46, %v3649_v57  ;;  %v1322_v27 = vmul.f32 %v2825_v25, %v2867_v62  ;;  %v1330_v59 = vmul.f32 %v2831_v1, %v2869_v37 }
 0x20f   : > { %4784 = vst [vmem:[#allocation152_spill] sm:$0xff] %v3651_v4  ;;  %v1803_v10 = vmul.f32 %v3571_v52, %v3651_v4  ;;  %v1467_v39 = vmul.f32 %v3620_v3, %v1267_v17  ;;  %v1483_v18 = vmul.f32 %v3615_v56, %v1267_v17  ;;  %v1491_v29 = vmul.f32 %v3623_v23, %v1275_v55 }
 0x210   : > { %v1507_v20 = vmul.f32 %v3620_v3, %v1275_v55  ;;  %2010 = vmatprep.mubr.f32.mxu1 %v1940_v41  ;;  %v1515_v4 = vmul.f32 %v3628_v33, %v1283_v34  ;;  %v3673_v52 = vsub.f32 %v1322_v27, %v1330_v59  ;;  %v1570_v37 = vmul.f32 %v2839_v48, %v2894_v50 }
 0x211   : > { %v1811_v24 = vsub.f32 %v1795_v15, %v1803_v10  ;;  %v3677_v22 = vsub.f32 %v1459_v28, %v1467_v39  ;;  %v1499_v46 = vsub.f32 %v1483_v18, %v1491_v29  ;;  %v1786_v1 = vmul.f32 %v2842_v26, %v2912_v44 }
 0x212   : > { %v2231_v17 = vadd.f32 1.8, %v2789_v43  ;;  %v1523_v62 = vsub.f32 %v1507_v20, %v1515_v4  ;;  %v1562_v55 = vmul.f32 %v2825_v25, %v3673_v52  ;;  %v1329_v34 = vmul.f32 %v2801_v5, %v2953_v53 }
 0x213   : > { %4785 = vst [vmem:[#allocation153_spill] sm:$0xff] %v3677_v22  ;;  %1953 = vmatpush1.msra.mxu1 %v1811_v24  ;;  %v1569_v15 = vmul.f32 %v2808_v14, %v2978_v51  ;;  %v1699_v50 = vmul.f32 %v3603_v8, %v3677_v22  ;;  %v1707_v28 = vmul.f32 %v3623_v23, %v1499_v46  ;;  %v2230_v41 = vadd.f32 1.8, %v2805_v6  ;;  %v4798_v23 = vld [vmem:[#allocation110_spill] sm:$0xff]  ;;  %v4801_v22 = vld [vmem:[#allocation113_spill] sm:$0xff] }
 0x214   : > { %v1723_v44 = vmul.f32 %v3615_v56, %v1499_v46  ;;  %vm945_vm10 = vcmp.ge.f32.partialorder %v2231_v17, 0.0  ;;  %v1731_v10 = vmul.f32 %v3628_v33, %v1523_v62  ;;  %v3693_v4 = vsub.f32 %v1562_v55, %v1570_v37 }
 0x215   : > { %v3696_v27 = vsel %vm945_vm10, 1.0, %v4675_v49  ;;  %v1785_v53 = vmul.f32 %v2816_v19, %v2998_v42  ;;  %v3700_v59 = vsub.f32 %v1699_v50, %v1707_v28  ;;  %v1328_v46 = vmul.f32 %v3002_v47, %v3046_v21 }
 0x216   : > { %v3704_v51 = vsub.f32 %v3696_v27, %v2927_v7  ;;  %v1739_v62 = vsub.f32 %v1723_v44, %v1731_v10  ;;  %v1778_v39 = vmul.f32 %v2825_v25, %v3693_v4  ;;  %v1568_v18 = vmul.f32 %v3013_v2, %v3073_v11  ;;  %v4787_v44 = vld [vmem:[#allocation74_spill] sm:$0xff] }
 0x217   : > { %4786 = vst [vmem:[#allocation154_spill] sm:$0xff] %v3700_v59  ;;  %v3715_v42 = vmul.f32 %v3020_v35, %v3095_v58  ;;  %v1915_v7 = vmul.f32 %v3603_v8, %v3700_v59  ;;  %vm944_vm11 = vcmp.ge.f32.partialorder %v2230_v41, 0.0  ;;  %v2229_v20 = vadd.f32 1.8, %v2791_v13  ;;  %v4792_v8 = vld [vmem:[#allocation92_spill] sm:$0xff] }
 0x218   : > { %v1321_v29 = vmul.f32 %v2231_v17, %v3704_v51  ;;  %v1923_v21 = vmul.f32 %v3628_v33, %v1739_v62  ;;  %v1794_v24 = vsub.f32 %v1778_v39, %v1786_v1  ;;  %v3723_v25 = vsel %vm944_vm11, 1.0, %v4675_v49  ;;  %v4788_v62 = vld [vmem:[#allocation88_spill] sm:$0xff] }
 0x219   : > { %v1327_v11 = vmul.f32 %v3120_v0, %v3155_v54  ;;  %v3731_v58 = vsub.f32 %v3723_v25, %v3030_v30  ;;  %vm943_vm12 = vcmp.ge.f32.partialorder %v2229_v20, 0.0  ;;  %v1567_v55 = vmul.f32 %v3123_v60, %v3177_v36 }
 0x21a   : > { %v3727_v37 = vsub.f32 %v1321_v29, %v1329_v34  ;;  %v1931_v50 = vsub.f32 %v1915_v7, %v1923_v21  ;;  %1954 = vmatprep.subr.mxu1 %v1794_v24  ;;  %v3736_v1 = vsel %vm943_vm12, 1.0, %v4675_v49  ;;  %v1783_v33 = vmul.f32 %v3128_v45, %v3209_v40  ;;  %v4789_v40 = vld [vmem:[#allocation75_spill] sm:$0xff]  ;;  %v4794_v45 = vld [vmem:[#allocation93_spill] sm:$0xff] }
 0x21b   : > { %v2228_v54 = vadd.f32 1.8, %v2813_v9  ;;  %v1320_v28 = vmul.f32 %v2230_v41, %v3731_v58  ;;  %v3745_v30 = vsub.f32 %v3736_v1, %v3140_v61  ;;  %v1326_v36 = vmul.f32 %v3225_v12, %v3265_v38  ;;  %v4790_v38 = vld [vmem:[#allocation78_spill] sm:$0xff] }
 0x21c   : > { %v1561_v34 = vmul.f32 %v2231_v17, %v3727_v37  ;;  %2048 = vmatpush1.msra.mxu0 %v1931_v50  ;;  %v1566_v10 = vmul.f32 %v4787_v44, %v3293_v16  ;;  %v3753_v39 = vmul.f32 %v4789_v40, %v4788_v62  ;;  %v2227_v7 = vadd.f32 1.8, %v2793_v63  ;;  %v4791_v16 = vld [vmem:[#allocation100_spill] sm:$0xff] }
 0x21d   : > { %vm942_vm13 = vcmp.ge.f32.partialorder %v2228_v54, 0.0  ;;  %v3758_v21 = vsub.f32 %v1320_v28, %v1328_v46  ;;  %v1319_v61 = vmul.f32 %v2229_v20, %v3745_v30  ;;  %v1325_v62 = vmul.f32 %v4792_v8, %v4791_v16  ;;  %v4793_v40 = vld [vmem:[#allocation104_spill] sm:$0xff]  ;;  %v4799_v16 = vld [vmem:[#allocation95_spill] sm:$0xff] }
 0x21e   : > { %v3756_v29 = vsub.f32 %v1561_v34, %v1569_v15  ;;  %v3762_v24 = vsel %vm942_vm13, 1.0, %v4675_v49  ;;  %vm941_vm14 = vcmp.ge.f32.partialorder %v2227_v7, 0.0  ;;  %v1565_v35 = vmul.f32 %v4794_v45, %v4793_v40 }
 0x21f   : > { %v3766_v50 = vsub.f32 %v3762_v24, %v4790_v38  ;;  %v1560_v46 = vmul.f32 %v2230_v41, %v3758_v21  ;;  %v3774_v34 = vsub.f32 %v1319_v61, %v1327_v11  ;;  %v3777_v28 = vsel %vm941_vm14, 1.0, %v4675_v49  ;;  %v4796_v38 = vld [vmem:[#allocation97_spill] sm:$0xff] }
 0x220   : > { %v1777_v15 = vmul.f32 %v2231_v17, %v3756_v29  ;;  %4795 = vst [vmem:[#allocation88_spill] sm:$0xff] %v3777_v28  ;;  %v3782_v26 = vsub.f32 %v3777_v28, %v4796_v38  ;;  %v1781_v59 = vmul.f32 %v4799_v16, %v4798_v23  ;;  %v2226_v40 = vadd.f32 1.8, %v2836_v31  ;;  %v4800_v61 = vld [vmem:[#allocation121_spill] sm:$0xff]  ;;  %v4802_v38 = vld [vmem:[#allocation127_spill] sm:$0xff]  ;;  %v4803_v28 = vld [vmem:[#allocation114_spill] sm:$0xff] }
 0x221   : > { %v1318_v19 = vmul.f32 %v2228_v54, %v3766_v50  ;;  %v3787_v17 = vsub.f32 %v1560_v46, %v1568_v18  ;;  %v1559_v11 = vmul.f32 %v2229_v20, %v3774_v34  ;;  %v1324_v56 = vmul.f32 %v4801_v22, %v4800_v61  ;;  %v4805_v18 = vld [vmem:[#allocation130_spill] sm:$0xff] }
 0x222   : > { %4797 = vst [vmem:[#allocation78_spill] sm:$0xff] %v3782_v26  ;;  %v1793_v3 = vsub.f32 %v1777_v15, %v1785_v53  ;;  %v1317_v8 = vmul.f32 %v2227_v7, %v3782_v26  ;;  %vm940_vm15 = vcmp.ge.f32.partialorder %v2226_v40, 0.0  ;;  %v1564_v63 = vmul.f32 %v4803_v28, %v4802_v38  ;;  %v4806_v15 = vld [vmem:[#allocation115_spill] sm:$0xff]  ;;  %v4807_v61 = vld [vmem:[#allocation118_spill] sm:$0xff] }
 0x223   : > { %v3792_v45 = vsub.f32 %v1318_v19, %v1326_v36  ;;  %v1776_v23 = vmul.f32 %v2230_v41, %v3787_v17  ;;  %v3798_v16 = vsub.f32 %v1559_v11, %v1567_v55  ;;  %v3801_v53 = vsel %vm940_vm15, 1.0, %v4675_v49  ;;  %v4808_v11 = vld [vmem:[#allocation142_spill] sm:$0xff]  ;;  %v4811_v26 = vld [vmem:[#allocation135_spill] sm:$0xff] }
 0x224   : > { %1955 = vmatpush1.msra.mxu1 %v1793_v3  ;;  %4804 = vst [vmem:[#allocation100_spill] sm:$0xff] %v3801_v53  ;;  %v1780_v46 = vmul.f32 %v4806_v15, %v4805_v18  ;;  %v3806_v36 = vsub.f32 %v1317_v8, %v1325_v62  ;;  %v3810_v22 = vsub.f32 %v3801_v53, %v4807_v61  ;;  %v2225_v3 = vadd.f32 1.8, %v2795_v32  ;;  %v4809_v38 = vld [vmem:[#allocation134_spill] sm:$0xff]  ;;  %v4817_v32 = vld [vmem:[#allocation13_spill] sm:$0xff] }
 0x225   : > { %v1558_v19 = vmul.f32 %v2228_v54, %v3792_v45  ;;  %v1792_v41 = vsub.f32 %v1776_v23, %v3715_v42  ;;  %v1775_v55 = vmul.f32 %v2229_v20, %v3798_v16  ;;  %v1323_v28 = vmul.f32 %v4809_v38, %v4808_v11  ;;  %v4810_v31 = vld [vmem:[#allocation146_spill] sm:$0xff]  ;;  %v4812_v42 = vld [vmem:[#allocation137_spill] sm:$0xff] }
 0x226   : > { %v1563_v18 = vmul.f32 %v4811_v26, %v4810_v31  ;;  %v1557_v8 = vmul.f32 %v2227_v7, %v3806_v36  ;;  %v1316_v62 = vmul.f32 %v2226_v40, %v3810_v22  ;;  %vm939_vm0 = vcmp.ge.f32.partialorder %v2225_v3, 0.0  ;;  %v4813_v23 = vld [vmem:[#allocation6_spill] sm:$0xff] }
 0x227   : > { %v3819_v15 = vsub.f32 %v1558_v19, %v1566_v10  ;;  %1956 = vmatprep.subr.mxu1 %v1792_v41  ;;  %v1791_v61 = vsub.f32 %v1775_v55, %v1783_v33  ;;  %v3824_v53 = vsel %vm939_vm0, 1.0, %v4675_v49  ;;  %v1779_v20 = vmul.f32 %v4812_v42, %v3649_v57  ;;  %v4814_v19 = vld [vmem:[#allocation139_spill] sm:$0xff]  ;;  %v4815_v33 = vld [vmem:[#allocation21_spill] sm:$0xff]  ;;  %v4816_v41 = vld [vmem:[#allocation12_spill] sm:$0xff] }
 0x228   : > { %v2224_v11 = vadd.f32 2.2, %v4813_v23  ;;  %v3830_v31 = vsub.f32 %v1557_v8, %v1565_v35  ;;  %v3832_v10 = vsub.f32 %v1316_v62, %v1324_v56  ;;  %v3836_v26 = vsub.f32 %v3824_v53, %v4814_v19  ;;  %v4818_v19 = vld [vmem:[#allocation4_spill] sm:$0xff] }
 0x229   : > { %v1774_v38 = vmul.f32 %v2228_v54, %v3819_v15  ;;  %1957 = vmatpush1.msra.mxu1 %v1791_v61  ;;  %v1306_v55 = vmul.f32 %v4816_v41, %v4815_v33  ;;  %v1546_v57 = vmul.f32 %v4817_v32, %v3673_v52  ;;  %v3844_v42 = vmul.f32 %v2839_v48, %v3693_v4 }
 0x22a   : > { %vm922_vm1 = vcmp.ge.f32.partialorder %v2224_v11, 0.0  ;;  %v1773_v56 = vmul.f32 %v2227_v7, %v3830_v31  ;;  %v1556_v54 = vmul.f32 %v2226_v40, %v3832_v10  ;;  %v1315_v8 = vmul.f32 %v2225_v3, %v3836_v26  ;;  %v4819_v7 = vld [vmem:[#allocation20_spill] sm:$0xff] }
 0x22b   : > { %v1790_v35 = vsub.f32 %v1774_v38, %v3753_v39  ;;  %v2320_v62 = vsel %vm922_vm1, 1.0, %v4675_v49  ;;  %v2223_v61 = vadd.f32 2.2, %v2789_v43  ;;  %v1305_v33 = vmul.f32 %v4818_v19, %v3704_v51  ;;  %v4820_v51 = vld [vmem:[#allocation37_spill] sm:$0xff] }
 0x22c   : > { %v1545_v52 = vmul.f32 %v2801_v5, %v3727_v37  ;;  %v1789_v4 = vsub.f32 %v1773_v56, %v1781_v59  ;;  %v3856_v41 = vsub.f32 %v1556_v54, %v1564_v63  ;;  %v3858_v39 = vsub.f32 %v1315_v8, %v1323_v28 }
 0x22d   : > { %1958 = vmatprep.subr.mxu1 %v1790_v35  ;;  %v1210_v38 = vsub.f32 %v2320_v62, %v4819_v7  ;;  %vm921_vm2 = vcmp.ge.f32.partialorder %v2223_v61, 0.0  ;;  %v3863_v32 = vmul.f32 %v2808_v14, %v3756_v29  ;;  %v2222_v48 = vadd.f32 2.2, %v2805_v6  ;;  %v4904_v14 = vld [vmem:[#allocation125_spill] sm:$0xff] }
 0x22e   : > { %v1304_v19 = vmul.f32 %v4820_v51, %v3731_v58  ;;  %1959 = vmatpush1.msra.mxu1 %v1789_v4  ;;  %v1772_v37 = vmul.f32 %v2226_v40, %v3856_v41  ;;  %v1555_v63 = vmul.f32 %v2225_v3, %v3858_v39  ;;  %v2319_v28 = vsel %vm921_vm2, 1.0, %v4675_v49 }
 0x22f   : > { %v1298_v59 = vmul.f32 %v2224_v11, %v1210_v38  ;;  %v1209_v35 = vsub.f32 %v2319_v28, %v3696_v27  ;;  %vm920_vm3 = vcmp.ge.f32.partialorder %v2222_v48, 0.0  ;;  %v1544_v29 = vmul.f32 %v3002_v47, %v3758_v21  ;;  %v4821_v27 = vld [vmem:[#allocation55_spill] sm:$0xff] }
 0x230   : > { %v3876_v56 = vmul.f32 %v3013_v2, %v3787_v17  ;;  %v1788_v54 = vsub.f32 %v1772_v37, %v1780_v46  ;;  %v3878_v58 = vsub.f32 %v1555_v63, %v1563_v18  ;;  %v2318_v40 = vsel %vm920_vm3, 1.0, %v4675_v49 }
 0x231   : > { %v1314_v8 = vsub.f32 %v1298_v59, %v1306_v55  ;;  %v1297_v62 = vmul.f32 %v2223_v61, %v1209_v35  ;;  %v1208_v4 = vsub.f32 %v2318_v40, %v3723_v25  ;;  %v2221_v7 = vadd.f32 2.2, %v2791_v13  ;;  %v4822_v59 = vld [vmem:[#allocation72_spill] sm:$0xff] }
 0x232   : > { %v1303_v38 = vmul.f32 %v4821_v27, %v3745_v30  ;;  %1960 = vmatprep.subr.mxu1 %v1788_v54  ;;  %v1771_v21 = vmul.f32 %v2225_v3, %v3878_v58  ;;  %v1543_v17 = vmul.f32 %v3120_v0, %v3774_v34  ;;  %v3890_v46 = vmul.f32 %v3123_v60, %v3798_v16  ;;  %v4897_v60 = vld [vmem:[#allocation120_spill] sm:$0xff] }
 0x233   : > { %v1538_v51 = vmul.f32 %v2224_v11, %v1314_v8  ;;  %v1313_v18 = vsub.f32 %v1297_v62, %v1305_v33  ;;  %v1296_v55 = vmul.f32 %v2222_v48, %v1208_v4  ;;  %vm919_vm4 = vcmp.ge.f32.partialorder %v2221_v7, 0.0  ;;  %v4823_v62 = vld [vmem:[#allocation2_spill] sm:$0xff] }
 0x234   : > { %v2220_v25 = vadd.f32 2.2, %v2813_v9  ;;  %v1787_v37 = vsub.f32 %v1771_v21, %v1779_v20  ;;  %v2317_v30 = vsel %vm919_vm4, 1.0, %v4675_v49  ;;  %v1302_v3 = vmul.f32 %v4822_v59, %v3766_v50  ;;  %v4824_v4 = vld [vmem:[#allocation78_spill] sm:$0xff]  ;;  %v4826_v21 = vld [vmem:[#allocation92_spill] sm:$0xff] }
 0x235   : > { %v1554_v63 = vsub.f32 %v1538_v51, %v1546_v57  ;;  %v1537_v28 = vmul.f32 %v2223_v61, %v1313_v18  ;;  %v1312_v35 = vsub.f32 %v1296_v55, %v1304_v19  ;;  %v1207_v34 = vsub.f32 %v2317_v30, %v3736_v1  ;;  %v4828_v55 = vld [vmem:[#allocation15_spill] sm:$0xff] }
 0x236   : > { %vm918_vm5 = vcmp.ge.f32.partialorder %v2220_v25, 0.0  ;;  %1961 = vmatpush1.msra.mxu1 %v1787_v37  ;;  %v1542_v54 = vmul.f32 %v3225_v12, %v3792_v45  ;;  %v1758_v20 = vmul.f32 %v4787_v44, %v3819_v15  ;;  %v3905_v1 = vadd.f32 2.2, %v4823_v62  ;;  %v4877_v12 = vld [vmem:[#allocation83_spill] sm:$0xff] }
 0x237   : > { %v1754_v16 = vmul.f32 %v2224_v11, %v1554_v63  ;;  %v2316_v33 = vsel %vm918_vm5, 1.0, %v4675_v49  ;;  %v1553_v57 = vsub.f32 %v1537_v28, %v1545_v52  ;;  %v1536_v8 = vmul.f32 %v2222_v48, %v1312_v35  ;;  %v4825_v11 = vld [vmem:[#allocation91_spill] sm:$0xff]  ;;  %v4829_v63 = vld [vmem:[#allocation112_spill] sm:$0xff]  ;;  %v4830_v28 = vld [vmem:[#allocation113_spill] sm:$0xff] }
 0x238   : > { %v1295_v40 = vmul.f32 %v2221_v7, %v1207_v34  ;;  %v1206_v50 = vsub.f32 %v2316_v33, %v3762_v24  ;;  %v1301_v27 = vmul.f32 %v4825_v11, %v4824_v4  ;;  %v3911_v51 = vmul.f32 %v4826_v21, %v3806_v36  ;;  %v4827_v24 = vld [vmem:[#allocation93_spill] sm:$0xff] }
 0x239   : > { %v1770_v19 = vsub.f32 %v1754_v16, %v3844_v42  ;;  %v1753_v45 = vmul.f32 %v2223_v61, %v1553_v57  ;;  %v1552_v18 = vsub.f32 %v1536_v8, %v1544_v29  ;;  %vm917_vm6 = vcmp.ge.f32.partialorder %v3905_v1, 0.0  ;;  %v4833_v57 = vld [vmem:[#allocation3_spill] sm:$0xff] }
 0x23a   : > { %v1311_v15 = vsub.f32 %v1295_v40, %v1303_v38  ;;  %v1294_v52 = vmul.f32 %v2220_v25, %v1206_v50  ;;  %v3916_v42 = vmul.f32 %v4827_v24, %v3830_v31  ;;  %v3919_v37 = vadd.f32 2.2, %v4828_v55  ;;  %v4831_v31 = vld [vmem:[#allocation114_spill] sm:$0xff]  ;;  %v4834_v40 = vld [vmem:[#allocation133_spill] sm:$0xff] }
 0x23b   : > { %1962 = vmatprep.subr.mxu1 %v1770_v19  ;;  %v1300_v30 = vmul.f32 %v4829_v63, %v3810_v22  ;;  %v1769_v36 = vsub.f32 %v1753_v45, %v3863_v32  ;;  %v1752_v59 = vmul.f32 %v2222_v48, %v1552_v18  ;;  %v2315_v38 = vsel %vm917_vm6, 1.0, %v4675_v49  ;;  %v4832_v32 = vld [vmem:[#allocation88_spill] sm:$0xff]  ;;  %v4837_v45 = vld [vmem:[#allocation135_spill] sm:$0xff] }
 0x23c   : > { %v1535_v61 = vmul.f32 %v2221_v7, %v1311_v15  ;;  %v1310_v29 = vsub.f32 %v1294_v52, %v1302_v3  ;;  %vm916_vm7 = vcmp.ge.f32.partialorder %v3919_v37, 0.0  ;;  %v1540_v35 = vmul.f32 %v4830_v28, %v3832_v10  ;;  %v4835_v10 = vld [vmem:[#allocation134_spill] sm:$0xff]  ;;  %v4875_v28 = vld [vmem:[#allocation80_spill] sm:$0xff] }
 0x23d   : > { %v3930_v34 = vmul.f32 %v4831_v31, %v3856_v41  ;;  %1963 = vmatpush1.msra.mxu1 %v1769_v36  ;;  %v1768_v16 = vsub.f32 %v1752_v59, %v3876_v56  ;;  %v1205_v48 = vsub.f32 %v2315_v38, %v4832_v32  ;;  %v2314_v3 = vsel %vm916_vm7, 1.0, %v4675_v49  ;;  %v4840_v32 = vld [vmem:[#allocation27_spill] sm:$0xff] }
 0x23e   : > { %v1551_v22 = vsub.f32 %v1535_v61, %v1543_v17  ;;  %v1534_v33 = vmul.f32 %v2220_v25, %v1310_v29  ;;  %v3936_v8 = vadd.f32 2.2, %v4833_v57  ;;  %v1299_v50 = vmul.f32 %v4834_v40, %v3836_v26  ;;  %v4836_v17 = vld [vmem:[#allocation100_spill] sm:$0xff] }
 0x23f   : > { %v3942_v19 = vmul.f32 %v4835_v10, %v3858_v39  ;;  %1964 = vmatprep.subr.mxu1 %v1768_v16  ;;  %v1293_v56 = vmul.f32 %v3905_v1, %v1205_v48  ;;  %v1204_v11 = vsub.f32 %v2314_v3, %v4836_v17  ;;  %v3949_v18 = vmul.f32 %v4837_v45, %v3878_v58  ;;  %v4841_v48 = vld [vmem:[#allocation14_spill] sm:$0xff]  ;;  %v4843_v17 = vld [vmem:[#allocation24_spill] sm:$0xff] }
 0x240   : > { %v1751_v41 = vmul.f32 %v2221_v7, %v1551_v22  ;;  %v1550_v4 = vsub.f32 %v1534_v33, %v1542_v54  ;;  %vm915_vm8 = vcmp.ge.f32.partialorder %v3936_v8, 0.0  ;;  %v2216_v15 = vmul.f32 -1.442695, %v4813_v23 }
 0x241   : > { %v2215_v26 = vmul.f32 -1.442695, %v2789_v43  ;;  %v1309_v63 = vsub.f32 %v1293_v56, %v1301_v27  ;;  %v1292_v7 = vmul.f32 %v3919_v37, %v1204_v11  ;;  %v2313_v54 = vsel %vm915_vm8, 1.0, %v4675_v49  ;;  %v4842_v56 = vld [vmem:[#allocation29_spill] sm:$0xff] }
 0x242   : > { %v1767_v39 = vsub.f32 %v1751_v41, %v3890_v46  ;;  %v1750_v52 = vmul.f32 %v2220_v25, %v1550_v4  ;;  %2436 = vpow2.f32 %v2216_v15  ;;  %v2214_v36 = vmul.f32 -1.442695, %v2805_v6  ;;  %v4844_v15 = vld [vmem:[#allocation30_spill] sm:$0xff] }
 0x243   : > { %v2213_v59 = vmul.f32 -1.442695, %v2791_v13  ;;  %v1533_v61 = vmul.f32 %v3905_v1, %v1309_v63  ;;  %v1308_v29 = vsub.f32 %v1292_v7, %v1300_v30  ;;  %v1203_v38 = vsub.f32 %v2313_v54, %v3824_v53  ;;  %v4838_v30 = vld [vmem:[#allocation23_spill] sm:$0xff]  ;;  %v4839_v53 = vld [vmem:[#allocation18_spill] sm:$0xff] }
 0x244   : > { %1965 = vmatpush1.msra.mxu1 %v1767_v39  ;;  %v1766_v58 = vsub.f32 %v1750_v52, %v1758_v20  ;;  %2438 = vpow2.f32 %v2215_v26  ;;  %v2212_v46 = vmul.f32 -1.442695, %v2813_v9  ;;  %v2211_v25 = vmul.f32 -1.442695, %v4823_v62  ;;  %v4845_v26 = vld [vmem:[#allocation25_spill] sm:$0xff] }
 0x245   : > { %v2210_v27 = vmul.f32 -1.442695, %v4828_v55  ;;  %v1549_v49 = vsub.f32 %v1533_v61, %v3911_v51  ;;  %v1532_v16 = vmul.f32 %v3919_v37, %v1308_v29  ;;  %v1291_v22 = vmul.f32 %v3936_v8, %v1203_v38  ;;  %v4850_v29 = vld [vmem:[#allocation41_spill] sm:$0xff] }
 0x246   : > { %1966 = vmatprep.subr.mxu1 %v1766_v58  ;;  %2440 = vpow2.f32 %v2214_v36  ;;  %v2209_v20 = vmul.f32 -1.442695, %v4833_v57  ;;  %v1442_v33 = vmul.f32 %v4839_v53, %v4838_v30  ;;  %v1450_v3 = vmul.f32 %v4841_v48, %v4840_v32  ;;  %v4848_v36 = vld [vmem:[#allocation33_spill] sm:$0xff] }
 0x247   : > { %2442 = vpow2.f32 %v2213_v59  ;;  %v1749_v40 = vmul.f32 %v3905_v1, %v1549_v49  ;;  %v1548_v41 = vsub.f32 %v1532_v16, %v1540_v35  ;;  %v1307_v4 = vsub.f32 %v1291_v22, %v1299_v50  ;;  %v4846_v35 = vld [vmem:[#allocation32_spill] sm:$0xff]  ;;  %v4847_v50 = vld [vmem:[#allocation10_spill] sm:$0xff]  ;;  %v4856_v32 = vld [vmem:[#allocation53_spill] sm:$0xff] }
 0x248   : > { %2444 = vpow2.f32 %v2212_v46  ;;  %v3972_v51 = vsub.f32 %v1442_v33, %v1450_v3  ;;  %v1690_v11 = vmul.f32 %v4843_v17, %v4842_v56  ;;  %v3978_v39 = vmul.f32 %v4845_v26, %v4844_v15  ;;  %v4849_v59 = vld [vmem:[#allocation8_spill] sm:$0xff]  ;;  %v4860_v56 = vld [vmem:[#allocation61_spill] sm:$0xff]  ;;  %v4861_v15 = vld [vmem:[#allocation50_spill] sm:$0xff] }
 0x249   : > { %2446 = vpow2.f32 %v2211_v25  ;;  %v1765_v52 = vsub.f32 %v1749_v40, %v3916_v42  ;;  %v1748_v63 = vmul.f32 %v3919_v37, %v1548_v41  ;;  %v1531_v7 = vmul.f32 %v3936_v8, %v1307_v4  ;;  %v4851_v37 = vld [vmem:[#allocation34_spill] sm:$0xff]  ;;  %v4852_v46 = vld [vmem:[#allocation44_spill] sm:$0xff]  ;;  %v4853_v25 = vld [vmem:[#allocation35_spill] sm:$0xff] }
 0x24a   : > { %2448 = vpow2.f32 %v2210_v27  ;;  %v1682_v1 = vmul.f32 %v4839_v53, %v3972_v51  ;;  %v1441_v54 = vmul.f32 %v4847_v50, %v4846_v35  ;;  %v1449_v58 = vmul.f32 %v4849_v59, %v4848_v36  ;;  %v4854_v22 = vld [vmem:[#allocation52_spill] sm:$0xff]  ;;  %v4858_v40 = vld [vmem:[#allocation58_spill] sm:$0xff]  ;;  %v4859_v41 = vld [vmem:[#allocation49_spill] sm:$0xff] }
 0x24b   : > { %2450 = vpow2.f32 %v2209_v20  ;;  %1967 = vmatpush1.msra.mxu1 %v1765_v52  ;;  %v1764_v61 = vsub.f32 %v1748_v63, %v3930_v34  ;;  %v1547_v42 = vsub.f32 %v1531_v7, %v3942_v19  ;;  %v1689_v38 = vmul.f32 %v4851_v37, %v4850_v29  ;;  %v4855_v20 = vld [vmem:[#allocation45_spill] sm:$0xff]  ;;  %v4857_v3 = vld [vmem:[#allocation48_spill] sm:$0xff]  ;;  %v4864_v52 = vld [vmem:[#allocation62_spill] sm:$0xff] }
 0x24c   : > { %v3995_v27 = vmul.f32 %v4853_v25, %v4852_v46  ;;  %v3997_v49 = vsub.f32 %v1682_v1, %v1690_v11  ;;  %v3999_v16 = vsub.f32 %v1441_v54, %v1449_v58  ;;  %v4003_v33 = vsub.f32 %v4855_v20, %v4854_v22  ;;  %v4863_v11 = vld [vmem:[#allocation69_spill] sm:$0xff]  ;;  %v4866_v36 = vld [vmem:[#allocation70_spill] sm:$0xff]  ;;  %v4868_v46 = vld [vmem:[#allocation60_spill] sm:$0xff] }
 0x24d   : > { %v1448_v34 = vmul.f32 %v4857_v3, %v4856_v32  ;;  %1968 = vmatprep.subr.mxu1 %v1764_v61  ;;  %v1747_v19 = vmul.f32 %v3936_v8, %v1547_v42  ;;  %v1688_v4 = vmul.f32 %v4859_v41, %v4858_v40  ;;  %v4012_v26 = vmul.f32 %v4861_v15, %v4860_v56  ;;  %v4865_v8 = vld [vmem:[#allocation43_spill] sm:$0xff]  ;;  %v4867_v58 = vld [vmem:[#allocation65_spill] sm:$0xff]  ;;  %v4869_v22 = vld [vmem:[#allocation76_spill] sm:$0xff] }
 0x24e   : > { %v4016_v63 = vsub.f32 %v4864_v52, %v4863_v11  ;;  %v4020_v7 = vmul.f32 %v4839_v53, %v3997_v49  ;;  %v1681_v1 = vmul.f32 %v4847_v50, %v3999_v16  ;;  %v1440_v54 = vmul.f32 %v4865_v8, %v4003_v33  ;;  %v4870_v20 = vld [vmem:[#allocation66_spill] sm:$0xff]  ;;  %v4871_v53 = vld [vmem:[#allocation79_spill] sm:$0xff] }
 0x24f   : > { %4862 = vst [vmem:[#allocation104_spill] sm:$0xff] %v4012_v26  ;;  %v1447_v61 = vmul.f32 %v4867_v58, %v4866_v36  ;;  %v2437_v42 = vpop.eup %2436  ;;  %v1763_v29 = vsub.f32 %v1747_v19, %v3949_v18  ;;  %v1687_v32 = vmul.f32 %v4870_v20, %v4869_v22  ;;  %v4872_v40 = vld [vmem:[#allocation67_spill] sm:$0xff]  ;;  %v4876_v22 = vld [vmem:[#allocation89_spill] sm:$0xff]  ;;  %vm1942_vm9 = vcmask 261120  }
 0x250   : > { %v1439_v25 = vmul.f32 %v4868_v46, %v4016_v63  ;;  %v4035_v56 = vmul.f32 %v4872_v40, %v4871_v53  ;;  %v794_v15 = vadd.f32 1.0, %v2437_v42  ;;  %v4039_v52 = vsub.f32 %v1681_v1, %v1689_v38  ;;  %v4874_v19 = vld [vmem:[#allocation87_spill] sm:$0xff]  ;;  %v4878_v40 = vld [vmem:[#allocation94_spill] sm:$0xff]  ;;  %v4879_v42 = vld [vmem:[#allocation84_spill] sm:$0xff] }
 0x251   : > { %v4041_v36 = vsub.f32 %v1440_v54, %v1448_v34  ;;  %v2439_v10 = vpop.eup %2438  ;;  %1969 = vmatpush1.msra.mxu1 %v1763_v29  ;;  %v4047_v21 = vsub.f32 %v4875_v28, %v4874_v19  ;;  %v1446_v53 = vmul.f32 %v4877_v12, %v4876_v22  ;;  %v1686_v0 = vmul.f32 %v4879_v42, %v4878_v40  ;;  %v4880_v29 = vld [vmem:[#allocation77_spill] sm:$0xff]  ;;  %v4881_v19 = vld [vmem:[#allocation98_spill] sm:$0xff] }
 0x252   : > { %4873 = vst [vmem:[#allocation97_spill] sm:$0xff] %v4035_v56  ;;  %v4043_v18 = vsub.f32 %v1439_v25, %v1447_v61  ;;  %2452 = vrcp.f32 %v794_v15  ;;  %v793_v38 = vadd.f32 1.0, %v2439_v10  ;;  %v4055_v34 = vmul.f32 %v4847_v50, %v4039_v52  ;;  %v4882_v22 = vld [vmem:[#allocation85_spill] sm:$0xff] }
 0x253   : > { %v2441_v47 = vpop.eup %2440  ;;  %v1680_v1 = vmul.f32 %v4865_v8, %v4041_v36  ;;  %v1438_v25 = vmul.f32 %v4880_v29, %v4047_v21  ;;  %v4065_v40 = vmul.f32 %v4882_v22, %v4881_v19  ;;  %v4905_v56 = vld [vmem:[#allocation117_spill] sm:$0xff] }
 0x254   : > { %v2443_v54 = vpop.eup %2442  ;;  %v792_v61 = vadd.f32 1.0, %v2441_v47  ;;  %v1679_v28 = vmul.f32 %v4868_v46, %v4043_v18  ;;  %2454 = vrcp.f32 %v793_v38  ;;  %v4885_v38 = vld [vmem:[#allocation108_spill] sm:$0xff] }
 0x255   : > { %4883 = vst [vmem:[#allocation110_spill] sm:$0xff] %v4065_v40  ;;  %v2445_v10 = vpop.eup %2444  ;;  %v791_v15 = vadd.f32 1.0, %v2443_v54  ;;  %v4069_v11 = vsub.f32 %v1680_v1, %v1688_v4  ;;  %v4073_v31 = vsub.f32 %v1438_v25, %v1446_v53  ;;  %v4886_v54 = vld [vmem:[#allocation99_spill] sm:$0xff]  ;;  %v4903_v25 = vld [vmem:[#allocation136_spill] sm:$0xff] }
 0x256   : > { %v2447_v5 = vpop.eup %2446  ;;  %2456 = vrcp.f32 %v792_v61  ;;  %v790_v47 = vadd.f32 1.0, %v2445_v10  ;;  %v4071_v45 = vsub.f32 %v1679_v28, %v1687_v32  ;;  %v4081_v22 = vsub.f32 %v4886_v54, %v4885_v38  ;;  %v4889_v61 = vld [vmem:[#allocation96_spill] sm:$0xff]  ;;  %v4890_v10 = vld [vmem:[#allocation109_spill] sm:$0xff]  ;;  %v4894_v54 = vld [vmem:[#allocation119_spill] sm:$0xff] }
 0x257   : > { %v2449_v24 = vpop.eup %2448  ;;  %2458 = vrcp.f32 %v791_v15  ;;  %v789_v44 = vadd.f32 1.0, %v2447_v5  ;;  %v4077_v19 = vmul.f32 %v4865_v8, %v4069_v11  ;;  %v1678_v53 = vmul.f32 %v4880_v29, %v4073_v31  ;;  %v4893_v38 = vld [vmem:[#allocation105_spill] sm:$0xff] }
 0x258   : > { %4887 = vst [vmem:[#allocation127_spill] sm:$0xff] %v4081_v22  ;;  %v2451_v4 = vpop.eup %2450  ;;  %2460 = vrcp.f32 %v790_v47  ;;  %v788_v1 = vadd.f32 1.0, %v2449_v24  ;;  %v4085_v32 = vmul.f32 %v4868_v46, %v4071_v45  ;;  %v1437_v28 = vmul.f32 %v4889_v61, %v4081_v22  ;;  %v4891_v46 = vld [vmem:[#allocation103_spill] sm:$0xff]  ;;  %v4892_v47 = vld [vmem:[#allocation116_spill] sm:$0xff]  ;;  %v4896_v8 = vld [vmem:[#allocation129_spill] sm:$0xff] }
 0x259   : > { %4884 = vst [vmem:[#allocation121_spill] sm:$0xff] %v4077_v19  ;;  %2462 = vrcp.f32 %v789_v44  ;;  %v787_v5 = vadd.f32 1.0, %v2451_v4  ;;  %v4095_v24 = vsub.f32 %v1678_v53, %v1686_v0  ;;  %v1445_v15 = vmul.f32 %v4891_v46, %v4890_v10  ;;  %v4895_v4 = vld [vmem:[#allocation106_spill] sm:$0xff]  ;;  %v4901_v53 = vld [vmem:[#allocation131_spill] sm:$0xff]  ;;  %v4902_v10 = vld [vmem:[#allocation124_spill] sm:$0xff] }
 0x25a   : > { %4888 = vst [vmem:[#allocation130_spill] sm:$0xff] %v4085_v32  ;;  %2464 = vrcp.f32 %v788_v1  ;;  %v1685_v44 = vmul.f32 %v4893_v38, %v4892_v47  ;;  %v4103_v50 = vmul.f32 %v4895_v4, %v4894_v54  ;;  %v4107_v2 = vsub.f32 %v4897_v60, %v4896_v8  ;;  %v4906_v4 = vld [vmem:[#allocation140_spill] sm:$0xff]  ;;  %v4907_v32 = vld [vmem:[#allocation126_spill] sm:$0xff]  ;;  %v4909_v8 = vld [vmem:[#allocation141_spill] sm:$0xff] }
 0x25b   : > { %2466 = vrcp.f32 %v787_v5  ;;  %v4111_v1 = vmul.f32 %v4880_v29, %v4095_v24  ;;  %v4113_v0 = vsub.f32 %v1437_v28, %v1445_v15  ;;  %v1444_v5 = vmul.f32 %v4902_v10, %v4901_v53  ;;  %v4908_v60 = vld [vmem:[#allocation150_spill] sm:$0xff]  ;;  %v4911_v29 = vld [vmem:[#allocation151_spill] sm:$0xff]  ;;  %v4912_v28 = vld [vmem:[#allocation145_spill] sm:$0xff] }
 0x25c   : > { %4898 = vst [vmem:[#allocation118_spill] sm:$0xff] %v4107_v2  ;;  %v1684_v47 = vmul.f32 %v4904_v14, %v4903_v25  ;;  %v1436_v54 = vmul.f32 %v4905_v56, %v4107_v2  ;;  %v4123_v38 = vmul.f32 %v4907_v32, %v4906_v4  ;;  %v4127_v26 = vsub.f32 %v4909_v8, %v4908_v60  ;;  %v4913_v14 = vld [vmem:[#allocation153_spill] sm:$0xff]  ;;  %v4914_v10 = vld [vmem:[#allocation147_spill] sm:$0xff]  ;;  %v4915_v19 = vld [vmem:[#allocation154_spill] sm:$0xff] }
 0x25d   : > { %4899 = vst [vmem:[#allocation142_spill] sm:$0xff] %v4111_v1  ;;  %4900 = vst [vmem:[#allocation146_spill] sm:$0xff] %v4113_v0  ;;  %v1443_v15 = vmul.f32 %v4912_v28, %v4911_v29  ;;  %v1677_v25 = vmul.f32 %v4889_v61, %v4113_v0  ;;  %v1683_v2 = vmul.f32 %v4914_v10, %v4913_v14  ;;  %v4916_v46 = vld [vmem:[#allocation148_spill] sm:$0xff]  ;;  %v4917_v60 = vld [vmem:[#allocation138_spill] sm:$0xff] }
 0x25e   : > { %4910 = vst [vmem:[#allocation6_spill] sm:$0xff] %v4127_v26  ;;  %v4139_v32 = vmul.f32 %v4916_v46, %v4915_v19  ;;  %v4141_v4 = vsub.f32 %v1436_v54, %v1444_v5  ;;  %v1435_v8 = vmul.f32 %v4917_v60, %v4127_v26  ;;  %v4918_v22 = vld [vmem:[#allocation22_spill] sm:$0xff]  ;;  %v4919_v29 = vld [vmem:[#allocation17_spill] sm:$0xff]  ;;  %v4920_v53 = vld [vmem:[#allocation19_spill] sm:$0xff]  ;;  %v1666_v14 = vmul.f32 %v4841_v48, %v3972_v51 }
 0x25f   : > { %v1418_v28 = vmul.f32 %v4919_v29, %v4918_v22  ;;  %v1426_v40 = vmul.f32 %v4920_v53, %v4838_v30  ;;  %v2453_v1 = vpop.eup %2452  ;;  %v4149_v0 = vsub.f32 %v1677_v25, %v1685_v44  ;;  %v4155_v19 = vmul.f32 %v4843_v17, %v3997_v49  ;;  %v4921_v46 = vld [vmem:[#allocation31_spill] sm:$0xff]  ;;  %v4922_v5 = vld [vmem:[#allocation9_spill] sm:$0xff] }
 0x260   : > { %v1417_v54 = vmul.f32 %v4922_v5, %v4921_v46  ;;  %v818_v10 = vmul.f32 %v2453_v1, %v4813_v23  ;;  %v1676_v22 = vmul.f32 %v4905_v56, %v4141_v4  ;;  %v4162_v26 = vsub.f32 %v1435_v8, %v1443_v15  ;;  %v4923_v17 = vld [vmem:[#allocation11_spill] sm:$0xff] }
 0x261   : > { %v4164_v30 = vsub.f32 %v1418_v28, %v1426_v40  ;;  %v2455_v44 = vpop.eup %2454  ;;  %v4168_v51 = vmul.f32 %v4889_v61, %v4149_v0  ;;  %v1425_v49 = vmul.f32 %v4923_v17, %v4846_v35  ;;  %v1665_v25 = vmul.f32 %v4849_v59, %v3999_v16 }
 0x262   : > { %v4176_v23 = vmul.f32 %v4851_v37, %v4039_v52  ;;  %1970 = vmatprep.subr.mxu1 %v818_v10  ;;  %v817_v40 = vmul.f32 %v2455_v44, %v2789_v43  ;;  %v4179_v28 = vsub.f32 %v1676_v22, %v1684_v47  ;;  %v1675_v61 = vmul.f32 %v4917_v60, %v4162_v26  ;;  %v4924_v52 = vld [vmem:[#allocation46_spill] sm:$0xff] }
 0x263   : > { %v2457_v1 = vpop.eup %2456  ;;  %v1658_v15 = vmul.f32 %v4919_v29, %v4164_v30  ;;  %v1909_v16 = vsub.f32 %v4168_v51, %v4103_v50  ;;  %v4188_v37 = vsub.f32 %v1417_v54, %v1425_v49  ;;  %v4925_v10 = vld [vmem:[#allocation42_spill] sm:$0xff]  ;;  %v4964_v51 = vld [vmem:[#allocation16_spill] sm:$0xff] }
 0x264   : > { %v2459_v35 = vpop.eup %2458  ;;  %v816_v8 = vmul.f32 %v2457_v1, %v2805_v6  ;;  %v1416_v46 = vmul.f32 %v4925_v10, %v4924_v52  ;;  %1971 = vmatpush1.msra.mxu1 %v817_v40  ;;  %v4195_v22 = vmul.f32 %v4905_v56, %v4179_v28  ;;  %v4197_v44 = vsub.f32 %v1675_v61, %v1683_v2  ;;  %v4926_v1 = vld [vmem:[#allocation47_spill] sm:$0xff]  ;;  %v4963_v50 = vld [vmem:[#allocation26_spill] sm:$0xff] }
 0x265   : > { %v2461_v43 = vpop.eup %2460  ;;  %v815_v47 = vmul.f32 %v2459_v35, %v2791_v13  ;;  %v4199_v59 = vsub.f32 %v1658_v15, %v1666_v14  ;;  %v1657_v49 = vmul.f32 %v4922_v5, %v4188_v37  ;;  %v1424_v40 = vmul.f32 %v4926_v1, %v4003_v33  ;;  %v4928_v52 = vld [vmem:[#allocation59_spill] sm:$0xff] }
 0x266   : > { %v2463_v6 = vpop.eup %2462  ;;  %1972 = vmatprep.subr.mxu1 %v816_v8  ;;  %v814_v54 = vmul.f32 %v2461_v43, %v2813_v9  ;;  %v1664_v13 = vmul.f32 %v4857_v3, %v4041_v36  ;;  %v1908_v56 = vsub.f32 %v4195_v22, %v4123_v38  ;;  %v1891_v14 = vmul.f32 %v4917_v60, %v4197_v44  ;;  %v4932_v22 = vld [vmem:[#allocation82_spill] sm:$0xff] }
 0x267   : > { %v2465_v35 = vpop.eup %2464  ;;  %1973 = vmatpush1.msra.mxu1 %v815_v47  ;;  %v813_v2 = vmul.f32 %v2463_v6, %v4823_v62  ;;  %v1874_v9 = vmul.f32 %v4919_v29, %v4199_v59  ;;  %v4216_v15 = vsub.f32 %v1657_v49, %v1665_v25  ;;  %v4218_v36 = vsub.f32 %v1416_v46, %v1424_v40  ;;  %v4927_v29 = vld [vmem:[#allocation63_spill] sm:$0xff]  ;;  %v4935_v40 = vld [vmem:[#allocation101_spill] sm:$0xff] }
 0x268   : > { %v2467_v61 = vpop.eup %2466  ;;  %1974 = vmatprep.subr.mxu1 %v814_v54  ;;  %v812_v33 = vmul.f32 %v2465_v35, %v4828_v55  ;;  %v4222_v62 = vmul.f32 %v4859_v41, %v4069_v11  ;;  %v1907_v60 = vsub.f32 %v1891_v14, %v4139_v32  ;;  %v1415_v43 = vmul.f32 %v4928_v52, %v4927_v29  ;;  %v4929_v41 = vld [vmem:[#allocation64_spill] sm:$0xff]  ;;  %v4931_v46 = vld [vmem:[#allocation75_spill] sm:$0xff]  ;;  %v4939_v14 = vld [vmem:[#allocation146_spill] sm:$0xff] }
 0x269   : > { %1975 = vmatpush1.msra.mxu1 %v813_v2  ;;  %v811_v38 = vmul.f32 %v2467_v61, %v4833_v57  ;;  %v1890_v8 = vsub.f32 %v1874_v9, %v4155_v19  ;;  %v1873_v55 = vmul.f32 %v4922_v5, %v4216_v15  ;;  %v1656_v25 = vmul.f32 %v4925_v10, %v4218_v36  ;;  %v4930_v19 = vld [vmem:[#allocation81_spill] sm:$0xff]  ;;  %v4937_v2 = vld [vmem:[#allocation127_spill] sm:$0xff]  ;;  %v4942_v61 = vld [vmem:[#allocation104_spill] sm:$0xff] }
 0x26a   : > { %1976 = vmatprep.subr.mxu1 %v812_v33  ;;  %v1423_v11 = vmul.f32 %v4929_v41, %v4016_v63  ;;  %v1663_v57 = vmul.f32 %v4867_v58, %v4043_v18  ;;  %v1879_v32 = vmul.f32 %v4870_v20, %v4071_v45  ;;  %v1414_v47 = vmul.f32 %v4931_v46, %v4930_v19  ;;  %v4941_v9 = vld [vmem:[#allocation121_spill] sm:$0xff]  ;;  %v4946_v29 = vld [vmem:[#allocation115_spill] sm:$0xff] }
 0x26b   : > { %1977 = vmatpush1.msra.mxu1 %v811_v38  ;;  %v1422_v6 = vmul.f32 %v4932_v22, %v4047_v21  ;;  %v1662_v5 = vmul.f32 %v4877_v12, %v4073_v31  ;;  %v4933_v54 = vsub.f32 %v4020_v7, %v3978_v39  ;;  %v1889_v63 = vsub.f32 %v1873_v55, %v4176_v23  ;;  %v4936_v31 = vld [vmem:[#allocation95_spill] sm:$0xff]  ;;  %v4938_v39 = vld [vmem:[#allocation102_spill] sm:$0xff] }
 0x26c   : > { %v1672_v18 = vsub.f32 %v1656_v25, %v1664_v13  ;;  %v4249_v49 = vsub.f32 %v1415_v43, %v1423_v11  ;;  %v1878_v45 = vmul.f32 %v4879_v42, %v4095_v24  ;;  %v4934_v20 = vsub.f32 %v4055_v34, %v3995_v27  ;;  %v4940_v23 = vld [vmem:[#allocation103_spill] sm:$0xff]  ;;  %v4944_v34 = vld [vmem:[#allocation105_spill] sm:$0xff]  ;;  %v4945_v38 = vld [vmem:[#allocation122_spill] sm:$0xff] }
 0x26d   : > { %1978 = vmatprep.subr.mxu1 %v4933_v54  ;;  %v4256_v21 = vsub.f32 %v1414_v47, %v1422_v6  ;;  %v1413_v35 = vmul.f32 %v4936_v31, %v4935_v40  ;;  %v1421_v7 = vmul.f32 %v4938_v39, %v4937_v2  ;;  %v1661_v13 = vmul.f32 %v4940_v23, %v4939_v14  ;;  %v4947_v55 = vld [vmem:[#allocation130_spill] sm:$0xff]  ;;  %v4948_v25 = vld [vmem:[#allocation97_spill] sm:$0xff] }
 0x26e   : > { %1979 = vmatpush2.msra.mxu1 %v4934_v20  ;;  %v4943_v33 = vsub.f32 %v4941_v9, %v4942_v61  ;;  %v1872_v42 = vmul.f32 %v4925_v10, %v1672_v18  ;;  %v1655_v27 = vmul.f32 %v4928_v52, %v4249_v49  ;;  %v1877_v24 = vmul.f32 %v4944_v34, %v4149_v0  ;;  %v4950_v6 = vld [vmem:[#allocation118_spill] sm:$0xff]  ;;  %v4951_v10 = vld [vmem:[#allocation123_spill] sm:$0xff]  ;;  %v4952_v20 = vld [vmem:[#allocation124_spill] sm:$0xff] }
 0x26f   : > { %v1412_v43 = vmul.f32 %v4946_v29, %v4945_v38  ;;  %v4949_v11 = vsub.f32 %v4947_v55, %v4948_v25  ;;  %v1654_v19 = vmul.f32 %v4931_v46, %v4256_v21  ;;  %v4279_v47 = vsub.f32 %v1413_v35, %v1421_v7  ;;  %v4953_v2 = vld [vmem:[#allocation142_spill] sm:$0xff]  ;;  %v4957_v38 = vld [vmem:[#allocation143_spill] sm:$0xff]  ;;  %v4958_v55 = vld [vmem:[#allocation137_spill] sm:$0xff] }
 0x270   : > { %1980 = vmatprep.subr.mxu1 %v4943_v33  ;;  %v1420_v54 = vmul.f32 %v4951_v10, %v4950_v6  ;;  %v1660_v40 = vmul.f32 %v4952_v20, %v4141_v4  ;;  %v4954_v0 = vld [vmem:[#allocation110_spill] sm:$0xff]  ;;  %v1888_v9 = vsub.f32 %v1872_v42, %v4222_v62  ;;  %v1671_v61 = vsub.f32 %v1655_v27, %v1663_v57  ;;  %v4956_v33 = vld [vmem:[#allocation125_spill] sm:$0xff]  ;;  %v4960_v6 = vld [vmem:[#allocation144_spill] sm:$0xff] }
 0x271   : > { %1981 = vmatpush2.msra.mxu1 %v4949_v11  ;;  %v4955_v14 = vsub.f32 %v4953_v2, %v4954_v0  ;;  %v1876_v34 = vmul.f32 %v4956_v33, %v4179_v28  ;;  %v1411_v35 = vmul.f32 %v4958_v55, %v4957_v38  ;;  %v1670_v7 = vsub.f32 %v1654_v19, %v1662_v5  ;;  %v4959_v11 = vld [vmem:[#allocation6_spill] sm:$0xff]  ;;  %v4961_v28 = vld [vmem:[#allocation145_spill] sm:$0xff]  ;;  %v4962_v27 = vld [vmem:[#allocation147_spill] sm:$0xff] }
 0x272   : > { %v1653_v4 = vmul.f32 %v4936_v31, %v4279_v47  ;;  %v4298_v25 = vsub.f32 %v1412_v43, %v1420_v54  ;;  %v1419_v62 = vmul.f32 %v4960_v6, %v4959_v11  ;;  %v1871_v57 = vmul.f32 %v4928_v52, %v1671_v61  ;;  %v4966_v0 = vld [vmem:[#allocation7_spill] sm:$0xff]  ;;  %v4970_v11 = vld [vmem:[#allocation68_spill] sm:$0xff] }
 0x273   : > { %1982 = vmatprep.subr.mxu1 %v4955_v14  ;;  %v1659_v42 = vmul.f32 %v4961_v28, %v4162_v26  ;;  %v1875_v2 = vmul.f32 %v4962_v27, %v4197_v44  ;;  %v1870_v5 = vmul.f32 %v4931_v46, %v1670_v7  ;;  %v1642_v52 = vmul.f32 %v4920_v53, %v4164_v30  ;;  %v4965_v44 = vld [vmem:[#allocation36_spill] sm:$0xff] }
 0x274   : > { %1983 = vmatpush2.msra.mxu1 %v1909_v16  ;;  %v1634_v16 = vmul.f32 %v4964_v51, %v4963_v50  ;;  %v1669_v43 = vsub.f32 %v1653_v4, %v1661_v13  ;;  %v1652_v19 = vmul.f32 %v4946_v29, %v4298_v25  ;;  %v1427_v54 = vsub.f32 %v1411_v35, %v1419_v62  ;;  %v4967_v30 = vld [vmem:[#allocation8_spill] sm:$0xff]  ;;  %v4968_v35 = vld [vmem:[#allocation51_spill] sm:$0xff]  ;;  %v4971_v62 = vld [vmem:[#allocation57_spill] sm:$0xff] }
 0x275   : > { %1984 = vmatprep.subr.mxu1 %v1908_v56  ;;  %v1887_v56 = vsub.f32 %v1871_v57, %v1879_v32  ;;  %v1858_v26 = vmul.f32 %v4841_v48, %v4199_v59  ;;  %v1633_v14 = vmul.f32 %v4966_v0, %v4965_v44  ;;  %v1857_v32 = vmul.f32 %v4967_v30, %v4216_v15  ;;  %v4969_v48 = vld [vmem:[#allocation40_spill] sm:$0xff]  ;;  %v4972_v50 = vld [vmem:[#allocation86_spill] sm:$0xff]  ;;  %v4978_v30 = vld [vmem:[#allocation149_spill] sm:$0xff] }
 0x276   : > { %1985 = vmatpush2.msra.mxu1 %v1907_v60  ;;  %v1886_v60 = vsub.f32 %v1870_v5, %v1878_v45  ;;  %v1869_v46 = vmul.f32 %v4936_v31, %v1669_v43  ;;  %v1668_v13 = vsub.f32 %v1652_v19, %v1660_v40  ;;  %v1651_v33 = vmul.f32 %v4958_v55, %v1427_v54 }
 0x277   : > { %1986 = vmatprep.subr.mxu1 %v1890_v8  ;;  %v1650_v38 = vsub.f32 %v1634_v16, %v1642_v52  ;;  %v1641_v8 = vmul.f32 %v4923_v17, %v4188_v37  ;;  %v1632_v59 = vmul.f32 %v4969_v48, %v4968_v35  ;;  %v1640_v31 = vmul.f32 %v4926_v1, %v4218_v36  ;;  %v4975_v52 = vld [vmem:[#allocation93_spill] sm:$0xff] }
 0x278   : > { %1987 = vmatpush2.msra.mxu1 %v1889_v63  ;;  %v1885_v4 = vsub.f32 %v1869_v46, %v1877_v24  ;;  %v1868_v63 = vmul.f32 %v4946_v29, %v1668_v13  ;;  %v1667_v45 = vsub.f32 %v1651_v33, %v1659_v42  ;;  %v1856_v37 = vmul.f32 %v4857_v3, %v1672_v18 }
 0x279   : > { %1988 = vmatprep.subr.mxu1 %v1888_v9  ;;  %v1850_v40 = vmul.f32 %v4964_v51, %v1650_v38  ;;  %v1649_v9 = vsub.f32 %v1633_v14, %v1641_v8  ;;  %v1631_v15 = vmul.f32 %v4971_v62, %v4970_v11  ;;  %v1648_v24 = vsub.f32 %v1632_v59, %v1640_v31  ;;  %v4973_v51 = vld [vmem:[#allocation74_spill] sm:$0xff]  ;;  %v4980_v31 = vld [vmem:[#allocation28_spill] sm:$0xff] }
 0x27a   : > { %1989 = vmatpush2.msra.mxu1 %v1887_v56  ;;  %v1884_v57 = vsub.f32 %v1868_v63, %v1876_v34  ;;  %v1867_v27 = vmul.f32 %v4958_v55, %v1667_v45  ;;  %v1639_v29 = vmul.f32 %v4929_v41, %v4249_v49  ;;  %v1855_v36 = vmul.f32 %v4867_v58, %v1671_v61  ;;  %v4974_v56 = vld [vmem:[#allocation107_spill] sm:$0xff] }
 0x27b   : > { %1990 = vmatprep.subr.mxu1 %v1886_v60  ;;  %v1849_v42 = vmul.f32 %v4966_v0, %v1649_v9  ;;  %v1630_v16 = vmul.f32 %v4973_v51, %v4972_v50  ;;  %v1848_v18 = vmul.f32 %v4969_v48, %v1648_v24  ;;  %v1638_v34 = vmul.f32 %v4932_v22, %v4256_v21  ;;  %v4976_v21 = vld [vmem:[#allocation128_spill] sm:$0xff] }
 0x27c   : > { %1991 = vmatpush2.msra.mxu1 %v1885_v4  ;;  %v1883_v3 = vsub.f32 %v1867_v27, %v1875_v2  ;;  %v1647_v5 = vsub.f32 %v1631_v15, %v1639_v29  ;;  %v1866_v55 = vsub.f32 %v1850_v40, %v1858_v26  ;;  %v1629_v49 = vmul.f32 %v4975_v52, %v4974_v56  ;;  %v4977_v26 = vld [vmem:[#allocation114_spill] sm:$0xff]  ;;  %v4981_v40 = vld [vmem:[#allocation13_spill] sm:$0xff]  ;;  %v4987_v50 = vld [vmem:[#allocation56_spill] sm:$0xff] }
 0x27d   : > { %1992 = vmatprep.subr.mxu1 %v1884_v57  ;;  %v1865_v19 = vsub.f32 %v1849_v42, %v1857_v32  ;;  %v1637_v44 = vmul.f32 %v4938_v39, %v4279_v47  ;;  %v1864_v58 = vsub.f32 %v1848_v18, %v1856_v37  ;;  %v1646_v0 = vsub.f32 %v1630_v16, %v1638_v34  ;;  %v4979_v32 = vld [vmem:[#allocation135_spill] sm:$0xff]  ;;  %v4983_v15 = vld [vmem:[#allocation5_spill] sm:$0xff]  ;;  %v4984_v27 = vld [vmem:[#allocation54_spill] sm:$0xff] }
 0x27e   : > { %1993 = vmatpush2.msra.mxu1 %v1883_v3  ;;  %v1847_v61 = vmul.f32 %v4971_v62, %v1647_v5  ;;  %v1854_v2 = vmul.f32 %v4877_v12, %v1670_v7  ;;  %v1853_v60 = vmul.f32 %v4940_v23, %v1669_v43  ;;  %v1628_v46 = vmul.f32 %v4977_v26, %v4976_v21  ;;  %v4982_v62 = vld [vmem:[#allocation39_spill] sm:$0xff]  ;;  %v4993_v56 = vld [vmem:[#allocation113_spill] sm:$0xff] }
 0x27f   : > { %1994 = vmatprep.subr.mxu1 %v1866_v55  ;;  %v1645_v14 = vsub.f32 %v1629_v49, %v1637_v44  ;;  %v1636_v33 = vmul.f32 %v4951_v10, %v4298_v25  ;;  %v1846_v47 = vmul.f32 %v4973_v51, %v1646_v0  ;;  %v1627_v35 = vmul.f32 %v4979_v32, %v4978_v30 }
 0x280   : > { %1995 = vmatpush2.msra.mxu1 %v1865_v19  ;;  %v1863_v8 = vsub.f32 %v1847_v61, %v1855_v36  ;;  %v1635_v48 = vmul.f32 %v4960_v6, %v1427_v54  ;;  %v1852_v23 = vmul.f32 %v4952_v20, %v1668_v13  ;;  %v1851_v25 = vmul.f32 %v4961_v28, %v1667_v45  ;;  %v4985_v28 = vld [vmem:[#allocation38_spill] sm:$0xff]  ;;  %v4986_v36 = vld [vmem:[#allocation71_spill] sm:$0xff] }
 0x281   : > { %1996 = vmatprep.subr.mxu1 %v1864_v58  ;;  %v1845_v12 = vmul.f32 %v4975_v52, %v1645_v14  ;;  %v1644_v7 = vsub.f32 %v1628_v46, %v1636_v33  ;;  %v1862_v43 = vsub.f32 %v1846_v47, %v1854_v2  ;;  %v1826_v37 = vmul.f32 %v4981_v40, %v4980_v31  ;;  %v4994_v58 = vld [vmem:[#allocation152_spill] sm:$0xff] }
 0x282   : > { %1997 = vmatpush2.msra.mxu1 %v1863_v8  ;;  %v1643_v59 = vsub.f32 %v1627_v35, %v1635_v48  ;;  %v1834_v11 = vmul.f32 %v4920_v53, %v1650_v38  ;;  %v1825_v57 = vmul.f32 %v4983_v15, %v4982_v62  ;;  %v1833_v20 = vmul.f32 %v4923_v17, %v1649_v9  ;;  %v1941_v38 = vld [vmem:[%s4405_s4 + $0x10] sm:$0xff]  ;;  %v4988_v17 = vld [vmem:[#allocation90_spill] sm:$0xff]  ;;  %v4989_v9 = vld [vmem:[#allocation73_spill] sm:$0xff] }
 0x283   : > { %v1861_v4 = vsub.f32 %v1845_v12, %v1853_v60  ;;  %v1844_v63 = vmul.f32 %v4977_v26, %v1644_v7  ;;  %1998 = vmatprep.subr.mxu1 %v1862_v43  ;;  %v1824_v45 = vmul.f32 %v4985_v28, %v4984_v27  ;;  %v1832_v29 = vmul.f32 %v4926_v1, %v1648_v24  ;;  %v4990_v1 = vld [vmem:[#allocation111_spill] sm:$0xff]  ;;  %v4991_v24 = vld [vmem:[#allocation92_spill] sm:$0xff] }
 0x284   : > { %v1843_v54 = vmul.f32 %v4979_v32, %v1643_v59  ;;  %v1823_v51 = vmul.f32 %v4987_v50, %v4986_v36  ;;  %v1831_v53 = vmul.f32 %v4929_v41, %v1647_v5  ;;  %v1842_v16 = vsub.f32 %v1826_v37, %v1834_v11  ;;  %v4992_v5 = vld [vmem:[#allocation132_spill] sm:$0xff]  ;;  %2409 = vmatmul.mubr.msk.f32.vlgmr.msra.gmra.mxu0 %vm1942_vm9, %v1941_v38 }
 0x285   : > { %1999 = vmatpush2.msra.mxu1 %v1861_v4  ;;  %v1860_v13 = vsub.f32 %v1844_v63, %v1852_v23  ;;  %v1822_v3 = vmul.f32 %v4989_v9, %v4988_v17  ;;  %v1830_v18 = vmul.f32 %v4932_v22, %v1646_v0  ;;  %v1841_v34 = vsub.f32 %v1825_v57, %v1833_v20  ;;  %v4995_v22 = vld [vmem:[#allocation134_spill] sm:$0xff] }
 0x286   : > { %v1859_v42 = vsub.f32 %v1843_v54, %v1851_v25  ;;  %v1821_v55 = vmul.f32 %v4991_v24, %v4990_v1  ;;  %v1829_v19 = vmul.f32 %v4938_v39, %v1645_v14  ;;  %v1840_v41 = vsub.f32 %v1824_v45, %v1832_v29 }
 0x287   : > { %2000 = vmatprep.subr.mxu1 %v1860_v13  ;;  %v1820_v52 = vmul.f32 %v4993_v56, %v4992_v5  ;;  %v1828_v49 = vmul.f32 %v4951_v10, %v1644_v7  ;;  %v1839_v44 = vsub.f32 %v1823_v51, %v1831_v53  ;;  %v1819_v61 = vmul.f32 %v4995_v22, %v4994_v58  ;;  %v1939_v10 = vld [vmem:[%s4405_s4] sm:$0xff] }
 0x288   : > { %2001 = vmatpush2.msra.mxu1 %v1859_v42  ;;  %v1827_v0 = vmul.f32 %v4960_v6, %v1643_v59  ;;  %v1838_v2 = vsub.f32 %v1822_v3, %v1830_v18  ;;  %v1837_v39 = vsub.f32 %v1821_v55, %v1829_v19 }
 0x289   : > { %2002 = vmatprep.subr.mxu1 %v1842_v16  ;;  %v1836_v14 = vsub.f32 %v1820_v52, %v1828_v49 }
 0x28a   : > { %2003 = vmatpush2.msra.mxu1 %v1841_v34  ;;  %v1835_v60 = vsub.f32 %v1819_v61, %v1827_v0 }
 0x28b   : > { %2004 = vmatprep.subr.mxu1 %v1840_v41 }
 0x28c   : > { %2005 = vmatpush2.msra.mxu1 %v1839_v44 }
 0x28d   : > { %2006 = vmatprep.subr.mxu1 %v1838_v2 }
 0x28e   : > { %2007 = vmatpush2.msra.mxu1 %v1837_v39 }
 0x28f   : > { %2008 = vmatprep.subr.mxu1 %v1836_v14 }
 0x290   : > { %2009 = vmatpush2.msra.mxu1 %v1835_v60 }
 0x291   : > { %2011 = vmatmul.mubr.f32.vlgmr.msra.gmra.mxu1 %v1939_v10 }
 0x344   : > { %v2083_v21 = vpop.f32.mrf.mxu0 }
 0x346   : > { %v2085_v46 = vpop.f32.mrf.mxu0 }
 0x351   : > { %v2012_v6 = vpop.f32.mrf.mxu1 }
 0x352   : > { %v2084_v26 = vadd.f32 %v2083_v21, %v2012_v6 }
 0x353   : > { %v2014_v33 = vpop.f32.mrf.mxu1 }
 0x354   : > { %2088 = vst [vmem:[%s226_s10] sm:$0xff] %v2084_v26  ;;  %v2086_v8 = vadd.f32 %v2085_v46, %v2014_v33 }
 0x356   : > { %2089 = vst [vmem:[%s226_s10 + $0x8] sm:$0xff] %v2086_v8 }
 0x357 PF: > { %s15_s18 = sadd.s32 1, %s2474_s18  }
 0x358   : > { %p12_p4 = scmp.ge.s32.totalorder %s15_s18, 4  }
 0x35a   :  { %14 = sbr.rel (!%p12_p4) target bundleno = 1 (0x1), region = 70 }

</bundles_post_ra>
